<compile_context>
chip_gen: v6e
topology: v6e:2x2x1
jax: 0.10.0
libtpu: 0.0.40
codegen_flags: <defaults>
</compile_context>

<pallas_src>
import functools

import numpy as np
import jax
import jax.numpy as jnp
from jax.experimental import pallas as pl
from jax.experimental.pallas import tpu as pltpu

EPS = 1e-6
HALO_ROWS = 8            # sublane-aligned halo sub-block (supports kernel_size <= 17)


# ----------------------------------------------------------------------------
# helpers traced INSIDE the kernels
# ----------------------------------------------------------------------------
def _ln(x, g, b, eps):
    # torch LayerNorm / channels_first LN math (biased variance)
    u = jnp.mean(x, axis=-1, keepdims=True)
    xc = x - u
    var = jnp.mean(xc * xc, axis=-1, keepdims=True)
    return xc * jax.lax.rsqrt(var + eps) * g + b


def _tail_mask(y, tile_i, tile_t, t_valid):
    # Zero rows whose global index is >= the true sequence length so that the
    # zero-tail invariant needed by the depthwise-conv halo holds at every layer.
    rows = tile_i * tile_t + jax.lax.broadcasted_iota(jnp.int32, (1, tile_t, 1), 1)
    return jnp.where(rows < t_valid, y, 0.0)


def _halo_window(xl_ref, xc_ref, xr_ref):
    # Assemble (B, TILE + 2*HALO_ROWS, C): previous 8-row sub-block | current tile
    # | next 8-row sub-block, with the halos zeroed outside the sequence (this is
    # exactly the Conv1d zero-padding).  All concat pieces are sublane aligned.
    i = pl.program_id(0)
    n = pl.num_programs(0)
    xc = xc_ref[...]
    left = jnp.where(i > 0, xl_ref[...], 0.0)
    right = jnp.where(i < n - 1, xr_ref[...], 0.0)
    return xc, jnp.concatenate([left, xc, right], axis=1)


# ----------------------------------------------------------------------------
# Pallas kernels
# ----------------------------------------------------------------------------
def stem_kernel(xl_ref, xc_ref, xr_ref, w_ref, b_ref, g_ref, beta_ref, o_ref,
                *, K, eps, t_valid, mxu_dtype):
    # Conv1d(Cin, Cout, k=K, pad=K//2) + LayerNorm(channels_first)
    B, TILE, Cout = o_ref.shape
    pad = (K - 1) // 2
    base = HALO_ROWS - pad
    _, xp = _halo_window(xl_ref, xc_ref, xr_ref)
    Cin = xp.shape[-1]
    # fold the K taps into a single contraction: (B*TILE, K*Cin) @ (K*Cin, Cout)
    taps = jnp.concatenate([xp[:, base + k:base + k + TILE, :] for k in range(K)],
                           axis=-1)
    y = jnp.dot(taps.reshape(B * TILE, K * Cin).astype(mxu_dtype), w_ref[...],
                preferred_element_type=jnp.float32)
    y = y.reshape(B, TILE, Cout) + b_ref[...]
    y = _ln(y, g_ref[...], beta_ref[...], eps)
    o_ref[...] = _tail_mask(y, pl.program_id(0), TILE, t_valid)


def downsample_kernel(x_ref, g_ref, beta_ref, w_ref, b_ref, o_ref,
                      *, eps, t_valid, mxu_dtype):
    # LayerNorm(channels_first) + 1x1 Conv1d (== Linear over channels)
    B, TILE, Cout = o_ref.shape
    Cin = x_ref.shape[-1]
    xn = _ln(x_ref[...], g_ref[...], beta_ref[...], eps)
    y = jnp.dot(xn.reshape(B * TILE, Cin).astype(mxu_dtype), w_ref[...],
                preferred_element_type=jnp.float32) + b_ref[...]
    y = y.reshape(B, TILE, Cout)
    o_ref[...] = _tail_mask(y, pl.program_id(0), TILE, t_valid)


def block_kernel(xl_ref, xc_ref, xr_ref, dw_w_ref, dw_b_ref, g_ref, beta_ref,
                 w1_ref, b1_ref, w2_ref, b2_ref, gamma_ref, o_ref,
                 *, K, eps, t_valid, mxu_dtype):
    # depthwise Conv1d(k=K) + LN + Linear -> GELU -> Linear + gamma + residual
    B, TILE, C = o_ref.shape
    pad = (K - 1) // 2
    base = HALO_ROWS - pad
    xc, xp = _halo_window(xl_ref, xc_ref, xr_ref)
    dw_w = dw_w_ref[...]                               # (K, C)

    acc = jnp.zeros((B, TILE, C), jnp.float32) + dw_b_ref[...]
    for k in range(K):                                 # static unroll over taps
        acc = acc + xp[:, base + k:base + k + TILE, :] * dw_w[k]

    xn = _ln(acc, g_ref[...], beta_ref[...], eps)

    h = jnp.dot(xn.reshape(B * TILE, C).astype(mxu_dtype), w1_ref[...],
                preferred_element_type=jnp.float32) + b1_ref[...]
    # exact GELU (erf), matching torch nn.GELU()
    h = 0.5 * h * (1.0 + jax.lax.erf(h * np.float32(0.7071067811865476)))
    y = jnp.dot(h.astype(mxu_dtype), w2_ref[...],
                preferred_element_type=jnp.float32) + b2_ref[...]
    y = y.reshape(B, TILE, C) * gamma_ref[...] + xc    # layer scale + residual

    o_ref[...] = _tail_mask(y, pl.program_id(0), TILE, t_valid)


def layernorm_kernel(x_ref, g_ref, beta_ref, o_ref, *, eps):
    o_ref[...] = _ln(x_ref[...], g_ref[...], beta_ref[...], eps)


# ----------------------------------------------------------------------------
# tiling / compiler-parameter helpers
# ----------------------------------------------------------------------------
def _vmem_capacity_bytes():
    try:
        cap = getattr(pltpu.get_tpu_info(), "vmem_capacity_bytes", None)
        if cap:
            return int(cap)
    except Exception:
        pass
    return 64 * 1024 * 1024          # conservative (v7x-sized) fallback


def _pick_tile_t(T, B, dims, mlp_ratio, vmem_cap, max_tile_t=None):
    """Largest T tile (multiple of 8 sublanes) whose block-kernel working set
    fits the generation's VMEM budget (v7x gets ~half the tile of v6e/v5e)."""
    c = max(dims)
    hid = int(mlp_ratio * c)
    # rough f32 bytes/row of the heaviest (ConvNeXt block) kernel: double-buffered
    # in/out tiles + halo window + dwconv acc + LN result + f32 GELU hidden +
    # bf16 copies fed to the MXU.
    per_row = 4 * B * (2 * c + 2 * c + 3 * c + hid) + 2 * B * (hid + 2 * c)
    budget = max(min(vmem_cap // 3, 48 * 1024 * 1024), 4 * 1024 * 1024)
    tile = max(8, (budget // max(per_row, 1)) // 8 * 8)
    tile = min(tile, 2048)
    if max_tile_t is not None:
        tile = min(tile, max(8, max_tile_t // 8 * 8))
    t_ceil = -(-T // 8) * 8
    tile = min(tile, t_ceil)
    # balance the tiles so padded T overshoots the real T by < 8 rows per tile
    n_tiles = max(1, -(-t_ceil // tile))
    tile = -(-t_ceil // n_tiles)
    tile = -(-tile // 8) * 8
    return int(tile)


# ----------------------------------------------------------------------------
# parameters (deterministic synthetic init; shapes mirror the torch module)
# ----------------------------------------------------------------------------
def init_params(key, input_channels, depths, dims, kernel_size, mlp_ratio=4):
    def nrm(k, shape):
        # TODO(synk): torch uses trunc_normal_(std=0.02); plain normal*0.02 here.
        return 0.02 * jax.random.normal(k, shape, jnp.float32)

    keys = iter(jax.random.split(key, 256))
    params = {}
    params['stem'] = dict(
        w=nrm(next(keys), (kernel_size, input_channels, dims[0])),
        b=jnp.zeros((1, dims[0]), jnp.float32),
        ln_g=jnp.ones((1, dims[0]), jnp.float32),
        ln_b=jnp.zeros((1, dims[0]), jnp.float32),
    )
    params['down'] = []
    for i in range(len(dims) - 1):
        params['down'].append(dict(
            ln_g=jnp.ones((1, dims[i]), jnp.float32),
            ln_b=jnp.zeros((1, dims[i]), jnp.float32),
            w=nrm(next(keys), (dims[i], dims[i + 1])),
            b=jnp.zeros((1, dims[i + 1]), jnp.float32),
        ))
    params['stages'] = []
    for i, d in enumerate(depths):
        C = dims[i]
        H = int(mlp_ratio * C)
        blocks = []
        for _ in range(d):
            blocks.append(dict(
                dw_w=nrm(next(keys), (kernel_size, C)),   # torch (C,1,K) -> (K,C)
                dw_b=jnp.zeros((1, C), jnp.float32),
                ln_g=jnp.ones((1, C), jnp.float32),
                ln_b=jnp.zeros((1, C), jnp.float32),
                w1=nrm(next(keys), (C, H)),               # Linear(C,H).weight.T
                b1=jnp.zeros((1, H), jnp.float32),
                w2=nrm(next(keys), (H, C)),               # Linear(H,C).weight.T
                b2=jnp.zeros((1, C), jnp.float32),
                gamma=jnp.full((1, C), 1e-6, jnp.float32),
            ))
        params['stages'].append(blocks)
    params['final_ln_g'] = jnp.ones((1, dims[-1]), jnp.float32)
    params['final_ln_b'] = jnp.zeros((1, dims[-1]), jnp.float32)
    return params


# ----------------------------------------------------------------------------
# forward pass (Pallas)
# ----------------------------------------------------------------------------
def convnext_encoder_forward(x_ncl, params, depths, dims, kernel_size,
                             mxu_dtype=jnp.bfloat16, mlp_ratio=4, max_tile_t=None):
    K = kernel_size
    pad = K // 2
    assert pad <= HALO_ROWS, "halo sub-block supports kernel_size <= 17"
    B, c_in, T = x_ncl.shape
    x = jnp.transpose(x_ncl, (0, 2, 1)).astype(jnp.float32)      # (B, T, Cin)

    vmem_cap = _vmem_capacity_bytes()
    tile_t = _pick_tile_t(T, B, dims, mlp_ratio, vmem_cap, max_tile_t)
    t_pad = -(-T // tile_t) * tile_t
    if t_pad != T:     # single global pad; kernels keep the tail zeroed afterwards
        x = jnp.pad(x, ((0, 0), (0, t_pad - T), (0, 0)))
    n_tiles = t_pad // tile_t
    n_sub = t_pad // HALO_ROWS
    grid = (n_tiles,)

    cparams = pltpu.CompilerParams(
        dimension_semantics=("parallel",),          # shard the tile axis (v7x 2 TCs)
        vmem_limit_bytes=int(min(0.75 * vmem_cap, 100 * 1024 * 1024)),
    )

    def row_spec(C):
        return pl.BlockSpec((B, tile_t, C), lambda i: (0, i, 0))

    def halo_specs(C):
        R = tile_t // HALO_ROWS
        left = pl.BlockSpec((B, HALO_ROWS, C),
                            lambda i, R=R: (0, jnp.maximum(i * R - 1, 0), 0))
        right = pl.BlockSpec((B, HALO_ROWS, C),
                             lambda i, R=R: (0, jnp.minimum((i + 1) * R, n_sub - 1), 0))
        return left, right

    def const_spec(shape):
        nd = len(shape)
        return pl.BlockSpec(shape, lambda i, nd=nd: (0,) * nd)

    def call(kernel, c_out, args, specs):
        return pl.pallas_call(
            kernel,
            out_shape=jax.ShapeDtypeStruct((B, t_pad, c_out), jnp.float32),
            grid=grid,
            in_specs=specs,
            out_specs=row_spec(c_out),
            compiler_params=cparams,
        )(*args)

    # ---- stem: Conv1d(k=K, pad=K//2) + LayerNorm(channels_first) -------------
    sp = params['stem']
    wf = sp['w'].reshape(K * c_in, dims[0]).astype(mxu_dtype)    # folded taps
    hl, hr = halo_specs(c_in)
    x = call(
        functools.partial(stem_kernel, K=K, eps=EPS, t_valid=T, mxu_dtype=mxu_dtype),
        dims[0],
        (x, x, x, wf, sp['b'], sp['ln_g'], sp['ln_b']),
        [hl, row_spec(c_in), hr,
         const_spec(wf.shape), const_spec(sp['b'].shape),
         const_spec(sp['ln_g'].shape), const_spec(sp['ln_b'].shape)])

    for s in range(len(dims)):
        if s > 0:
            dp = params['down'][s - 1]
            wd = dp['w'].astype(mxu_dtype)
            x = call(
                functools.partial(downsample_kernel, eps=EPS, t_valid=T,
                                  mxu_dtype=mxu_dtype),
                dims[s],
                (x, dp['ln_g'], dp['ln_b'], wd, dp['b']),
                [row_spec(dims[s - 1]), const_spec(dp['ln_g'].shape),
                 const_spec(dp['ln_b'].shape), const_spec(wd.shape),
                 const_spec(dp['b'].shape)])
        hl, hr = halo_specs(dims[s])
        for bp in params['stages'][s]:
            w1 = bp['w1'].astype(mxu_dtype)
            w2 = bp['w2'].astype(mxu_dtype)
            x = call(
                functools.partial(block_kernel, K=K, eps=EPS, t_valid=T,
                                  mxu_dtype=mxu_dtype),
                dims[s],
                (x, x, x, bp['dw_w'], bp['dw_b'], bp['ln_g'], bp['ln_b'],
                 w1, bp['b1'], w2, bp['b2'], bp['gamma']),
                [hl, row_spec(dims[s]), hr,
                 const_spec(bp['dw_w'].shape), const_spec(bp['dw_b'].shape),
                 const_spec(bp['ln_g'].shape), const_spec(bp['ln_b'].shape),
                 const_spec(w1.shape), const_spec(bp['b1'].shape),
                 const_spec(w2.shape), const_spec(bp['b2'].shape),
                 const_spec(bp['gamma'].shape)])

    # ---- final LayerNorm(channels_first) --------------------------------------
    x = call(
        functools.partial(layernorm_kernel, eps=EPS),
        dims[-1],
        (x, params['final_ln_g'], params['final_ln_b']),
        [row_spec(dims[-1]), const_spec((1, dims[-1])), const_spec((1, dims[-1]))])

    return jnp.transpose(x[:, :T, :], (0, 2, 1))                 # back to (B, C, T)


# ----------------------------------------------------------------------------
# pure-JAX reference (same math) for correctness checking
# ----------------------------------------------------------------------------
def reference_forward(x_ncl, params, depths, dims, kernel_size):
    K = kernel_size
    pad = K // 2
    x = jnp.transpose(x_ncl, (0, 2, 1)).astype(jnp.float32)

    def ln(v, g, b):
        u = v.mean(-1, keepdims=True)
        vc = v - u
        s = (vc * vc).mean(-1, keepdims=True)
        return vc / jnp.sqrt(s + EPS) * g + b

    for i in range(len(dims)):
        T = x.shape[1]
        if i == 0:
            sp = params['stem']
            xp = jnp.pad(x, ((0, 0), (pad, pad), (0, 0)))
            acc = sum(jnp.einsum('btc,cd->btd', xp[:, k:k + T, :], sp['w'][k])
                      for k in range(K)) + sp['b']
            x = ln(acc, sp['ln_g'], sp['ln_b'])
        else:
            dp = params['down'][i - 1]
            x = ln(x, dp['ln_g'], dp['ln_b']) @ dp['w'] + dp['b']
        for bp in params['stages'][i]:
            T = x.shape[1]
            xp = jnp.pad(x, ((0, 0), (pad, pad), (0, 0)))
            acc = bp['dw_b'] + sum(xp[:, k:k + T, :] * bp['dw_w'][k] for k in range(K))
            h = ln(acc, bp['ln_g'], bp['ln_b']) @ bp['w1'] + bp['b1']
            h = 0.5 * h * (1.0 + jax.scipy.special.erf(h / jnp.sqrt(2.0)))
            y = (h @ bp['w2'] + bp['b2']) * bp['gamma']
            x = x + y
    x = ln(x, params['final_ln_g'], params['final_ln_b'])
    return jnp.transpose(x, (0, 2, 1))


# ----------------------------------------------------------------------------
if __name__ == "__main__":
    key = jax.random.PRNGKey(0)
    k_in, k_par = jax.random.split(key)

    # small synthetic config (module defaults scaled down)
    input_channels = 4
    depths = [1, 1]
    dims = [32, 64]
    kernel_size = 7
    B, T = 2, 40     # T not a multiple of the forced tile -> exercises halo + masking

    x = jax.random.normal(k_in, (B, input_channels, T), jnp.float32)  # NCL like torch
    params = init_params(k_par, input_channels, depths, dims, kernel_size)

    ref = reference_forward(x, params, depths, dims, kernel_size)

    # 1) f32 MXU path with forced small tiles: exercises the multi-tile halo and
    #    tail-masking logic and must match the f32 reference tightly.
    fwd_f32 = jax.jit(functools.partial(
        convnext_encoder_forward, depths=depths, dims=dims, kernel_size=kernel_size,
        mxu_dtype=jnp.float32, max_tile_t=16))
    out_f32 = jax.block_until_ready(fwd_f32(x, params))
    assert out_f32.shape == (B, dims[-1], T), out_f32.shape
    np.testing.assert_allclose(np.asarray(out_f32), np.asarray(ref),
                               rtol=1e-4, atol=1e-4)

    # 2) bf16 MXU path (the recommended perf config on v5e/v6e/v7x), VMEM-sized tile.
    fwd_bf16 = jax.jit(functools.partial(
        convnext_encoder_forward, depths=depths, dims=dims, kernel_size=kernel_size,
        mxu_dtype=jnp.bfloat16))
    out_bf16 = jax.block_until_ready(fwd_bf16(x, params))
    assert out_bf16.shape == (B, dims[-1], T), out_bf16.shape
    np.testing.assert_allclose(np.asarray(out_bf16), np.asarray(ref),
                               rtol=5e-2, atol=5e-2)

    print("KERNEL_OK")
</pallas_src>

<mosaic_0001>
module attributes {stable_mosaic.version = 11 : i64} {
  func.func @stem_kernel(%arg0: i32, %arg1: memref<2x8x4xf32, #tpu.memory_space<vmem>>, %arg2: memref<2x16x4xf32, #tpu.memory_space<vmem>>, %arg3: memref<2x8x4xf32, #tpu.memory_space<vmem>>, %arg4: memref<28x32xf32, #tpu.memory_space<vmem>>, %arg5: memref<1x32xf32, #tpu.memory_space<vmem>>, %arg6: memref<1x32xf32, #tpu.memory_space<vmem>>, %arg7: memref<1x32xf32, #tpu.memory_space<vmem>>, %arg8: memref<2x16x32xf32, #tpu.memory_space<vmem>>) attributes {dimension_semantics = [#tpu.dimension_semantics<parallel>], iteration_bounds = array<i64: 3>, scalar_prefetch = 0 : i64, scratch_operands = 0 : i64, tpu.core_type = #tpu.core_type<tc>, window_params = [{transform_indices = @transform_0, window_bounds = array<i64: 2, 8, 4>}, {transform_indices = @transform_1, window_bounds = array<i64: 2, 16, 4>}, {transform_indices = @transform_2, window_bounds = array<i64: 2, 8, 4>}, {pipeline_mode = #tpu.pipeline_mode<synchronous>, transform_indices = @transform_3, window_bounds = array<i64: 28, 32>}, {pipeline_mode = #tpu.pipeline_mode<synchronous>, transform_indices = @transform_4, window_bounds = array<i64: 1, 32>}, {pipeline_mode = #tpu.pipeline_mode<synchronous>, transform_indices = @transform_5, window_bounds = array<i64: 1, 32>}, {pipeline_mode = #tpu.pipeline_mode<synchronous>, transform_indices = @transform_6, window_bounds = array<i64: 1, 32>}, {transform_indices = @transform_7, window_bounds = array<i64: 2, 16, 32>}]} {
    %c0 = arith.constant 0 : index
    %c0_0 = arith.constant 0 : index
    %c0_1 = arith.constant 0 : index
    %0 = vector.load %arg2[%c0, %c0_0, %c0_1] : memref<2x16x4xf32, #tpu.memory_space<vmem>>, vector<2x16x4xf32>
    %c0_i32 = arith.constant 0 : i32
    %1 = arith.cmpi sgt, %arg0, %c0_i32 : i32
    %c0_2 = arith.constant 0 : index
    %c0_3 = arith.constant 0 : index
    %c0_4 = arith.constant 0 : index
    %2 = vector.load %arg1[%c0_2, %c0_3, %c0_4] : memref<2x8x4xf32, #tpu.memory_space<vmem>>, vector<2x8x4xf32>
    %cst = arith.constant 0.000000e+00 : f32
    %3 = vector.broadcast %cst : f32 to vector<2x8x4xf32>
    %4 = arith.select %1, %2, %3 : vector<2x8x4xf32>
    %c2_i32 = arith.constant 2 : i32
    %5 = arith.cmpi slt, %arg0, %c2_i32 : i32
    %c0_5 = arith.constant 0 : index
    %c0_6 = arith.constant 0 : index
    %c0_7 = arith.constant 0 : index
    %6 = vector.load %arg3[%c0_5, %c0_6, %c0_7] : memref<2x8x4xf32, #tpu.memory_space<vmem>>, vector<2x8x4xf32>
    %cst_8 = arith.constant 0.000000e+00 : f32
    %7 = vector.broadcast %cst_8 : f32 to vector<2x8x4xf32>
    %8 = arith.select %5, %6, %7 : vector<2x8x4xf32>
    %9 = tpu.concatenate %4, %0, %8 in 1 : vector<2x8x4xf32>, vector<2x16x4xf32>, vector<2x8x4xf32> -> vector<2x32x4xf32>
    %10 = vector.extract_strided_slice %9 {offsets = [0, 5, 0], sizes = [2, 16, 4], strides = [1, 1, 1]} : vector<2x32x4xf32> to vector<2x16x4xf32>
    %11 = vector.extract_strided_slice %9 {offsets = [0, 6, 0], sizes = [2, 16, 4], strides = [1, 1, 1]} : vector<2x32x4xf32> to vector<2x16x4xf32>
    %12 = vector.extract_strided_slice %9 {offsets = [0, 7, 0], sizes = [2, 16, 4], strides = [1, 1, 1]} : vector<2x32x4xf32> to vector<2x16x4xf32>
    %13 = vector.extract_strided_slice %9 {offsets = [0, 8, 0], sizes = [2, 16, 4], strides = [1, 1, 1]} : vector<2x32x4xf32> to vector<2x16x4xf32>
    %14 = vector.extract_strided_slice %9 {offsets = [0, 9, 0], sizes = [2, 16, 4], strides = [1, 1, 1]} : vector<2x32x4xf32> to vector<2x16x4xf32>
    %15 = vector.extract_strided_slice %9 {offsets = [0, 10, 0], sizes = [2, 16, 4], strides = [1, 1, 1]} : vector<2x32x4xf32> to vector<2x16x4xf32>
    %16 = vector.extract_strided_slice %9 {offsets = [0, 11, 0], sizes = [2, 16, 4], strides = [1, 1, 1]} : vector<2x32x4xf32> to vector<2x16x4xf32>
    %17 = tpu.concatenate %10, %11, %12, %13, %14, %15, %16 in 2 : vector<2x16x4xf32>, vector<2x16x4xf32>, vector<2x16x4xf32>, vector<2x16x4xf32>, vector<2x16x4xf32>, vector<2x16x4xf32>, vector<2x16x4xf32> -> vector<2x16x28xf32>
    %18 = vector.shape_cast %17 : vector<2x16x28xf32> to vector<32x28xf32>
    %c0_9 = arith.constant 0 : index
    %c0_10 = arith.constant 0 : index
    %19 = vector.load %arg4[%c0_9, %c0_10] : memref<28x32xf32, #tpu.memory_space<vmem>>, vector<28x32xf32>
    %cst_11 = arith.constant dense<0.000000e+00> : vector<32x32xf32>
    %20 = tpu.matmul %18, %19, %cst_11 {dimension_numbers = #tpu.dot_dimension_numbers<[1], [0], [0], [1], [0, 0, 1, 1], [], []>} : vector<32x28xf32>, vector<28x32xf32>, vector<32x32xf32> -> vector<32x32xf32>
    %21 = vector.shape_cast %20 : vector<32x32xf32> to vector<2x16x32xf32>
    %c0_12 = arith.constant 0 : index
    %c0_13 = arith.constant 0 : index
    %22 = vector.load %arg5[%c0_12, %c0_13] : memref<1x32xf32, #tpu.memory_space<vmem>>, vector<1x32xf32>
    %23 = vector.shape_cast %22 : vector<1x32xf32> to vector<1x1x32xf32>
    %24 = vector.broadcast %23 : vector<1x1x32xf32> to vector<2x16x32xf32>
    %25 = arith.addf %21, %24 : vector<2x16x32xf32>
    %c0_14 = arith.constant 0 : index
    %c0_15 = arith.constant 0 : index
    %26 = vector.load %arg6[%c0_14, %c0_15] : memref<1x32xf32, #tpu.memory_space<vmem>>, vector<1x32xf32>
    %c0_16 = arith.constant 0 : index
    %c0_17 = arith.constant 0 : index
    %27 = vector.load %arg7[%c0_16, %c0_17] : memref<1x32xf32, #tpu.memory_space<vmem>>, vector<1x32xf32>
    %cst_18 = arith.constant dense<0.000000e+00> : vector<2x16xf32>
    %28 = vector.multi_reduction <add>, %25, %cst_18 [2] : vector<2x16x32xf32> to vector<2x16xf32>
    %29 = vector.shape_cast %28 : vector<2x16xf32> to vector<2x16x1xf32>
    %cst_19 = arith.constant 3.200000e+01 : f32
    %30 = vector.broadcast %cst_19 : f32 to vector<2x16x1xf32>
    %31 = arith.divf %29, %30 : vector<2x16x1xf32>
    %32 = vector.broadcast %31 : vector<2x16x1xf32> to vector<2x16x32xf32>
    %33 = arith.subf %25, %32 : vector<2x16x32xf32>
    %34 = arith.mulf %33, %33 : vector<2x16x32xf32>
    %cst_20 = arith.constant dense<0.000000e+00> : vector<2x16xf32>
    %35 = vector.multi_reduction <add>, %34, %cst_20 [2] : vector<2x16x32xf32> to vector<2x16xf32>
    %36 = vector.shape_cast %35 : vector<2x16xf32> to vector<2x16x1xf32>
    %cst_21 = arith.constant 3.200000e+01 : f32
    %37 = vector.broadcast %cst_21 : f32 to vector<2x16x1xf32>
    %38 = arith.divf %36, %37 : vector<2x16x1xf32>
    %cst_22 = arith.constant 9.99999997E-7 : f32
    %39 = vector.broadcast %cst_22 : f32 to vector<2x16x1xf32>
    %40 = arith.addf %38, %39 : vector<2x16x1xf32>
    %41 = math.rsqrt %40 : vector<2x16x1xf32>
    %42 = vector.broadcast %41 : vector<2x16x1xf32> to vector<2x16x32xf32>
    %43 = arith.mulf %33, %42 : vector<2x16x32xf32>
    %44 = vector.shape_cast %26 : vector<1x32xf32> to vector<1x1x32xf32>
    %45 = vector.broadcast %44 : vector<1x1x32xf32> to vector<2x16x32xf32>
    %46 = arith.mulf %43, %45 : vector<2x16x32xf32>
    %47 = vector.shape_cast %27 : vector<1x32xf32> to vector<1x1x32xf32>
    %48 = vector.broadcast %47 : vector<1x1x32xf32> to vector<2x16x32xf32>
    %49 = arith.addf %46, %48 : vector<2x16x32xf32>
    %c16_i32 = arith.constant 16 : i32
    %50 = arith.muli %arg0, %c16_i32 : i32
    %51 = tpu.iota {dimensions = array<i32: 1>} : vector<1x16x1xi32>
    %52 = vector.broadcast %50 : i32 to vector<1x16x1xi32>
    %53 = arith.addi %52, %51 : vector<1x16x1xi32>
    %c40_i32 = arith.constant 40 : i32
    %54 = vector.broadcast %c40_i32 : i32 to vector<1x16x1xi32>
    %55 = arith.cmpi slt, %53, %54 : vector<1x16x1xi32>
    %cst_23 = arith.constant 0.000000e+00 : f32
    %56 = vector.shape_cast %55 : vector<1x16x1xi1> to vector<1x16x1xi1>
    %57 = vector.broadcast %56 : vector<1x16x1xi1> to vector<2x16x32xi1>
    %58 = vector.broadcast %cst_23 : f32 to vector<2x16x32xf32>
    %59 = arith.select %57, %49, %58 : vector<2x16x32xi1>, vector<2x16x32xf32>
    %c0_24 = arith.constant 0 : index
    %c0_25 = arith.constant 0 : index
    %c0_26 = arith.constant 0 : index
    %60 = vector.load %arg8[%c0_24, %c0_25, %c0_26] : memref<2x16x32xf32, #tpu.memory_space<vmem>>, vector<2x16x32xf32>
    tpu.vector_store %arg8[%c0_24, %c0_25, %c0_26], %59 {strides = array<i32>} : memref<2x16x32xf32, #tpu.memory_space<vmem>>, vector<2x16x32xf32>,
    return
  }
  func.func @transform_0(%arg0: i32) -> (i32, i32, i32) {
    %c2_i32 = arith.constant 2 : i32
    %0 = arith.muli %arg0, %c2_i32 : i32
    %c1_i32 = arith.constant 1 : i32
    %1 = arith.subi %0, %c1_i32 : i32
    %c0_i32 = arith.constant 0 : i32
    %2 = arith.maxsi %1, %c0_i32 : i32
    %c0_i32_0 = arith.constant 0 : i32
    %c0_i32_1 = arith.constant 0 : i32
    %c0_i32_2 = arith.constant 0 : i32
    return %c0_i32_0, %2, %c0_i32_1 : i32, i32, i32
  }
  func.func @transform_1(%arg0: i32) -> (i32, i32, i32) {
    %c0_i32 = arith.constant 0 : i32
    %c0_i32_0 = arith.constant 0 : i32
    %c0_i32_1 = arith.constant 0 : i32
    return %c0_i32, %arg0, %c0_i32_0 : i32, i32, i32
  }
  func.func @transform_2(%arg0: i32) -> (i32, i32, i32) {
    %c1_i32 = arith.constant 1 : i32
    %0 = arith.addi %arg0, %c1_i32 : i32
    %c2_i32 = arith.constant 2 : i32
    %1 = arith.muli %0, %c2_i32 : i32
    %c5_i32 = arith.constant 5 : i32
    %2 = arith.minsi %1, %c5_i32 : i32
    %c0_i32 = arith.constant 0 : i32
    %c0_i32_0 = arith.constant 0 : i32
    %c0_i32_1 = arith.constant 0 : i32
    return %c0_i32, %2, %c0_i32_0 : i32, i32, i32
  }
  func.func @transform_3(%arg0: i32) -> (i32, i32) {
    %c0_i32 = arith.constant 0 : i32
    %c0_i32_0 = arith.constant 0 : i32
    %c0_i32_1 = arith.constant 0 : i32
    return %c0_i32, %c0_i32_0 : i32, i32
  }
  func.func @transform_4(%arg0: i32) -> (i32, i32) {
    %c0_i32 = arith.constant 0 : i32
    %c0_i32_0 = arith.constant 0 : i32
    %c0_i32_1 = arith.constant 0 : i32
    return %c0_i32, %c0_i32_0 : i32, i32
  }
  func.func @transform_5(%arg0: i32) -> (i32, i32) {
    %c0_i32 = arith.constant 0 : i32
    %c0_i32_0 = arith.constant 0 : i32
    %c0_i32_1 = arith.constant 0 : i32
    return %c0_i32, %c0_i32_0 : i32, i32
  }
  func.func @transform_6(%arg0: i32) -> (i32, i32) {
    %c0_i32 = arith.constant 0 : i32
    %c0_i32_0 = arith.constant 0 : i32
    %c0_i32_1 = arith.constant 0 : i32
    return %c0_i32, %c0_i32_0 : i32, i32
  }
  func.func @transform_7(%arg0: i32) -> (i32, i32, i32) {
    %c0_i32 = arith.constant 0 : i32
    %c0_i32_0 = arith.constant 0 : i32
    %c0_i32_1 = arith.constant 0 : i32
    return %c0_i32, %arg0, %c0_i32_0 : i32, i32, i32
  }
}

module attributes {stable_mosaic.version = 11 : i64} {
  func.func @downsample_kernel(%arg0: i32, %arg1: memref<2x16x32xf32, #tpu.memory_space<vmem>>, %arg2: memref<1x32xf32, #tpu.memory_space<vmem>>, %arg3: memref<1x32xf32, #tpu.memory_space<vmem>>, %arg4: memref<32x64xf32, #tpu.memory_space<vmem>>, %arg5: memref<1x64xf32, #tpu.memory_space<vmem>>, %arg6: memref<2x16x64xf32, #tpu.memory_space<vmem>>) attributes {dimension_semantics = [#tpu.dimension_semantics<parallel>], iteration_bounds = array<i64: 3>, scalar_prefetch = 0 : i64, scratch_operands = 0 : i64, tpu.core_type = #tpu.core_type<tc>, window_params = [{transform_indices = @transform_0, window_bounds = array<i64: 2, 16, 32>}, {pipeline_mode = #tpu.pipeline_mode<synchronous>, transform_indices = @transform_1, window_bounds = array<i64: 1, 32>}, {pipeline_mode = #tpu.pipeline_mode<synchronous>, transform_indices = @transform_2, window_bounds = array<i64: 1, 32>}, {pipeline_mode = #tpu.pipeline_mode<synchronous>, transform_indices = @transform_3, window_bounds = array<i64: 32, 64>}, {pipeline_mode = #tpu.pipeline_mode<synchronous>, transform_indices = @transform_4, window_bounds = array<i64: 1, 64>}, {transform_indices = @transform_5, window_bounds = array<i64: 2, 16, 64>}]} {
    %c0 = arith.constant 0 : index
    %c0_0 = arith.constant 0 : index
    %c0_1 = arith.constant 0 : index
    %0 = vector.load %arg1[%c0, %c0_0, %c0_1] : memref<2x16x32xf32, #tpu.memory_space<vmem>>, vector<2x16x32xf32>
    %c0_2 = arith.constant 0 : index
    %c0_3 = arith.constant 0 : index
    %1 = vector.load %arg2[%c0_2, %c0_3] : memref<1x32xf32, #tpu.memory_space<vmem>>, vector<1x32xf32>
    %c0_4 = arith.constant 0 : index
    %c0_5 = arith.constant 0 : index
    %2 = vector.load %arg3[%c0_4, %c0_5] : memref<1x32xf32, #tpu.memory_space<vmem>>, vector<1x32xf32>
    %cst = arith.constant dense<0.000000e+00> : vector<2x16xf32>
    %3 = vector.multi_reduction <add>, %0, %cst [2] : vector<2x16x32xf32> to vector<2x16xf32>
    %4 = vector.shape_cast %3 : vector<2x16xf32> to vector<2x16x1xf32>
    %cst_6 = arith.constant 3.200000e+01 : f32
    %5 = vector.broadcast %cst_6 : f32 to vector<2x16x1xf32>
    %6 = arith.divf %4, %5 : vector<2x16x1xf32>
    %7 = vector.broadcast %6 : vector<2x16x1xf32> to vector<2x16x32xf32>
    %8 = arith.subf %0, %7 : vector<2x16x32xf32>
    %9 = arith.mulf %8, %8 : vector<2x16x32xf32>
    %cst_7 = arith.constant dense<0.000000e+00> : vector<2x16xf32>
    %10 = vector.multi_reduction <add>, %9, %cst_7 [2] : vector<2x16x32xf32> to vector<2x16xf32>
    %11 = vector.shape_cast %10 : vector<2x16xf32> to vector<2x16x1xf32>
    %cst_8 = arith.constant 3.200000e+01 : f32
    %12 = vector.broadcast %cst_8 : f32 to vector<2x16x1xf32>
    %13 = arith.divf %11, %12 : vector<2x16x1xf32>
    %cst_9 = arith.constant 9.99999997E-7 : f32
    %14 = vector.broadcast %cst_9 : f32 to vector<2x16x1xf32>
    %15 = arith.addf %13, %14 : vector<2x16x1xf32>
    %16 = math.rsqrt %15 : vector<2x16x1xf32>
    %17 = vector.broadcast %16 : vector<2x16x1xf32> to vector<2x16x32xf32>
    %18 = arith.mulf %8, %17 : vector<2x16x32xf32>
    %19 = vector.shape_cast %1 : vector<1x32xf32> to vector<1x1x32xf32>
    %20 = vector.broadcast %19 : vector<1x1x32xf32> to vector<2x16x32xf32>
    %21 = arith.mulf %18, %20 : vector<2x16x32xf32>
    %22 = vector.shape_cast %2 : vector<1x32xf32> to vector<1x1x32xf32>
    %23 = vector.broadcast %22 : vector<1x1x32xf32> to vector<2x16x32xf32>
    %24 = arith.addf %21, %23 : vector<2x16x32xf32>
    %25 = vector.shape_cast %24 : vector<2x16x32xf32> to vector<32x32xf32>
    %c0_10 = arith.constant 0 : index
    %c0_11 = arith.constant 0 : index
    %26 = vector.load %arg4[%c0_10, %c0_11] : memref<32x64xf32, #tpu.memory_space<vmem>>, vector<32x64xf32>
    %cst_12 = arith.constant dense<0.000000e+00> : vector<32x64xf32>
    %27 = tpu.matmul %25, %26, %cst_12 {dimension_numbers = #tpu.dot_dimension_numbers<[1], [0], [0], [1], [0, 0, 1, 1], [], []>} : vector<32x32xf32>, vector<32x64xf32>, vector<32x64xf32> -> vector<32x64xf32>
    %c0_13 = arith.constant 0 : index
    %c0_14 = arith.constant 0 : index
    %28 = vector.load %arg5[%c0_13, %c0_14] : memref<1x64xf32, #tpu.memory_space<vmem>>, vector<1x64xf32>
    %29 = vector.broadcast %28 : vector<1x64xf32> to vector<32x64xf32>
    %30 = arith.addf %27, %29 : vector<32x64xf32>
    %31 = vector.shape_cast %30 : vector<32x64xf32> to vector<2x16x64xf32>
    %c16_i32 = arith.constant 16 : i32
    %32 = arith.muli %arg0, %c16_i32 : i32
    %33 = tpu.iota {dimensions = array<i32: 1>} : vector<1x16x1xi32>
    %34 = vector.broadcast %32 : i32 to vector<1x16x1xi32>
    %35 = arith.addi %34, %33 : vector<1x16x1xi32>
    %c40_i32 = arith.constant 40 : i32
    %36 = vector.broadcast %c40_i32 : i32 to vector<1x16x1xi32>
    %37 = arith.cmpi slt, %35, %36 : vector<1x16x1xi32>
    %cst_15 = arith.constant 0.000000e+00 : f32
    %38 = vector.shape_cast %37 : vector<1x16x1xi1> to vector<1x16x1xi1>
    %39 = vector.broadcast %38 : vector<1x16x1xi1> to vector<2x16x64xi1>
    %40 = vector.broadcast %cst_15 : f32 to vector<2x16x64xf32>
    %41 = arith.select %39, %31, %40 : vector<2x16x64xi1>, vector<2x16x64xf32>
    %c0_16 = arith.constant 0 : index
    %c0_17 = arith.constant 0 : index
    %c0_18 = arith.constant 0 : index
    %42 = vector.load %arg6[%c0_16, %c0_17, %c0_18] : memref<2x16x64xf32, #tpu.memory_space<vmem>>, vector<2x16x64xf32>
    tpu.vector_store %arg6[%c0_16, %c0_17, %c0_18], %41 {strides = array<i32>} : memref<2x16x64xf32, #tpu.memory_space<vmem>>, vector<2x16x64xf32>,
    return
  }
  func.func @transform_0(%arg0: i32) -> (i32, i32, i32) {
    %c0_i32 = arith.constant 0 : i32
    %c0_i32_0 = arith.constant 0 : i32
    %c0_i32_1 = arith.constant 0 : i32
    return %c0_i32, %arg0, %c0_i32_0 : i32, i32, i32
  }
  func.func @transform_1(%arg0: i32) -> (i32, i32) {
    %c0_i32 = arith.constant 0 : i32
    %c0_i32_0 = arith.constant 0 : i32
    %c0_i32_1 = arith.constant 0 : i32
    return %c0_i32, %c0_i32_0 : i32, i32
  }
  func.func @transform_2(%arg0: i32) -> (i32, i32) {
    %c0_i32 = arith.constant 0 : i32
    %c0_i32_0 = arith.constant 0 : i32
    %c0_i32_1 = arith.constant 0 : i32
    return %c0_i32, %c0_i32_0 : i32, i32
  }
  func.func @transform_3(%arg0: i32) -> (i32, i32) {
    %c0_i32 = arith.constant 0 : i32
    %c0_i32_0 = arith.constant 0 : i32
    %c0_i32_1 = arith.constant 0 : i32
    return %c0_i32, %c0_i32_0 : i32, i32
  }
  func.func @transform_4(%arg0: i32) -> (i32, i32) {
    %c0_i32 = arith.constant 0 : i32
    %c0_i32_0 = arith.constant 0 : i32
    %c0_i32_1 = arith.constant 0 : i32
    return %c0_i32, %c0_i32_0 : i32, i32
  }
  func.func @transform_5(%arg0: i32) -> (i32, i32, i32) {
    %c0_i32 = arith.constant 0 : i32
    %c0_i32_0 = arith.constant 0 : i32
    %c0_i32_1 = arith.constant 0 : i32
    return %c0_i32, %arg0, %c0_i32_0 : i32, i32, i32
  }
}

module attributes {stable_mosaic.version = 11 : i64} {
  func.func @block_kernel(%arg0: i32, %arg1: memref<2x8x32xf32, #tpu.memory_space<vmem>>, %arg2: memref<2x16x32xf32, #tpu.memory_space<vmem>>, %arg3: memref<2x8x32xf32, #tpu.memory_space<vmem>>, %arg4: memref<7x32xf32, #tpu.memory_space<vmem>>, %arg5: memref<1x32xf32, #tpu.memory_space<vmem>>, %arg6: memref<1x32xf32, #tpu.memory_space<vmem>>, %arg7: memref<1x32xf32, #tpu.memory_space<vmem>>, %arg8: memref<32x128xf32, #tpu.memory_space<vmem>>, %arg9: memref<1x128xf32, #tpu.memory_space<vmem>>, %arg10: memref<128x32xf32, #tpu.memory_space<vmem>>, %arg11: memref<1x32xf32, #tpu.memory_space<vmem>>, %arg12: memref<1x32xf32, #tpu.memory_space<vmem>>, %arg13: memref<2x16x32xf32, #tpu.memory_space<vmem>>) attributes {dimension_semantics = [#tpu.dimension_semantics<parallel>], iteration_bounds = array<i64: 3>, scalar_prefetch = 0 : i64, scratch_operands = 0 : i64, tpu.core_type = #tpu.core_type<tc>, window_params = [{transform_indices = @transform_0, window_bounds = array<i64: 2, 8, 32>}, {transform_indices = @transform_1, window_bounds = array<i64: 2, 16, 32>}, {transform_indices = @transform_2, window_bounds = array<i64: 2, 8, 32>}, {pipeline_mode = #tpu.pipeline_mode<synchronous>, transform_indices = @transform_3, window_bounds = array<i64: 7, 32>}, {pipeline_mode = #tpu.pipeline_mode<synchronous>, transform_indices = @transform_4, window_bounds = array<i64: 1, 32>}, {pipeline_mode = #tpu.pipeline_mode<synchronous>, transform_indices = @transform_5, window_bounds = array<i64: 1, 32>}, {pipeline_mode = #tpu.pipeline_mode<synchronous>, transform_indices = @transform_6, window_bounds = array<i64: 1, 32>}, {pipeline_mode = #tpu.pipeline_mode<synchronous>, transform_indices = @transform_7, window_bounds = array<i64: 32, 128>}, {pipeline_mode = #tpu.pipeline_mode<synchronous>, transform_indices = @transform_8, window_bounds = array<i64: 1, 128>}, {pipeline_mode = #tpu.pipeline_mode<synchronous>, transform_indices = @transform_9, window_bounds = array<i64: 128, 32>}, {pipeline_mode = #tpu.pipeline_mode<synchronous>, transform_indices = @transform_10, window_bounds = array<i64: 1, 32>}, {pipeline_mode = #tpu.pipeline_mode<synchronous>, transform_indices = @transform_11, window_bounds = array<i64: 1, 32>}, {transform_indices = @transform_12, window_bounds = array<i64: 2, 16, 32>}]} {
    %c0 = arith.constant 0 : index
    %c0_0 = arith.constant 0 : index
    %c0_1 = arith.constant 0 : index
    %0 = vector.load %arg2[%c0, %c0_0, %c0_1] : memref<2x16x32xf32, #tpu.memory_space<vmem>>, vector<2x16x32xf32>
    %c0_i32 = arith.constant 0 : i32
    %1 = arith.cmpi sgt, %arg0, %c0_i32 : i32
    %c0_2 = arith.constant 0 : index
    %c0_3 = arith.constant 0 : index
    %c0_4 = arith.constant 0 : index
    %2 = vector.load %arg1[%c0_2, %c0_3, %c0_4] : memref<2x8x32xf32, #tpu.memory_space<vmem>>, vector<2x8x32xf32>
    %cst = arith.constant 0.000000e+00 : f32
    %3 = vector.broadcast %cst : f32 to vector<2x8x32xf32>
    %4 = arith.select %1, %2, %3 : vector<2x8x32xf32>
    %c2_i32 = arith.constant 2 : i32
    %5 = arith.cmpi slt, %arg0, %c2_i32 : i32
    %c0_5 = arith.constant 0 : index
    %c0_6 = arith.constant 0 : index
    %c0_7 = arith.constant 0 : index
    %6 = vector.load %arg3[%c0_5, %c0_6, %c0_7] : memref<2x8x32xf32, #tpu.memory_space<vmem>>, vector<2x8x32xf32>
    %cst_8 = arith.constant 0.000000e+00 : f32
    %7 = vector.broadcast %cst_8 : f32 to vector<2x8x32xf32>
    %8 = arith.select %5, %6, %7 : vector<2x8x32xf32>
    %9 = tpu.concatenate %4, %0, %8 in 1 : vector<2x8x32xf32>, vector<2x16x32xf32>, vector<2x8x32xf32> -> vector<2x32x32xf32>
    %c0_9 = arith.constant 0 : index
    %c0_10 = arith.constant 0 : index
    %10 = vector.load %arg4[%c0_9, %c0_10] : memref<7x32xf32, #tpu.memory_space<vmem>>, vector<7x32xf32>
    %cst_11 = arith.constant 0.000000e+00 : f32
    %11 = vector.broadcast %cst_11 : f32 to vector<2x16x32xf32>
    %c0_12 = arith.constant 0 : index
    %c0_13 = arith.constant 0 : index
    %12 = vector.load %arg5[%c0_12, %c0_13] : memref<1x32xf32, #tpu.memory_space<vmem>>, vector<1x32xf32>
    %13 = vector.shape_cast %12 : vector<1x32xf32> to vector<1x1x32xf32>
    %14 = vector.broadcast %13 : vector<1x1x32xf32> to vector<2x16x32xf32>
    %15 = arith.addf %11, %14 : vector<2x16x32xf32>
    %16 = vector.extract_strided_slice %9 {offsets = [0, 5, 0], sizes = [2, 16, 32], strides = [1, 1, 1]} : vector<2x32x32xf32> to vector<2x16x32xf32>
    %17 = vector.extract_strided_slice %10 {offsets = [0, 0], sizes = [1, 32], strides = [1, 1]} : vector<7x32xf32> to vector<1x32xf32>
    %18 = vector.shape_cast %17 : vector<1x32xf32> to vector<32xf32>
    %19 = vector.shape_cast %18 : vector<32xf32> to vector<1x1x32xf32>
    %20 = vector.broadcast %19 : vector<1x1x32xf32> to vector<2x16x32xf32>
    %21 = arith.mulf %16, %20 : vector<2x16x32xf32>
    %22 = arith.addf %15, %21 : vector<2x16x32xf32>
    %23 = vector.extract_strided_slice %9 {offsets = [0, 6, 0], sizes = [2, 16, 32], strides = [1, 1, 1]} : vector<2x32x32xf32> to vector<2x16x32xf32>
    %24 = vector.extract_strided_slice %10 {offsets = [1, 0], sizes = [1, 32], strides = [1, 1]} : vector<7x32xf32> to vector<1x32xf32>
    %25 = vector.shape_cast %24 : vector<1x32xf32> to vector<32xf32>
    %26 = vector.shape_cast %25 : vector<32xf32> to vector<1x1x32xf32>
    %27 = vector.broadcast %26 : vector<1x1x32xf32> to vector<2x16x32xf32>
    %28 = arith.mulf %23, %27 : vector<2x16x32xf32>
    %29 = arith.addf %22, %28 : vector<2x16x32xf32>
    %30 = vector.extract_strided_slice %9 {offsets = [0, 7, 0], sizes = [2, 16, 32], strides = [1, 1, 1]} : vector<2x32x32xf32> to vector<2x16x32xf32>
    %31 = vector.extract_strided_slice %10 {offsets = [2, 0], sizes = [1, 32], strides = [1, 1]} : vector<7x32xf32> to vector<1x32xf32>
    %32 = vector.shape_cast %31 : vector<1x32xf32> to vector<32xf32>
    %33 = vector.shape_cast %32 : vector<32xf32> to vector<1x1x32xf32>
    %34 = vector.broadcast %33 : vector<1x1x32xf32> to vector<2x16x32xf32>
    %35 = arith.mulf %30, %34 : vector<2x16x32xf32>
    %36 = arith.addf %29, %35 : vector<2x16x32xf32>
    %37 = vector.extract_strided_slice %9 {offsets = [0, 8, 0], sizes = [2, 16, 32], strides = [1, 1, 1]} : vector<2x32x32xf32> to vector<2x16x32xf32>
    %38 = vector.extract_strided_slice %10 {offsets = [3, 0], sizes = [1, 32], strides = [1, 1]} : vector<7x32xf32> to vector<1x32xf32>
    %39 = vector.shape_cast %38 : vector<1x32xf32> to vector<32xf32>
    %40 = vector.shape_cast %39 : vector<32xf32> to vector<1x1x32xf32>
    %41 = vector.broadcast %40 : vector<1x1x32xf32> to vector<2x16x32xf32>
    %42 = arith.mulf %37, %41 : vector<2x16x32xf32>
    %43 = arith.addf %36, %42 : vector<2x16x32xf32>
    %44 = vector.extract_strided_slice %9 {offsets = [0, 9, 0], sizes = [2, 16, 32], strides = [1, 1, 1]} : vector<2x32x32xf32> to vector<2x16x32xf32>
    %45 = vector.extract_strided_slice %10 {offsets = [4, 0], sizes = [1, 32], strides = [1, 1]} : vector<7x32xf32> to vector<1x32xf32>
    %46 = vector.shape_cast %45 : vector<1x32xf32> to vector<32xf32>
    %47 = vector.shape_cast %46 : vector<32xf32> to vector<1x1x32xf32>
    %48 = vector.broadcast %47 : vector<1x1x32xf32> to vector<2x16x32xf32>
    %49 = arith.mulf %44, %48 : vector<2x16x32xf32>
    %50 = arith.addf %43, %49 : vector<2x16x32xf32>
    %51 = vector.extract_strided_slice %9 {offsets = [0, 10, 0], sizes = [2, 16, 32], strides = [1, 1, 1]} : vector<2x32x32xf32> to vector<2x16x32xf32>
    %52 = vector.extract_strided_slice %10 {offsets = [5, 0], sizes = [1, 32], strides = [1, 1]} : vector<7x32xf32> to vector<1x32xf32>
    %53 = vector.shape_cast %52 : vector<1x32xf32> to vector<32xf32>
    %54 = vector.shape_cast %53 : vector<32xf32> to vector<1x1x32xf32>
    %55 = vector.broadcast %54 : vector<1x1x32xf32> to vector<2x16x32xf32>
    %56 = arith.mulf %51, %55 : vector<2x16x32xf32>
    %57 = arith.addf %50, %56 : vector<2x16x32xf32>
    %58 = vector.extract_strided_slice %9 {offsets = [0, 11, 0], sizes = [2, 16, 32], strides = [1, 1, 1]} : vector<2x32x32xf32> to vector<2x16x32xf32>
    %59 = vector.extract_strided_slice %10 {offsets = [6, 0], sizes = [1, 32], strides = [1, 1]} : vector<7x32xf32> to vector<1x32xf32>
    %60 = vector.shape_cast %59 : vector<1x32xf32> to vector<32xf32>
    %61 = vector.shape_cast %60 : vector<32xf32> to vector<1x1x32xf32>
    %62 = vector.broadcast %61 : vector<1x1x32xf32> to vector<2x16x32xf32>
    %63 = arith.mulf %58, %62 : vector<2x16x32xf32>
    %64 = arith.addf %57, %63 : vector<2x16x32xf32>
    %c0_14 = arith.constant 0 : index
    %c0_15 = arith.constant 0 : index
    %65 = vector.load %arg6[%c0_14, %c0_15] : memref<1x32xf32, #tpu.memory_space<vmem>>, vector<1x32xf32>
    %c0_16 = arith.constant 0 : index
    %c0_17 = arith.constant 0 : index
    %66 = vector.load %arg7[%c0_16, %c0_17] : memref<1x32xf32, #tpu.memory_space<vmem>>, vector<1x32xf32>
    %cst_18 = arith.constant dense<0.000000e+00> : vector<2x16xf32>
    %67 = vector.multi_reduction <add>, %64, %cst_18 [2] : vector<2x16x32xf32> to vector<2x16xf32>
    %68 = vector.shape_cast %67 : vector<2x16xf32> to vector<2x16x1xf32>
    %cst_19 = arith.constant 3.200000e+01 : f32
    %69 = vector.broadcast %cst_19 : f32 to vector<2x16x1xf32>
    %70 = arith.divf %68, %69 : vector<2x16x1xf32>
    %71 = vector.broadcast %70 : vector<2x16x1xf32> to vector<2x16x32xf32>
    %72 = arith.subf %64, %71 : vector<2x16x32xf32>
    %73 = arith.mulf %72, %72 : vector<2x16x32xf32>
    %cst_20 = arith.constant dense<0.000000e+00> : vector<2x16xf32>
    %74 = vector.multi_reduction <add>, %73, %cst_20 [2] : vector<2x16x32xf32> to vector<2x16xf32>
    %75 = vector.shape_cast %74 : vector<2x16xf32> to vector<2x16x1xf32>
    %cst_21 = arith.constant 3.200000e+01 : f32
    %76 = vector.broadcast %cst_21 : f32 to vector<2x16x1xf32>
    %77 = arith.divf %75, %76 : vector<2x16x1xf32>
    %cst_22 = arith.constant 9.99999997E-7 : f32
    %78 = vector.broadcast %cst_22 : f32 to vector<2x16x1xf32>
    %79 = arith.addf %77, %78 : vector<2x16x1xf32>
    %80 = math.rsqrt %79 : vector<2x16x1xf32>
    %81 = vector.broadcast %80 : vector<2x16x1xf32> to vector<2x16x32xf32>
    %82 = arith.mulf %72, %81 : vector<2x16x32xf32>
    %83 = vector.shape_cast %65 : vector<1x32xf32> to vector<1x1x32xf32>
    %84 = vector.broadcast %83 : vector<1x1x32xf32> to vector<2x16x32xf32>
    %85 = arith.mulf %82, %84 : vector<2x16x32xf32>
    %86 = vector.shape_cast %66 : vector<1x32xf32> to vector<1x1x32xf32>
    %87 = vector.broadcast %86 : vector<1x1x32xf32> to vector<2x16x32xf32>
    %88 = arith.addf %85, %87 : vector<2x16x32xf32>
    %89 = vector.shape_cast %88 : vector<2x16x32xf32> to vector<32x32xf32>
    %c0_23 = arith.constant 0 : index
    %c0_24 = arith.constant 0 : index
    %90 = vector.load %arg8[%c0_23, %c0_24] : memref<32x128xf32, #tpu.memory_space<vmem>>, vector<32x128xf32>
    %cst_25 = arith.constant dense<0.000000e+00> : vector<32x128xf32>
    %91 = tpu.matmul %89, %90, %cst_25 {dimension_numbers = #tpu.dot_dimension_numbers<[1], [0], [0], [1], [0, 0, 1, 1], [], []>} : vector<32x32xf32>, vector<32x128xf32>, vector<32x128xf32> -> vector<32x128xf32>
    %c0_26 = arith.constant 0 : index
    %c0_27 = arith.constant 0 : index
    %92 = vector.load %arg9[%c0_26, %c0_27] : memref<1x128xf32, #tpu.memory_space<vmem>>, vector<1x128xf32>
    %93 = vector.broadcast %92 : vector<1x128xf32> to vector<32x128xf32>
    %94 = arith.addf %91, %93 : vector<32x128xf32>
    %cst_28 = arith.constant 5.000000e-01 : f32
    %95 = vector.broadcast %cst_28 : f32 to vector<32x128xf32>
    %96 = arith.mulf %95, %94 : vector<32x128xf32>
    %cst_29 = arith.constant 0.707106769 : f32
    %97 = vector.broadcast %cst_29 : f32 to vector<32x128xf32>
    %98 = arith.mulf %94, %97 : vector<32x128xf32>
    %99 = math.erf %98 : vector<32x128xf32>
    %cst_30 = arith.constant 1.000000e+00 : f32
    %100 = vector.broadcast %cst_30 : f32 to vector<32x128xf32>
    %101 = arith.addf %100, %99 : vector<32x128xf32>
    %102 = arith.mulf %96, %101 : vector<32x128xf32>
    %c0_31 = arith.constant 0 : index
    %c0_32 = arith.constant 0 : index
    %103 = vector.load %arg10[%c0_31, %c0_32] : memref<128x32xf32, #tpu.memory_space<vmem>>, vector<128x32xf32>
    %cst_33 = arith.constant dense<0.000000e+00> : vector<32x32xf32>
    %104 = tpu.matmul %102, %103, %cst_33 {dimension_numbers = #tpu.dot_dimension_numbers<[1], [0], [0], [1], [0, 0, 1, 1], [], []>} : vector<32x128xf32>, vector<128x32xf32>, vector<32x32xf32> -> vector<32x32xf32>
    %c0_34 = arith.constant 0 : index
    %c0_35 = arith.constant 0 : index
    %105 = vector.load %arg11[%c0_34, %c0_35] : memref<1x32xf32, #tpu.memory_space<vmem>>, vector<1x32xf32>
    %106 = vector.broadcast %105 : vector<1x32xf32> to vector<32x32xf32>
    %107 = arith.addf %104, %106 : vector<32x32xf32>
    %108 = vector.shape_cast %107 : vector<32x32xf32> to vector<2x16x32xf32>
    %c0_36 = arith.constant 0 : index
    %c0_37 = arith.constant 0 : index
    %109 = vector.load %arg12[%c0_36, %c0_37] : memref<1x32xf32, #tpu.memory_space<vmem>>, vector<1x32xf32>
    %110 = vector.shape_cast %109 : vector<1x32xf32> to vector<1x1x32xf32>
    %111 = vector.broadcast %110 : vector<1x1x32xf32> to vector<2x16x32xf32>
    %112 = arith.mulf %108, %111 : vector<2x16x32xf32>
    %113 = arith.addf %112, %0 : vector<2x16x32xf32>
    %c16_i32 = arith.constant 16 : i32
    %114 = arith.muli %arg0, %c16_i32 : i32
    %115 = tpu.iota {dimensions = array<i32: 1>} : vector<1x16x1xi32>
    %116 = vector.broadcast %114 : i32 to vector<1x16x1xi32>
    %117 = arith.addi %116, %115 : vector<1x16x1xi32>
    %c40_i32 = arith.constant 40 : i32
    %118 = vector.broadcast %c40_i32 : i32 to vector<1x16x1xi32>
    %119 = arith.cmpi slt, %117, %118 : vector<1x16x1xi32>
    %cst_38 = arith.constant 0.000000e+00 : f32
    %120 = vector.shape_cast %119 : vector<1x16x1xi1> to vector<1x16x1xi1>
    %121 = vector.broadcast %120 : vector<1x16x1xi1> to vector<2x16x32xi1>
    %122 = vector.broadcast %cst_38 : f32 to vector<2x16x32xf32>
    %123 = arith.select %121, %113, %122 : vector<2x16x32xi1>, vector<2x16x32xf32>
    %c0_39 = arith.constant 0 : index
    %c0_40 = arith.constant 0 : index
    %c0_41 = arith.constant 0 : index
    %124 = vector.load %arg13[%c0_39, %c0_40, %c0_41] : memref<2x16x32xf32, #tpu.memory_space<vmem>>, vector<2x16x32xf32>
    tpu.vector_store %arg13[%c0_39, %c0_40, %c0_41], %123 {strides = array<i32>} : memref<2x16x32xf32, #tpu.memory_space<vmem>>, vector<2x16x32xf32>,
    return
  }
  func.func @transform_0(%arg0: i32) -> (i32, i32, i32) {
    %c2_i32 = arith.constant 2 : i32
    %0 = arith.muli %arg0, %c2_i32 : i32
    %c1_i32 = arith.constant 1 : i32
    %1 = arith.subi %0, %c1_i32 : i32
    %c0_i32 = arith.constant 0 : i32
    %2 = arith.maxsi %1, %c0_i32 : i32
    %c0_i32_0 = arith.constant 0 : i32
    %c0_i32_1 = arith.constant 0 : i32
    %c0_i32_2 = arith.constant 0 : i32
    return %c0_i32_0, %2, %c0_i32_1 : i32, i32, i32
  }
  func.func @transform_1(%arg0: i32) -> (i32, i32, i32) {
    %c0_i32 = arith.constant 0 : i32
    %c0_i32_0 = arith.constant 0 : i32
    %c0_i32_1 = arith.constant 0 : i32
    return %c0_i32, %arg0, %c0_i32_0 : i32, i32, i32
  }
  func.func @transform_2(%arg0: i32) -> (i32, i32, i32) {
    %c1_i32 = arith.constant 1 : i32
    %0 = arith.addi %arg0, %c1_i32 : i32
    %c2_i32 = arith.constant 2 : i32
    %1 = arith.muli %0, %c2_i32 : i32
    %c5_i32 = arith.constant 5 : i32
    %2 = arith.minsi %1, %c5_i32 : i32
    %c0_i32 = arith.constant 0 : i32
    %c0_i32_0 = arith.constant 0 : i32
    %c0_i32_1 = arith.constant 0 : i32
    return %c0_i32, %2, %c0_i32_0 : i32, i32, i32
  }
  func.func @transform_3(%arg0: i32) -> (i32, i32) {
    %c0_i32 = arith.constant 0 : i32
    %c0_i32_0 = arith.constant 0 : i32
    %c0_i32_1 = arith.constant 0 : i32
    return %c0_i32, %c0_i32_0 : i32, i32
  }
  func.func @transform_4(%arg0: i32) -> (i32, i32) {
    %c0_i32 = arith.constant 0 : i32
    %c0_i32_0 = arith.constant 0 : i32
    %c0_i32_1 = arith.constant 0 : i32
    return %c0_i32, %c0_i32_0 : i32, i32
  }
  func.func @transform_5(%arg0: i32) -> (i32, i32) {
    %c0_i32 = arith.constant 0 : i32
    %c0_i32_0 = arith.constant 0 : i32
    %c0_i32_1 = arith.constant 0 : i32
    return %c0_i32, %c0_i32_0 : i32, i32
  }
  func.func @transform_6(%arg0: i32) -> (i32, i32) {
    %c0_i32 = arith.constant 0 : i32
    %c0_i32_0 = arith.constant 0 : i32
    %c0_i32_1 = arith.constant 0 : i32
    return %c0_i32, %c0_i32_0 : i32, i32
  }
  func.func @transform_7(%arg0: i32) -> (i32, i32) {
    %c0_i32 = arith.constant 0 : i32
    %c0_i32_0 = arith.constant 0 : i32
    %c0_i32_1 = arith.constant 0 : i32
    return %c0_i32, %c0_i32_0 : i32, i32
  }
  func.func @transform_8(%arg0: i32) -> (i32, i32) {
    %c0_i32 = arith.constant 0 : i32
    %c0_i32_0 = arith.constant 0 : i32
    %c0_i32_1 = arith.constant 0 : i32
    return %c0_i32, %c0_i32_0 : i32, i32
  }
  func.func @transform_9(%arg0: i32) -> (i32, i32) {
    %c0_i32 = arith.constant 0 : i32
    %c0_i32_0 = arith.constant 0 : i32
    %c0_i32_1 = arith.constant 0 : i32
    return %c0_i32, %c0_i32_0 : i32, i32
  }
  func.func @transform_10(%arg0: i32) -> (i32, i32) {
    %c0_i32 = arith.constant 0 : i32
    %c0_i32_0 = arith.constant 0 : i32
    %c0_i32_1 = arith.constant 0 : i32
    return %c0_i32, %c0_i32_0 : i32, i32
  }
  func.func @transform_11(%arg0: i32) -> (i32, i32) {
    %c0_i32 = arith.constant 0 : i32
    %c0_i32_0 = arith.constant 0 : i32
    %c0_i32_1 = arith.constant 0 : i32
    return %c0_i32, %c0_i32_0 : i32, i32
  }
  func.func @transform_12(%arg0: i32) -> (i32, i32, i32) {
    %c0_i32 = arith.constant 0 : i32
    %c0_i32_0 = arith.constant 0 : i32
    %c0_i32_1 = arith.constant 0 : i32
    return %c0_i32, %arg0, %c0_i32_0 : i32, i32, i32
  }
}

module attributes {stable_mosaic.version = 11 : i64} {
  func.func @block_kernel(%arg0: i32, %arg1: memref<2x8x64xf32, #tpu.memory_space<vmem>>, %arg2: memref<2x16x64xf32, #tpu.memory_space<vmem>>, %arg3: memref<2x8x64xf32, #tpu.memory_space<vmem>>, %arg4: memref<7x64xf32, #tpu.memory_space<vmem>>, %arg5: memref<1x64xf32, #tpu.memory_space<vmem>>, %arg6: memref<1x64xf32, #tpu.memory_space<vmem>>, %arg7: memref<1x64xf32, #tpu.memory_space<vmem>>, %arg8: memref<64x256xf32, #tpu.memory_space<vmem>>, %arg9: memref<1x256xf32, #tpu.memory_space<vmem>>, %arg10: memref<256x64xf32, #tpu.memory_space<vmem>>, %arg11: memref<1x64xf32, #tpu.memory_space<vmem>>, %arg12: memref<1x64xf32, #tpu.memory_space<vmem>>, %arg13: memref<2x16x64xf32, #tpu.memory_space<vmem>>) attributes {dimension_semantics = [#tpu.dimension_semantics<parallel>], iteration_bounds = array<i64: 3>, scalar_prefetch = 0 : i64, scratch_operands = 0 : i64, tpu.core_type = #tpu.core_type<tc>, window_params = [{transform_indices = @transform_0, window_bounds = array<i64: 2, 8, 64>}, {transform_indices = @transform_1, window_bounds = array<i64: 2, 16, 64>}, {transform_indices = @transform_2, window_bounds = array<i64: 2, 8, 64>}, {pipeline_mode = #tpu.pipeline_mode<synchronous>, transform_indices = @transform_3, window_bounds = array<i64: 7, 64>}, {pipeline_mode = #tpu.pipeline_mode<synchronous>, transform_indices = @transform_4, window_bounds = array<i64: 1, 64>}, {pipeline_mode = #tpu.pipeline_mode<synchronous>, transform_indices = @transform_5, window_bounds = array<i64: 1, 64>}, {pipeline_mode = #tpu.pipeline_mode<synchronous>, transform_indices = @transform_6, window_bounds = array<i64: 1, 64>}, {pipeline_mode = #tpu.pipeline_mode<synchronous>, transform_indices = @transform_7, window_bounds = array<i64: 64, 256>}, {pipeline_mode = #tpu.pipeline_mode<synchronous>, transform_indices = @transform_8, window_bounds = array<i64: 1, 256>}, {pipeline_mode = #tpu.pipeline_mode<synchronous>, transform_indices = @transform_9, window_bounds = array<i64: 256, 64>}, {pipeline_mode = #tpu.pipeline_mode<synchronous>, transform_indices = @transform_10, window_bounds = array<i64: 1, 64>}, {pipeline_mode = #tpu.pipeline_mode<synchronous>, transform_indices = @transform_11, window_bounds = array<i64: 1, 64>}, {transform_indices = @transform_12, window_bounds = array<i64: 2, 16, 64>}]} {
    %c0 = arith.constant 0 : index
    %c0_0 = arith.constant 0 : index
    %c0_1 = arith.constant 0 : index
    %0 = vector.load %arg2[%c0, %c0_0, %c0_1] : memref<2x16x64xf32, #tpu.memory_space<vmem>>, vector<2x16x64xf32>
    %c0_i32 = arith.constant 0 : i32
    %1 = arith.cmpi sgt, %arg0, %c0_i32 : i32
    %c0_2 = arith.constant 0 : index
    %c0_3 = arith.constant 0 : index
    %c0_4 = arith.constant 0 : index
    %2 = vector.load %arg1[%c0_2, %c0_3, %c0_4] : memref<2x8x64xf32, #tpu.memory_space<vmem>>, vector<2x8x64xf32>
    %cst = arith.constant 0.000000e+00 : f32
    %3 = vector.broadcast %cst : f32 to vector<2x8x64xf32>
    %4 = arith.select %1, %2, %3 : vector<2x8x64xf32>
    %c2_i32 = arith.constant 2 : i32
    %5 = arith.cmpi slt, %arg0, %c2_i32 : i32
    %c0_5 = arith.constant 0 : index
    %c0_6 = arith.constant 0 : index
    %c0_7 = arith.constant 0 : index
    %6 = vector.load %arg3[%c0_5, %c0_6, %c0_7] : memref<2x8x64xf32, #tpu.memory_space<vmem>>, vector<2x8x64xf32>
    %cst_8 = arith.constant 0.000000e+00 : f32
    %7 = vector.broadcast %cst_8 : f32 to vector<2x8x64xf32>
    %8 = arith.select %5, %6, %7 : vector<2x8x64xf32>
    %9 = tpu.concatenate %4, %0, %8 in 1 : vector<2x8x64xf32>, vector<2x16x64xf32>, vector<2x8x64xf32> -> vector<2x32x64xf32>
    %c0_9 = arith.constant 0 : index
    %c0_10 = arith.constant 0 : index
    %10 = vector.load %arg4[%c0_9, %c0_10] : memref<7x64xf32, #tpu.memory_space<vmem>>, vector<7x64xf32>
    %cst_11 = arith.constant 0.000000e+00 : f32
    %11 = vector.broadcast %cst_11 : f32 to vector<2x16x64xf32>
    %c0_12 = arith.constant 0 : index
    %c0_13 = arith.constant 0 : index
    %12 = vector.load %arg5[%c0_12, %c0_13] : memref<1x64xf32, #tpu.memory_space<vmem>>, vector<1x64xf32>
    %13 = vector.shape_cast %12 : vector<1x64xf32> to vector<1x1x64xf32>
    %14 = vector.broadcast %13 : vector<1x1x64xf32> to vector<2x16x64xf32>
    %15 = arith.addf %11, %14 : vector<2x16x64xf32>
    %16 = vector.extract_strided_slice %9 {offsets = [0, 5, 0], sizes = [2, 16, 64], strides = [1, 1, 1]} : vector<2x32x64xf32> to vector<2x16x64xf32>
    %17 = vector.extract_strided_slice %10 {offsets = [0, 0], sizes = [1, 64], strides = [1, 1]} : vector<7x64xf32> to vector<1x64xf32>
    %18 = vector.shape_cast %17 : vector<1x64xf32> to vector<64xf32>
    %19 = vector.shape_cast %18 : vector<64xf32> to vector<1x1x64xf32>
    %20 = vector.broadcast %19 : vector<1x1x64xf32> to vector<2x16x64xf32>
    %21 = arith.mulf %16, %20 : vector<2x16x64xf32>
    %22 = arith.addf %15, %21 : vector<2x16x64xf32>
    %23 = vector.extract_strided_slice %9 {offsets = [0, 6, 0], sizes = [2, 16, 64], strides = [1, 1, 1]} : vector<2x32x64xf32> to vector<2x16x64xf32>
    %24 = vector.extract_strided_slice %10 {offsets = [1, 0], sizes = [1, 64], strides = [1, 1]} : vector<7x64xf32> to vector<1x64xf32>
    %25 = vector.shape_cast %24 : vector<1x64xf32> to vector<64xf32>
    %26 = vector.shape_cast %25 : vector<64xf32> to vector<1x1x64xf32>
    %27 = vector.broadcast %26 : vector<1x1x64xf32> to vector<2x16x64xf32>
    %28 = arith.mulf %23, %27 : vector<2x16x64xf32>
    %29 = arith.addf %22, %28 : vector<2x16x64xf32>
    %30 = vector.extract_strided_slice %9 {offsets = [0, 7, 0], sizes = [2, 16, 64], strides = [1, 1, 1]} : vector<2x32x64xf32> to vector<2x16x64xf32>
    %31 = vector.extract_strided_slice %10 {offsets = [2, 0], sizes = [1, 64], strides = [1, 1]} : vector<7x64xf32> to vector<1x64xf32>
    %32 = vector.shape_cast %31 : vector<1x64xf32> to vector<64xf32>
    %33 = vector.shape_cast %32 : vector<64xf32> to vector<1x1x64xf32>
    %34 = vector.broadcast %33 : vector<1x1x64xf32> to vector<2x16x64xf32>
    %35 = arith.mulf %30, %34 : vector<2x16x64xf32>
    %36 = arith.addf %29, %35 : vector<2x16x64xf32>
    %37 = vector.extract_strided_slice %9 {offsets = [0, 8, 0], sizes = [2, 16, 64], strides = [1, 1, 1]} : vector<2x32x64xf32> to vector<2x16x64xf32>
    %38 = vector.extract_strided_slice %10 {offsets = [3, 0], sizes = [1, 64], strides = [1, 1]} : vector<7x64xf32> to vector<1x64xf32>
    %39 = vector.shape_cast %38 : vector<1x64xf32> to vector<64xf32>
    %40 = vector.shape_cast %39 : vector<64xf32> to vector<1x1x64xf32>
    %41 = vector.broadcast %40 : vector<1x1x64xf32> to vector<2x16x64xf32>
    %42 = arith.mulf %37, %41 : vector<2x16x64xf32>
    %43 = arith.addf %36, %42 : vector<2x16x64xf32>
    %44 = vector.extract_strided_slice %9 {offsets = [0, 9, 0], sizes = [2, 16, 64], strides = [1, 1, 1]} : vector<2x32x64xf32> to vector<2x16x64xf32>
    %45 = vector.extract_strided_slice %10 {offsets = [4, 0], sizes = [1, 64], strides = [1, 1]} : vector<7x64xf32> to vector<1x64xf32>
    %46 = vector.shape_cast %45 : vector<1x64xf32> to vector<64xf32>
    %47 = vector.shape_cast %46 : vector<64xf32> to vector<1x1x64xf32>
    %48 = vector.broadcast %47 : vector<1x1x64xf32> to vector<2x16x64xf32>
    %49 = arith.mulf %44, %48 : vector<2x16x64xf32>
    %50 = arith.addf %43, %49 : vector<2x16x64xf32>
    %51 = vector.extract_strided_slice %9 {offsets = [0, 10, 0], sizes = [2, 16, 64], strides = [1, 1, 1]} : vector<2x32x64xf32> to vector<2x16x64xf32>
    %52 = vector.extract_strided_slice %10 {offsets = [5, 0], sizes = [1, 64], strides = [1, 1]} : vector<7x64xf32> to vector<1x64xf32>
    %53 = vector.shape_cast %52 : vector<1x64xf32> to vector<64xf32>
    %54 = vector.shape_cast %53 : vector<64xf32> to vector<1x1x64xf32>
    %55 = vector.broadcast %54 : vector<1x1x64xf32> to vector<2x16x64xf32>
    %56 = arith.mulf %51, %55 : vector<2x16x64xf32>
    %57 = arith.addf %50, %56 : vector<2x16x64xf32>
    %58 = vector.extract_strided_slice %9 {offsets = [0, 11, 0], sizes = [2, 16, 64], strides = [1, 1, 1]} : vector<2x32x64xf32> to vector<2x16x64xf32>
    %59 = vector.extract_strided_slice %10 {offsets = [6, 0], sizes = [1, 64], strides = [1, 1]} : vector<7x64xf32> to vector<1x64xf32>
    %60 = vector.shape_cast %59 : vector<1x64xf32> to vector<64xf32>
    %61 = vector.shape_cast %60 : vector<64xf32> to vector<1x1x64xf32>
    %62 = vector.broadcast %61 : vector<1x1x64xf32> to vector<2x16x64xf32>
    %63 = arith.mulf %58, %62 : vector<2x16x64xf32>
    %64 = arith.addf %57, %63 : vector<2x16x64xf32>
    %c0_14 = arith.constant 0 : index
    %c0_15 = arith.constant 0 : index
    %65 = vector.load %arg6[%c0_14, %c0_15] : memref<1x64xf32, #tpu.memory_space<vmem>>, vector<1x64xf32>
    %c0_16 = arith.constant 0 : index
    %c0_17 = arith.constant 0 : index
    %66 = vector.load %arg7[%c0_16, %c0_17] : memref<1x64xf32, #tpu.memory_space<vmem>>, vector<1x64xf32>
    %cst_18 = arith.constant dense<0.000000e+00> : vector<2x16xf32>
    %67 = vector.multi_reduction <add>, %64, %cst_18 [2] : vector<2x16x64xf32> to vector<2x16xf32>
    %68 = vector.shape_cast %67 : vector<2x16xf32> to vector<2x16x1xf32>
    %cst_19 = arith.constant 6.400000e+01 : f32
    %69 = vector.broadcast %cst_19 : f32 to vector<2x16x1xf32>
    %70 = arith.divf %68, %69 : vector<2x16x1xf32>
    %71 = vector.broadcast %70 : vector<2x16x1xf32> to vector<2x16x64xf32>
    %72 = arith.subf %64, %71 : vector<2x16x64xf32>
    %73 = arith.mulf %72, %72 : vector<2x16x64xf32>
    %cst_20 = arith.constant dense<0.000000e+00> : vector<2x16xf32>
    %74 = vector.multi_reduction <add>, %73, %cst_20 [2] : vector<2x16x64xf32> to vector<2x16xf32>
    %75 = vector.shape_cast %74 : vector<2x16xf32> to vector<2x16x1xf32>
    %cst_21 = arith.constant 6.400000e+01 : f32
    %76 = vector.broadcast %cst_21 : f32 to vector<2x16x1xf32>
    %77 = arith.divf %75, %76 : vector<2x16x1xf32>
    %cst_22 = arith.constant 9.99999997E-7 : f32
    %78 = vector.broadcast %cst_22 : f32 to vector<2x16x1xf32>
    %79 = arith.addf %77, %78 : vector<2x16x1xf32>
    %80 = math.rsqrt %79 : vector<2x16x1xf32>
    %81 = vector.broadcast %80 : vector<2x16x1xf32> to vector<2x16x64xf32>
    %82 = arith.mulf %72, %81 : vector<2x16x64xf32>
    %83 = vector.shape_cast %65 : vector<1x64xf32> to vector<1x1x64xf32>
    %84 = vector.broadcast %83 : vector<1x1x64xf32> to vector<2x16x64xf32>
    %85 = arith.mulf %82, %84 : vector<2x16x64xf32>
    %86 = vector.shape_cast %66 : vector<1x64xf32> to vector<1x1x64xf32>
    %87 = vector.broadcast %86 : vector<1x1x64xf32> to vector<2x16x64xf32>
    %88 = arith.addf %85, %87 : vector<2x16x64xf32>
    %89 = vector.shape_cast %88 : vector<2x16x64xf32> to vector<32x64xf32>
    %c0_23 = arith.constant 0 : index
    %c0_24 = arith.constant 0 : index
    %90 = vector.load %arg8[%c0_23, %c0_24] : memref<64x256xf32, #tpu.memory_space<vmem>>, vector<64x256xf32>
    %cst_25 = arith.constant dense<0.000000e+00> : vector<32x256xf32>
    %91 = tpu.matmul %89, %90, %cst_25 {dimension_numbers = #tpu.dot_dimension_numbers<[1], [0], [0], [1], [0, 0, 1, 1], [], []>} : vector<32x64xf32>, vector<64x256xf32>, vector<32x256xf32> -> vector<32x256xf32>
    %c0_26 = arith.constant 0 : index
    %c0_27 = arith.constant 0 : index
    %92 = vector.load %arg9[%c0_26, %c0_27] : memref<1x256xf32, #tpu.memory_space<vmem>>, vector<1x256xf32>
    %93 = vector.broadcast %92 : vector<1x256xf32> to vector<32x256xf32>
    %94 = arith.addf %91, %93 : vector<32x256xf32>
    %cst_28 = arith.constant 5.000000e-01 : f32
    %95 = vector.broadcast %cst_28 : f32 to vector<32x256xf32>
    %96 = arith.mulf %95, %94 : vector<32x256xf32>
    %cst_29 = arith.constant 0.707106769 : f32
    %97 = vector.broadcast %cst_29 : f32 to vector<32x256xf32>
    %98 = arith.mulf %94, %97 : vector<32x256xf32>
    %99 = math.erf %98 : vector<32x256xf32>
    %cst_30 = arith.constant 1.000000e+00 : f32
    %100 = vector.broadcast %cst_30 : f32 to vector<32x256xf32>
    %101 = arith.addf %100, %99 : vector<32x256xf32>
    %102 = arith.mulf %96, %101 : vector<32x256xf32>
    %c0_31 = arith.constant 0 : index
    %c0_32 = arith.constant 0 : index
    %103 = vector.load %arg10[%c0_31, %c0_32] : memref<256x64xf32, #tpu.memory_space<vmem>>, vector<256x64xf32>
    %cst_33 = arith.constant dense<0.000000e+00> : vector<32x64xf32>
    %104 = tpu.matmul %102, %103, %cst_33 {dimension_numbers = #tpu.dot_dimension_numbers<[1], [0], [0], [1], [0, 0, 1, 1], [], []>} : vector<32x256xf32>, vector<256x64xf32>, vector<32x64xf32> -> vector<32x64xf32>
    %c0_34 = arith.constant 0 : index
    %c0_35 = arith.constant 0 : index
    %105 = vector.load %arg11[%c0_34, %c0_35] : memref<1x64xf32, #tpu.memory_space<vmem>>, vector<1x64xf32>
    %106 = vector.broadcast %105 : vector<1x64xf32> to vector<32x64xf32>
    %107 = arith.addf %104, %106 : vector<32x64xf32>
    %108 = vector.shape_cast %107 : vector<32x64xf32> to vector<2x16x64xf32>
    %c0_36 = arith.constant 0 : index
    %c0_37 = arith.constant 0 : index
    %109 = vector.load %arg12[%c0_36, %c0_37] : memref<1x64xf32, #tpu.memory_space<vmem>>, vector<1x64xf32>
    %110 = vector.shape_cast %109 : vector<1x64xf32> to vector<1x1x64xf32>
    %111 = vector.broadcast %110 : vector<1x1x64xf32> to vector<2x16x64xf32>
    %112 = arith.mulf %108, %111 : vector<2x16x64xf32>
    %113 = arith.addf %112, %0 : vector<2x16x64xf32>
    %c16_i32 = arith.constant 16 : i32
    %114 = arith.muli %arg0, %c16_i32 : i32
    %115 = tpu.iota {dimensions = array<i32: 1>} : vector<1x16x1xi32>
    %116 = vector.broadcast %114 : i32 to vector<1x16x1xi32>
    %117 = arith.addi %116, %115 : vector<1x16x1xi32>
    %c40_i32 = arith.constant 40 : i32
    %118 = vector.broadcast %c40_i32 : i32 to vector<1x16x1xi32>
    %119 = arith.cmpi slt, %117, %118 : vector<1x16x1xi32>
    %cst_38 = arith.constant 0.000000e+00 : f32
    %120 = vector.shape_cast %119 : vector<1x16x1xi1> to vector<1x16x1xi1>
    %121 = vector.broadcast %120 : vector<1x16x1xi1> to vector<2x16x64xi1>
    %122 = vector.broadcast %cst_38 : f32 to vector<2x16x64xf32>
    %123 = arith.select %121, %113, %122 : vector<2x16x64xi1>, vector<2x16x64xf32>
    %c0_39 = arith.constant 0 : index
    %c0_40 = arith.constant 0 : index
    %c0_41 = arith.constant 0 : index
    %124 = vector.load %arg13[%c0_39, %c0_40, %c0_41] : memref<2x16x64xf32, #tpu.memory_space<vmem>>, vector<2x16x64xf32>
    tpu.vector_store %arg13[%c0_39, %c0_40, %c0_41], %123 {strides = array<i32>} : memref<2x16x64xf32, #tpu.memory_space<vmem>>, vector<2x16x64xf32>,
    return
  }
  func.func @transform_0(%arg0: i32) -> (i32, i32, i32) {
    %c2_i32 = arith.constant 2 : i32
    %0 = arith.muli %arg0, %c2_i32 : i32
    %c1_i32 = arith.constant 1 : i32
    %1 = arith.subi %0, %c1_i32 : i32
    %c0_i32 = arith.constant 0 : i32
    %2 = arith.maxsi %1, %c0_i32 : i32
    %c0_i32_0 = arith.constant 0 : i32
    %c0_i32_1 = arith.constant 0 : i32
    %c0_i32_2 = arith.constant 0 : i32
    return %c0_i32_0, %2, %c0_i32_1 : i32, i32, i32
  }
  func.func @transform_1(%arg0: i32) -> (i32, i32, i32) {
    %c0_i32 = arith.constant 0 : i32
    %c0_i32_0 = arith.constant 0 : i32
    %c0_i32_1 = arith.constant 0 : i32
    return %c0_i32, %arg0, %c0_i32_0 : i32, i32, i32
  }
  func.func @transform_2(%arg0: i32) -> (i32, i32, i32) {
    %c1_i32 = arith.constant 1 : i32
    %0 = arith.addi %arg0, %c1_i32 : i32
    %c2_i32 = arith.constant 2 : i32
    %1 = arith.muli %0, %c2_i32 : i32
    %c5_i32 = arith.constant 5 : i32
    %2 = arith.minsi %1, %c5_i32 : i32
    %c0_i32 = arith.constant 0 : i32
    %c0_i32_0 = arith.constant 0 : i32
    %c0_i32_1 = arith.constant 0 : i32
    return %c0_i32, %2, %c0_i32_0 : i32, i32, i32
  }
  func.func @transform_3(%arg0: i32) -> (i32, i32) {
    %c0_i32 = arith.constant 0 : i32
    %c0_i32_0 = arith.constant 0 : i32
    %c0_i32_1 = arith.constant 0 : i32
    return %c0_i32, %c0_i32_0 : i32, i32
  }
  func.func @transform_4(%arg0: i32) -> (i32, i32) {
    %c0_i32 = arith.constant 0 : i32
    %c0_i32_0 = arith.constant 0 : i32
    %c0_i32_1 = arith.constant 0 : i32
    return %c0_i32, %c0_i32_0 : i32, i32
  }
  func.func @transform_5(%arg0: i32) -> (i32, i32) {
    %c0_i32 = arith.constant 0 : i32
    %c0_i32_0 = arith.constant 0 : i32
    %c0_i32_1 = arith.constant 0 : i32
    return %c0_i32, %c0_i32_0 : i32, i32
  }
  func.func @transform_6(%arg0: i32) -> (i32, i32) {
    %c0_i32 = arith.constant 0 : i32
    %c0_i32_0 = arith.constant 0 : i32
    %c0_i32_1 = arith.constant 0 : i32
    return %c0_i32, %c0_i32_0 : i32, i32
  }
  func.func @transform_7(%arg0: i32) -> (i32, i32) {
    %c0_i32 = arith.constant 0 : i32
    %c0_i32_0 = arith.constant 0 : i32
    %c0_i32_1 = arith.constant 0 : i32
    return %c0_i32, %c0_i32_0 : i32, i32
  }
  func.func @transform_8(%arg0: i32) -> (i32, i32) {
    %c0_i32 = arith.constant 0 : i32
    %c0_i32_0 = arith.constant 0 : i32
    %c0_i32_1 = arith.constant 0 : i32
    return %c0_i32, %c0_i32_0 : i32, i32
  }
  func.func @transform_9(%arg0: i32) -> (i32, i32) {
    %c0_i32 = arith.constant 0 : i32
    %c0_i32_0 = arith.constant 0 : i32
    %c0_i32_1 = arith.constant 0 : i32
    return %c0_i32, %c0_i32_0 : i32, i32
  }
  func.func @transform_10(%arg0: i32) -> (i32, i32) {
    %c0_i32 = arith.constant 0 : i32
    %c0_i32_0 = arith.constant 0 : i32
    %c0_i32_1 = arith.constant 0 : i32
    return %c0_i32, %c0_i32_0 : i32, i32
  }
  func.func @transform_11(%arg0: i32) -> (i32, i32) {
    %c0_i32 = arith.constant 0 : i32
    %c0_i32_0 = arith.constant 0 : i32
    %c0_i32_1 = arith.constant 0 : i32
    return %c0_i32, %c0_i32_0 : i32, i32
  }
  func.func @transform_12(%arg0: i32) -> (i32, i32, i32) {
    %c0_i32 = arith.constant 0 : i32
    %c0_i32_0 = arith.constant 0 : i32
    %c0_i32_1 = arith.constant 0 : i32
    return %c0_i32, %arg0, %c0_i32_0 : i32, i32, i32
  }
}

module attributes {stable_mosaic.version = 11 : i64} {
  func.func @layernorm_kernel(%arg0: i32, %arg1: memref<2x16x64xf32, #tpu.memory_space<vmem>>, %arg2: memref<1x64xf32, #tpu.memory_space<vmem>>, %arg3: memref<1x64xf32, #tpu.memory_space<vmem>>, %arg4: memref<2x16x64xf32, #tpu.memory_space<vmem>>) attributes {dimension_semantics = [#tpu.dimension_semantics<parallel>], iteration_bounds = array<i64: 3>, scalar_prefetch = 0 : i64, scratch_operands = 0 : i64, tpu.core_type = #tpu.core_type<tc>, window_params = [{transform_indices = @transform_0, window_bounds = array<i64: 2, 16, 64>}, {pipeline_mode = #tpu.pipeline_mode<synchronous>, transform_indices = @transform_1, window_bounds = array<i64: 1, 64>}, {pipeline_mode = #tpu.pipeline_mode<synchronous>, transform_indices = @transform_2, window_bounds = array<i64: 1, 64>}, {transform_indices = @transform_3, window_bounds = array<i64: 2, 16, 64>}]} {
    %c0 = arith.constant 0 : index
    %c0_0 = arith.constant 0 : index
    %c0_1 = arith.constant 0 : index
    %0 = vector.load %arg1[%c0, %c0_0, %c0_1] : memref<2x16x64xf32, #tpu.memory_space<vmem>>, vector<2x16x64xf32>
    %c0_2 = arith.constant 0 : index
    %c0_3 = arith.constant 0 : index
    %1 = vector.load %arg2[%c0_2, %c0_3] : memref<1x64xf32, #tpu.memory_space<vmem>>, vector<1x64xf32>
    %c0_4 = arith.constant 0 : index
    %c0_5 = arith.constant 0 : index
    %2 = vector.load %arg3[%c0_4, %c0_5] : memref<1x64xf32, #tpu.memory_space<vmem>>, vector<1x64xf32>
    %cst = arith.constant dense<0.000000e+00> : vector<2x16xf32>
    %3 = vector.multi_reduction <add>, %0, %cst [2] : vector<2x16x64xf32> to vector<2x16xf32>
    %4 = vector.shape_cast %3 : vector<2x16xf32> to vector<2x16x1xf32>
    %cst_6 = arith.constant 6.400000e+01 : f32
    %5 = vector.broadcast %cst_6 : f32 to vector<2x16x1xf32>
    %6 = arith.divf %4, %5 : vector<2x16x1xf32>
    %7 = vector.broadcast %6 : vector<2x16x1xf32> to vector<2x16x64xf32>
    %8 = arith.subf %0, %7 : vector<2x16x64xf32>
    %9 = arith.mulf %8, %8 : vector<2x16x64xf32>
    %cst_7 = arith.constant dense<0.000000e+00> : vector<2x16xf32>
    %10 = vector.multi_reduction <add>, %9, %cst_7 [2] : vector<2x16x64xf32> to vector<2x16xf32>
    %11 = vector.shape_cast %10 : vector<2x16xf32> to vector<2x16x1xf32>
    %cst_8 = arith.constant 6.400000e+01 : f32
    %12 = vector.broadcast %cst_8 : f32 to vector<2x16x1xf32>
    %13 = arith.divf %11, %12 : vector<2x16x1xf32>
    %cst_9 = arith.constant 9.99999997E-7 : f32
    %14 = vector.broadcast %cst_9 : f32 to vector<2x16x1xf32>
    %15 = arith.addf %13, %14 : vector<2x16x1xf32>
    %16 = math.rsqrt %15 : vector<2x16x1xf32>
    %17 = vector.broadcast %16 : vector<2x16x1xf32> to vector<2x16x64xf32>
    %18 = arith.mulf %8, %17 : vector<2x16x64xf32>
    %19 = vector.shape_cast %1 : vector<1x64xf32> to vector<1x1x64xf32>
    %20 = vector.broadcast %19 : vector<1x1x64xf32> to vector<2x16x64xf32>
    %21 = arith.mulf %18, %20 : vector<2x16x64xf32>
    %22 = vector.shape_cast %2 : vector<1x64xf32> to vector<1x1x64xf32>
    %23 = vector.broadcast %22 : vector<1x1x64xf32> to vector<2x16x64xf32>
    %24 = arith.addf %21, %23 : vector<2x16x64xf32>
    %c0_10 = arith.constant 0 : index
    %c0_11 = arith.constant 0 : index
    %c0_12 = arith.constant 0 : index
    %25 = vector.load %arg4[%c0_10, %c0_11, %c0_12] : memref<2x16x64xf32, #tpu.memory_space<vmem>>, vector<2x16x64xf32>
    tpu.vector_store %arg4[%c0_10, %c0_11, %c0_12], %24 {strides = array<i32>} : memref<2x16x64xf32, #tpu.memory_space<vmem>>, vector<2x16x64xf32>,
    return
  }
  func.func @transform_0(%arg0: i32) -> (i32, i32, i32) {
    %c0_i32 = arith.constant 0 : i32
    %c0_i32_0 = arith.constant 0 : i32
    %c0_i32_1 = arith.constant 0 : i32
    return %c0_i32, %arg0, %c0_i32_0 : i32, i32, i32
  }
  func.func @transform_1(%arg0: i32) -> (i32, i32) {
    %c0_i32 = arith.constant 0 : i32
    %c0_i32_0 = arith.constant 0 : i32
    %c0_i32_1 = arith.constant 0 : i32
    return %c0_i32, %c0_i32_0 : i32, i32
  }
  func.func @transform_2(%arg0: i32) -> (i32, i32) {
    %c0_i32 = arith.constant 0 : i32
    %c0_i32_0 = arith.constant 0 : i32
    %c0_i32_1 = arith.constant 0 : i32
    return %c0_i32, %c0_i32_0 : i32, i32
  }
  func.func @transform_3(%arg0: i32) -> (i32, i32, i32) {
    %c0_i32 = arith.constant 0 : i32
    %c0_i32_0 = arith.constant 0 : i32
    %c0_i32_1 = arith.constant 0 : i32
    return %c0_i32, %arg0, %c0_i32_0 : i32, i32, i32
  }
}

</mosaic_0001>

<bundles_post_ra>
// kernel: convnext_encoder_forward.7
= control target key start
LH: loop header
LB: loop body
LE: loop exit
PB: predicated region body
PF: predicated region fallthrough
CT: control target
= control target key end

     0   :  { %s731_s18 = smov 0   ;;  %s733_s19 = smov 0   ;;  %s837_s0 = inlined_call_operand.vmem [shape: f32[2,48,32], index: 0, kind: input, shape index: {}]   ;;  %s838_s1 = inlined_call_operand.vmem [shape: f32[1,32], index: 1, kind: input, shape index: {}]   ;;  %s839_s2 = inlined_call_operand.vmem [shape: f32[1,32], index: 2, kind: input, shape index: {}]   ;;  %s840_s3 = inlined_call_operand.vmem [shape: f32[32,64], index: 3, kind: input, shape index: {}]   ;;  %s841_s4 = inlined_call_operand.vmem [shape: f32[1,64], index: 4, kind: input, shape index: {}]   ;;  %s842_s5 = inlined_call_operand.vmem [shape: f32[2,48,64], index: 5, kind: output, shape index: {}]  }
   0x1   :  { %s735_s20 = smov 0  }
   0x2 LB: > { %s590_s21 = sadd.s32 4294967295, %s699_s20   ;;  %s748_s22 = sadd.s32 1, %s699_s20   ;;  %s699_s20 = sphi %s735_s20, %s846_s20   ;;  %s695_s19 = sphi %s733_s19, %s845_s19   ;;  %s691_s18 = sphi %s731_s18, %s844_s18  }
   0x3   : > { %s19_s23 = ssub.s32 %s699_s20, %s748_s22  ;;  %s22_s24 = sadd.s32 1, %s695_s19 }
   0x4   : > { %p20_p0 = scmp.eq.s32.totalorder %s19_s23, 0  ;;  %p29_p1 = scmp.ne.s32.totalorder %s695_s19, %s691_s18 }
   0x5   : > { %p30_p2 = scmp.eq.s32.totalorder %s699_s20, 0  ;;  %p143_p3 = scmp.eq.s32.totalorder %s590_s21, 2 }
   0x6   : > { %s759_s25 = scalar_select %p20_p0, %s695_s19, %s22_s24  }
   0x7   : > { %p31_p4 = por %p30_p2, %p29_p1  ;;  %p761_p5 = por %p143_p3, %p29_p1 }
   0x8   : > { %p593_p6 = scmp.ge.s32.totalorder %s699_s20, 3 }
   0xa   : > { %177 = sbr.rel (%p593_p6) target bundleno = 21 (0x15), region = 32 }
   0xf   : > { %180 = sbr.rel (!%p31_p4) target bundleno = 21 (0x15), region = 36  ;;  %s182_s27 = sand.u32 (%p31_p4), 1, %s695_s19  }
  0x10   : > { %s613_s28 = sshll.u32 (%p31_p4), %s699_s20, 4  ;;  %s594_s29 = sshll.u32 (%p31_p4), %s182_s27, 5 }
  0x11   : > { %s187_s7 = scalar_lea.vmem (%p31_p4), %s837_s0, %s613_s28  ;;  %s184_s8 = scalar_lea.vmem (%p31_p4), [#allocation2], %s594_s29 }
  0x12   : > { %v222_v0 = vld [vmem:[%s187_s7] sm:$0xff] (%p31_p4)  ;;  %v224_v1 = vld [vmem:[%s187_s7 + $0x8] sm:$0xff] (%p31_p4)  ;;  %v226_v2 = vld [vmem:[%s187_s7 + $0x30] sm:$0xff] (%p31_p4) }
  0x13   : > { %223 = vst [vmem:[%s184_s8] sm:$0xff] (%p31_p4), %v222_v0  ;;  %225 = vst [vmem:[%s184_s8 + $0x8] sm:$0xff] (%p31_p4), %v224_v1  ;;  %v228_v3 = vld [vmem:[%s187_s7 + $0x38] sm:$0xff] (%p31_p4) }
  0x14   : > { %227 = vst [vmem:[%s184_s8 + $0x10] sm:$0xff] %v226_v2  ;;  %229 = vst [vmem:[%s184_s8 + $0x18] sm:$0xff] %v228_v3 }
  0x15 PF: > { %p597_p7 = scmp.ge.s32.totalorder %s699_s20, 1  ;;  %p234_p8 = scmp.lt.s32.totalorder %s699_s20, 4 }
  0x17   : > { %p235_p9 = pnand %p597_p7, %p234_p8 }
  0x18   : > { %s241_s9 = sand.u32 (!%p235_p9), 1, %s691_s18   ;;  %s607_s30 = sshll.u32 (!%p235_p9), %s590_s21, 4 }
  0x19   : > { %238 = sbr.rel (%p235_p9) target bundleno = 554 (0x22a), region = 74  ;;  %s774_s10 = sshll.u32 (!%p235_p9), %s241_s9, 5 }
  0x1a   : > { %s243_s11 = scalar_lea.vmem (!%p235_p9), [#allocation2], %s774_s10  ;;  %s266_s20 = scalar_lea.vmem (!%p235_p9), [#allocation3], %s774_s10 }
  0x1e   : > { %vm275_vm0 = vcmask 261120   ;;  %v269_v4 = vld [vmem:[%s243_s11] sm:$0xff]  ;;  %v270_v5 = vld [vmem:[%s243_s11 + $0x8] sm:$0xff]  ;;  %v271_v6 = vld [vmem:[%s243_s11 + $0x10] sm:$0xff]  ;;  %v458_v2 = vlaneseq  ;;  %vm474_vm2 = vcmask 523264   ;;  %s488_s9 = scalar_lea.vmem (%p761_p5), %s842_s5, %s607_s30 }
  0x1f   : > { %v276_v7 = vsel %vm275_vm0, %v269_v4, 0.0  ;;  %v279_v8 = vsel %vm275_vm0, %v270_v5, 0.0  ;;  %v272_v9 = vld [vmem:[%s243_s11 + $0x18] sm:$0xff]  ;;  %v282_v10 = vsel %vm275_vm0, %v271_v6, 0.0  ;;  %v351_v33 = vld [vmem:[%s840_s3 + $0x10] sm:$0xff]  ;;  %v350_v34 = vld [vmem:[%s840_s3 + $0x8] sm:$0xff] }
  0x20   : > { %277 = vadd.xlane.f32.xlu0 %v276_v7  ;;  %280 = vadd.xlane.f32.xlu1 %v279_v8  ;;  %v285_v11 = vsel %vm275_vm0, %v272_v9, 0.0  ;;  %v352_v32 = vld [vmem:[%s840_s3 + $0x18] sm:$0xff]  ;;  %v349_v35 = vld [vmem:[%s840_s3] sm:$0xff]  ;;  %v459_v3 = vshrl.u32 %v458_v2, 7 }
  0x21   : > { %623 = vmatprep.subr.mxu0 %v352_v32  ;;  %637 = vmatprep.subr.mxu1 %v352_v32  ;;  %v600_v49 = vld [vmem:[%s838_s1] ss:$0 sm:$0xff] }
  0x22   : > { %624 = vmatpush3.msra.mxu0 %v352_v32  ;;  %641 = vmatpush3.msra.mxu1 %v352_v32  ;;  %v601_v51 = vld [vmem:[%s839_s2] ss:$0 sm:$0xff] }
  0x23   : > { %625 = vmatprep.subr.mxu0 %v351_v33  ;;  %638 = vmatprep.subr.mxu1 %v351_v33  ;;  %v602_v7 = vld [vmem:[%s841_s4] ss:$0 sm:$0xff] }
  0x24   : > { %283 = vadd.xlane.f32.xlu0 %v282_v10  ;;  %286 = vadd.xlane.f32.xlu1 %v285_v11 }
  0x25   : > { %626 = vmatpush3.msra.mxu0 %v351_v33  ;;  %642 = vmatpush3.msra.mxu1 %v351_v33 }
  0x26   : > { %627 = vmatprep.subr.mxu0 %v350_v34  ;;  %639 = vmatprep.subr.mxu1 %v350_v34 }
  0x27   : > { %628 = vmatpush3.msra.mxu0 %v350_v34  ;;  %643 = vmatpush3.msra.mxu1 %v350_v34 }
  0x28   : > { %629 = vmatprep.subr.mxu0 %v349_v35  ;;  %640 = vmatprep.subr.mxu1 %v349_v35 }
  0x29   : > { %630 = vmatpush3.msra.mxu0 %v349_v35  ;;  %644 = vmatpush3.msra.mxu1 %v349_v35 }
  0xa9   : > { %v278_v12 = vpop.xlane.xlu0 %277  ;;  %v281_v13 = vpop.xlane.xlu1 %280 }
  0xaa   : > { %v289_v14 = vmul.f32 0.03125, %v278_v12  ;;  %v290_v15 = vmul.f32 0.03125, %v281_v13 }
  0xac   : > { %v293_v16 = vsub.f32 %v269_v4, %v289_v14  ;;  %v781_v17 = vsub.f32 %v270_v5, %v290_v15  ;;  %v460_v4 = vadd.s32 8, %v459_v3  ;;  %v461_v5 = vstv %s607_s30 }
  0xad   : > { %v284_v18 = vpop.xlane.xlu0 %283  ;;  %v287_v19 = vpop.xlane.xlu1 %286  ;;  %v462_v8 = vadd.s32 %v461_v5, %v459_v3 }
  0xae   : > { %v291_v20 = vmul.f32 0.03125, %v284_v18  ;;  %v292_v21 = vmul.f32 0.03125, %v287_v19  ;;  %v297_v22 = vmul.f32 %v293_v16, %v293_v16  ;;  %v298_v23 = vmul.f32 %v781_v17, %v781_v17 }
  0xaf   : > { %vm464_vm3 = vcmp.lt.s32.totalorder %v462_v8, 40 }
  0xb0   : > { %v295_v24 = vsub.f32 %v271_v6, %v291_v20  ;;  %v296_v25 = vsub.f32 %v272_v9, %v292_v21  ;;  %v301_v26 = vsel %vm275_vm0, %v297_v22, 0.0  ;;  %v304_v27 = vsel %vm275_vm0, %v298_v23, 0.0 }
  0xb1   : > { %302 = vadd.xlane.f32.xlu0 %v301_v26  ;;  %v463_v6 = vadd.s32 %v461_v5, %v460_v4 }
  0xb2   : > { %v299_v28 = vmul.f32 %v295_v24, %v295_v24  ;;  %v300_v29 = vmul.f32 %v296_v25, %v296_v25 }
  0xb3   : > { %vm465_vm1 = vcmp.lt.s32.totalorder %v463_v6, 40 }
  0xb4   : > { %v307_v30 = vsel %vm275_vm0, %v299_v28, 0.0  ;;  %v310_v31 = vsel %vm275_vm0, %v300_v29, 0.0 }
  0xb5   : > { %305 = vadd.xlane.f32.xlu0 %v304_v27  ;;  %308 = vadd.xlane.f32.xlu1 %v307_v30 }
  0xb9   : > { %311 = vadd.xlane.f32.xlu1 %v310_v31 }
 0x13a   : > { %v303_v36 = vpop.xlane.xlu0 %302 }
 0x13b   : > { %v313_v37 = vmul.f32 0.03125, %v303_v36 }
 0x13d   : > { %v317_v38 = vadd.f32 1e-06, %v313_v37 }
 0x13e   : > { %v309_v39 = vpop.xlane.xlu1 %308  ;;  %v306_v40 = vpop.xlane.xlu0 %305 }
 0x13f   : > { %669 = vrsqrt.f32 %v317_v38  ;;  %v315_v41 = vmul.f32 0.03125, %v309_v39  ;;  %v314_v42 = vmul.f32 0.03125, %v306_v40 }
 0x141   : > { %v319_v43 = vadd.f32 1e-06, %v315_v41  ;;  %v318_v44 = vadd.f32 1e-06, %v314_v42 }
 0x142   : > { %v312_v45 = vpop.xlane.xlu1 %311 }
 0x143   : > { %671 = vrsqrt.f32 %v319_v43  ;;  %v316_v46 = vmul.f32 0.03125, %v312_v45 }
 0x144   : > { %673 = vrsqrt.f32 %v318_v44 }
 0x145   : > { %v320_v47 = vadd.f32 1e-06, %v316_v46 }
 0x147   : > { %675 = vrsqrt.f32 %v320_v47 }
 0x14c   : > { %v670_v48 = vpop.eup %669 }
 0x14d   : > { %v325_v50 = vmul.f32 %v670_v48, %v293_v16 }
 0x14f   : > { %v335_v52 = vmul.f32 %v600_v49, %v325_v50 }
 0x150   : > { %v672_v53 = vpop.eup %671 }
 0x151   : > { %v674_v54 = vpop.eup %673  ;;  %v345_v55 = vadd.f32 %v601_v51, %v335_v52  ;;  %v327_v56 = vmul.f32 %v672_v53, %v295_v24 }
 0x152   : > { %v326_v57 = vmul.f32 %v674_v54, %v781_v17 }
 0x153   : > { %631 = vmatprep.mubr.msk.f32.mxu0 %vm275_vm0, %v345_v55  ;;  %v337_v58 = vmul.f32 %v600_v49, %v327_v56 }
 0x154   : > { %v676_v59 = vpop.eup %675  ;;  %v336_v60 = vmul.f32 %v600_v49, %v326_v57 }
 0x155   : > { %v347_v61 = vadd.f32 %v601_v51, %v337_v58  ;;  %v328_v62 = vmul.f32 %v676_v59, %v296_v25 }
 0x156   : > { %v346_v63 = vadd.f32 %v601_v51, %v336_v60 }
 0x157   : > { %634 = vmatprep.mubr.msk.f32.mxu1 %vm275_vm0, %v347_v61  ;;  %v338_v0 = vmul.f32 %v600_v49, %v328_v62 }
 0x158   : > { %632 = vmatmul.mubr.msk.f32.vlgmr.msra.gmra.mxu0 %vm275_vm0, %v346_v63 }
 0x159   : > { %v348_v1 = vadd.f32 %v601_v51, %v338_v0 }
 0x15b   : > { %635 = vmatmul.mubr.msk.f32.vlgmr.msra.gmra.mxu1 %vm275_vm0, %v348_v1 }
 0x218   : > { %v633_v9 = vpop.f32.mrf.mxu0 }
 0x219   : > { %v444_v10 = vadd.f32 %v633_v9, %v602_v7 }
 0x21a   : > { %v438_v11 = vpop.f32.mrf.mxu0 }
 0x21b   : > { %v471_v12 = vsel %vm465_vm1, %v444_v10, 0.0  ;;  %v439_v13 = vadd.f32 %v602_v7, %v438_v11  ;;  %v636_v14 = vpop.f32.mrf.mxu1 }
 0x21c   : > { %476 = vst.msk [vmem:[%s266_s20 + $0x8] sm:$0xff] %vm474_vm2, %v471_v12  ;;  %v454_v15 = vadd.f32 %v636_v14, %v602_v7 }
 0x21d   : > { %v470_v16 = vsel %vm464_vm3, %v439_v13, 0.0  ;;  %v448_v17 = vpop.f32.mrf.mxu1  ;;  %485 = sbr.rel (!%p761_p5) target bundleno = 554 (0x22a), region = 82 }
 0x21e   : > { %475 = vst.msk [vmem:[%s266_s20] sm:$0xff] %vm474_vm2, %v470_v16  ;;  %v473_v18 = vsel %vm465_vm1, %v454_v15, 0.0  ;;  %v449_v19 = vadd.f32 %v602_v7, %v448_v17 }
 0x21f   : > { %478 = vst.msk [vmem:[%s266_s20 + $0x18] sm:$0xff] %vm474_vm2, %v473_v18 }
 0x220   : > { %v472_v20 = vsel %vm464_vm3, %v449_v19, 0.0 }
 0x221   : > { %477 = vst.msk [vmem:[%s266_s20 + $0x10] sm:$0xff] %vm474_vm2, %v472_v20 }
 0x223   : > { %v525_v22 = vld [vmem:[%s266_s20 + $0x8] sm:$0xff] }
 0x224   : > { %526 = vst [vmem:[%s488_s9 + $0x8] sm:$0xff] %v525_v22 }
 0x225   : > { %v523_v21 = vld [vmem:[%s266_s20] sm:$0xff] }
 0x226   : > { %524 = vst [vmem:[%s488_s9] sm:$0xff] %v523_v21  ;;  %v529_v24 = vld [vmem:[%s266_s20 + $0x18] sm:$0xff] }
 0x227   : > { %530 = vst [vmem:[%s488_s9 + $0x38] sm:$0xff] %v529_v24 }
 0x228   : > { %v527_v23 = vld [vmem:[%s266_s20 + $0x10] sm:$0xff] }
 0x229   : > { %528 = vst [vmem:[%s488_s9 + $0x30] sm:$0xff] %v527_v23 }
 0x22a PF: > { %p12_p10 = scmp.ge.s32.totalorder %s748_s22, 5   ;;  %s844_s18 = smov %s695_s19 }
 0x22b   : > { %s845_s19 = smov %s759_s25  ;;  %s846_s20 = smov %s748_s22 }
 0x22c   :  { %14 = sbr.rel (!%p12_p10) target bundleno = 2 (0x2), region = 151 }

// kernel: convnext_encoder_forward.5
= control target key start
LH: loop header
LB: loop body
LE: loop exit
PB: predicated region body
PF: predicated region fallthrough
CT: control target
= control target key end

     0   :  { %s1670_s0 = inlined_call_operand.vmem [shape: f32[2,48,4], index: 0, kind: input, shape index: {}, may-alias: {0,1,2}]   ;;  %s1671_s1 = inlined_call_operand.vmem [shape: f32[2,48,4], index: 1, kind: input, shape index: {}, may-alias: {0,1,2}]   ;;  %s1672_s2 = inlined_call_operand.vmem [shape: f32[2,48,4], index: 2, kind: input, shape index: {}, may-alias: {0,1,2}]   ;;  %s1673_s3 = inlined_call_operand.vmem [shape: f32[28,32], index: 3, kind: input, shape index: {}]   ;;  %s1674_s4 = inlined_call_operand.vmem [shape: f32[1,32], index: 4, kind: input, shape index: {}]   ;;  %s1675_s5 = inlined_call_operand.vmem [shape: f32[1,32], index: 5, kind: input, shape index: {}]   ;;  %s1676_s6 = inlined_call_operand.vmem [shape: f32[1,32], index: 6, kind: input, shape index: {}]   ;;  %s1677_s7 = inlined_call_operand.vmem [shape: f32[2,48,32], index: 7, kind: output, shape index: {}]  }
   0x1   :  { %1681 = sst [smem:[#allocation10_spill]] %s1677_s7 }
   0x2   :  { %s1350_s24 = smov 0   ;;  %s1352_s25 = smov 0  }
   0x3   :  { %s1354_s26 = smov 0   ;;  %s1356_s27 = smov 0  }
   0x4   :  { %s1358_s28 = smov 0   ;;  %s1360_s29 = smov 0  }
   0x5   :  { %s1362_s30 = smov 0  }
   0x6 LB: > { %1682 = sst [smem:[#allocation6_spill]] %s1298_s29  ;;  %s1386_s8 = sadd.s32 1, %s1302_s30   ;;  %s1302_s30 = sphi %s1362_s30, %s1691_s30   ;;  %s1298_s29 = sphi %s1360_s29, %s1694_s29   ;;  %s1294_s28 = sphi %s1358_s28, %s1693_s28   ;;  %s1290_s27 = sphi %s1356_s27, %s1698_s27   ;;  %s1286_s26 = sphi %s1354_s26, %s1697_s26   ;;  %s1282_s25 = sphi %s1352_s25, %s1696_s25   ;;  %s1278_s24 = sphi %s1350_s24, %s1695_s24  }
   0x7   : > { %1683 = sst [smem:[#allocation7_spill]] %s1386_s8  ;;  %s1087_s9 = sshll.u32 %s1302_s30, 1 }
   0x8   : > { %s32_s10 = sadd.s32 1, %s1298_s29  ;;  %s1088_s11 = sadd.s32 4294967295, %s1087_s9 }
   0x9   : > { %s1125_s12 = sadd.s32 2, %s1087_s9  ;;  %p23_p0 = scmp.gt.s32.totalorder %s1088_s11, 0 }
   0xa   : > { %s1090_s13 = sadd.s32 4294967295, %s1125_s12  ;;  %p39_p2 = scmp.ne.s32.totalorder %s1298_s29, %s1294_s28 }
   0xb   : > { %p27_p1 = scmp.gt.s32.totalorder %s1090_s13, 0  ;;  %s1700_s11 = smov (!%p23_p0, %s1088_s11), 0 }
   0xc   : > { %p40_p3 = scmp.eq.s32.totalorder %s1302_s30, 0  ;;  %s55_s14 = ssub.s32 %s1302_s30, %s1386_s8 }
   0xd   : > { %s1702_s13 = smov (!%p27_p1, %s1090_s13), 0  ;;  %p56_p4 = scmp.eq.s32.totalorder %s55_s14, 0 }
   0xe   : > { %s29_s15 = ssub.s32 %s1700_s11, %s1702_s13  ;;  %p1400_p6 = por %p40_p3, %p39_p2 }
   0xf   : > { %p30_p5 = scmp.eq.s32.totalorder %s29_s15, 0  ;;  %s58_s17 = sadd.s32 1, %s1290_s27 }
  0x10   : > { %p65_p7 = scmp.ne.s32.totalorder %s1290_s27, %s1286_s26  ;;  %p83_p9 = scmp.lt.s32.totalorder %s1125_s12, 5 }
  0x11   : > { %s1408_s18 = scalar_select %p30_p5, %s1298_s29, %s32_s10  }
  0x12   : > { %s1411_s19 = scalar_select %p56_p4, %s1290_s27, %s58_s17  }
  0x13   : > { %1685 = sst [smem:[#allocation8_spill]] %s1408_s18  ;;  %p1418_p8 = por %p65_p7, %p40_p3 }
  0x14   : > { %1686 = sst [smem:[#allocation9_spill]] %s1411_s19  ;;  %s1423_s21 = sadd.s32 4294967295, %s1302_s30  }
  0x15   : > { %s1129_s22 = sadd.s32 2, %s1125_s12  ;;  %s1704_s12 = smov (!%p83_p9, %s1125_s12), 5 }
  0x16   : > { %p87_p10 = scmp.lt.s32.totalorder %s1129_s22, 5  ;;  %p99_p11 = scmp.ne.s32.totalorder %s1282_s25, %s1278_s24 }
  0x17   : > { %p213_p12 = scmp.eq.s32.totalorder %s1423_s21, 2  ;;  %s92_s13 = sadd.s32 1, %s1282_s25 }
  0x18   : > { %s1706_s22 = smov (!%p87_p10, %s1129_s22), 5  ;;  %p1432_p13 = por %p99_p11, %p40_p3 }
  0x19   : > { %p1439_p0 = por %p213_p12, %p65_p7  ;;  %s89_s10 = ssub.s32 %s1704_s12, %s1706_s22 }
  0x1a   : > { %p90_p1 = scmp.eq.s32.totalorder %s89_s10, 0  ;;  %p1094_p2 = scmp.ge.s32.totalorder %s1302_s30, 3 }
  0x1c   : > { %s1446_s14 = scalar_select %p90_p1, %s1282_s25, %s92_s13  }
  0x1d   : > { %247 = sbr.rel (%p1094_p2) target bundleno = 50 (0x32), region = 32 }
  0x22   : > { %250 = sbr.rel (!%p1400_p6) target bundleno = 39 (0x27), region = 36  ;;  %s252_s15 = sand.u32 (%p1400_p6), 1, %s1298_s29  }
  0x23   : > { %s1098_s17 = sshll.u32 (%p1400_p6), %s1700_s11, 3  ;;  %s1095_s18 = sshll.u32 (%p1400_p6), %s252_s15, 4 }
  0x24   : > { %s260_s7 = scalar_lea.vmem (%p1400_p6), %s1670_s0, %s1098_s17  ;;  %s254_s22 = scalar_lea.vmem (%p1400_p6), [#allocation2], %s1095_s18 }
  0x25   : > { %v291_v0 = vld [vmem:[%s260_s7] sm:$0xff] (%p1400_p6)  ;;  %v293_v1 = vld [vmem:[%s260_s7 + $0x30] sm:$0xff] (%p1400_p6) }
  0x26   : > { %292 = vst [vmem:[%s254_s22] sm:$0xff] (%p1400_p6), %v291_v0  ;;  %294 = vst [vmem:[%s254_s22 + $0x8] sm:$0xff] (%p1400_p6), %v293_v1 }
  0x27 PF: > { %300 = sbr.rel (!%p1418_p8) target bundleno = 45 (0x2d), region = 74  ;;  %s302_s16 = sand.u32 (%p1418_p8), 1, %s1290_s27  }
  0x28   : > { %s1130_s10 = sshll.u32 (%p1418_p8), %s1302_s30, 4  ;;  %s1099_s13 = sshll.u32 (%p1418_p8), %s302_s16, 5 }
  0x29   : > { %s307_s29 = scalar_lea.vmem (%p1418_p8), %s1671_s1, %s1130_s10  ;;  %s304_s7 = scalar_lea.vmem (%p1418_p8), [#allocation3], %s1099_s13 }
  0x2a   : > { %v342_v2 = vld [vmem:[%s307_s29] sm:$0xff] (%p1418_p8)  ;;  %v344_v3 = vld [vmem:[%s307_s29 + $0x8] sm:$0xff] (%p1418_p8)  ;;  %v346_v4 = vld [vmem:[%s307_s29 + $0x30] sm:$0xff] (%p1418_p8) }
  0x2b   : > { %343 = vst [vmem:[%s304_s7] sm:$0xff] (%p1418_p8), %v342_v2  ;;  %345 = vst [vmem:[%s304_s7 + $0x8] sm:$0xff] (%p1418_p8), %v344_v3  ;;  %v348_v5 = vld [vmem:[%s307_s29 + $0x38] sm:$0xff] (%p1418_p8) }
  0x2c   : > { %347 = vst [vmem:[%s304_s7 + $0x10] sm:$0xff] %v346_v4  ;;  %349 = vst [vmem:[%s304_s7 + $0x18] sm:$0xff] %v348_v5 }
  0x2d PF: > { %355 = sbr.rel (!%p1432_p13) target bundleno = 50 (0x32), region = 112  ;;  %s357_s8 = sand.u32 (%p1432_p13), 1, %s1282_s25  }
  0x2e   : > { %s1104_s18 = sshll.u32 (%p1432_p13), %s1704_s12, 3  ;;  %s1102_s19 = sshll.u32 (%p1432_p13), %s357_s8, 4 }
  0x2f   : > { %s365_s22 = scalar_lea.vmem (%p1432_p13), %s1672_s2, %s1104_s18  ;;  %s359_s16 = scalar_lea.vmem (%p1432_p13), [#allocation4], %s1102_s19 }
  0x30   : > { %v396_v6 = vld [vmem:[%s365_s22] sm:$0xff] (%p1432_p13)  ;;  %v398_v7 = vld [vmem:[%s365_s22 + $0x30] sm:$0xff] (%p1432_p13) }
  0x31   : > { %397 = vst [vmem:[%s359_s16] sm:$0xff] (%p1432_p13), %v396_v6  ;;  %399 = vst [vmem:[%s359_s16 + $0x8] sm:$0xff] (%p1432_p13), %v398_v7 }
  0x32 PF: > { %p1105_p3 = scmp.ge.s32.totalorder %s1302_s30, 1  ;;  %p404_p4 = scmp.lt.s32.totalorder %s1302_s30, 4 }
  0x34   : > { %p405_p5 = pnand %p1105_p3, %p404_p4 }
  0x35   : > { %s418_s29 = sand.u32 (!%p405_p5), 1, %s1286_s26   ;;  %s411_s23 = sand.u32 (!%p405_p5), 1, %s1294_s28  }
  0x36   : > { %408 = sbr.rel (%p405_p5) target bundleno = 774 (0x306), region = 150  ;;  %s1473_s12 = sshll.u32 (!%p405_p5), %s418_s29, 5 }
  0x37   : > { %s420_s10 = scalar_lea.vmem (!%p405_p5), [#allocation3], %s1473_s12  ;;  %p477_p6 = scmp.gt.s32.totalorder (!%p405_p5), %s1423_s21, 0 }
  0x38   : > { %s1106_s26 = sshll.u32 (!%p405_p5), %s411_s23, 4  ;;  %s1304_s28 = smov (!%p405_p5), 4  }
  0x39   : > { %s413_s13 = scalar_lea.vmem (!%p405_p5), [#allocation2], %s1106_s26  ;;  %p485_p7 = scmp.lt.s32.totalorder (!%p405_p5), %s1423_s21, 2 }
  0x3a   : > { %s1305_s11 = smov (!%p405_p5), 8   ;;  %s425_s15 = sand.u32 (!%p405_p5), 1, %s1278_s24  }
  0x3b   : > { %v1477_v8 = vld [vmem:[%s420_s10 + $0x10] sm:$0xff]  ;;  %v1479_v9 = vld [vmem:[%s420_s10 + $0x18] sm:$0xff]  ;;  %vm499_vm0 = vcmask 1046528   ;;  %v1481_v10 = vld [vmem:[%s420_s10] sm:$0xff]  ;;  %s1229_s30 = scalar_select %p477_p6, 255, 0 }
  0x3c   : > { %v506_v11 = vrot.slane %v1477_v8, 1  ;;  %v508_v12 = vrot.slane %v1479_v9, 1  ;;  %v1486_v13 = vld [vmem:[%s420_s10 + $0x8] sm:$0xff]  ;;  %v501_v14 = vrot.slane %v1481_v10, 1  ;;  %v530_v21 = vrot.slane %v1481_v10, 2  ;;  %s1306_s7 = smov 12  }
  0x3d   : > { %v503_v15 = vrot.slane %v1486_v13, 1  ;;  %v1492_v18 = vld [vmem:[%s413_s13 + $0x8] sm:%s1229_s30]  ;;  %v1496_v20 = vld [vmem:[%s413_s13] sm:%s1229_s30]  ;;  %v532_v22 = vrot.slane %v1486_v13, 2  ;;  %vm528_vm1 = vcmask 1045504   ;;  %v535_v28 = vrot.slane %v1477_v8, 2 }
  0x3e   : > { %v509_v16 = vsel %vm499_vm0, %v506_v11, %v508_v12  ;;  %v505_v19 = vrot.slane %v1492_v18, 1  ;;  %v500_v23 = vrot.slane %v1496_v20, 1  ;;  %v529_v24 = vrot.slane %v1496_v20, 2  ;;  %s1108_s8 = sshll.u32 %s425_s15, 4  ;;  %s1307_s19 = smov 16   ;;  %v731_v0 = vld [vmem:[%s1673_s3 + $0x10] sm:$0xff] }
  0x3f   : > { %518 = vrot.lane.b32.xlu1 %v509_v16, %s1304_s28  ;;  %v504_v17 = vsel %vm499_vm0, %v501_v14, %v503_v15  ;;  %v533_v27 = vsel %vm528_vm1, %v530_v21, %v532_v22  ;;  %v537_v29 = vrot.slane %v1479_v9, 2  ;;  %v534_v31 = vrot.slane %v1492_v18, 2  ;;  %s1235_s18 = scalar_select %p485_p7, 255, 0  ;;  %v732_v60 = vld [vmem:[%s1673_s3 + $0x18] sm:$0xf] }
  0x40   : > { %512 = vrot.lane.b32.xlu0 %v504_v17, %s1304_s28  ;;  %v507_v25 = vsel %vm499_vm0, %v505_v19, %v506_v11  ;;  %v502_v26 = vsel %vm499_vm0, %v500_v23, %v501_v14  ;;  %v531_v30 = vsel %vm528_vm1, %v529_v24, %v530_v21  ;;  %v558_v34 = vrot.slane %v1481_v10, 3  ;;  %s427_s24 = scalar_lea.vmem [#allocation4], %s1108_s8  ;;  %s1308_s20 = smov 20   ;;  %v730_v2 = vld [vmem:[%s1673_s3 + $0x8] sm:$0xff]  ;;  %v729_v6 = vld [vmem:[%s1673_s3] sm:$0xff] }
  0x41   : > { %v538_v32 = vsel %vm528_vm1, %v535_v28, %v537_v29  ;;  %v536_v33 = vsel %vm528_vm1, %v534_v31, %v535_v28  ;;  %v559_v35 = vrot.slane %v1486_v13, 3  ;;  %vm557_vm2 = vcmask 1044480   ;;  %v1519_v45 = vld [vmem:[%s427_s24 + $0x8] sm:%s1235_s18]  ;;  %v1521_v46 = vld [vmem:[%s427_s24] sm:%s1235_s18]  ;;  %s1309_s30 = smov 24   ;;  %s1118_s15 = sshll.u32 %s1423_s21, 4 }
  0x42   : > { %v561_v37 = vrot.slane %v1477_v8, 3  ;;  %v562_v38 = vrot.slane %v1479_v9, 3  ;;  %v585_v40 = vrot.slane %v1481_v10, 4  ;;  %v586_v41 = vrot.slane %v1486_v13, 4  ;;  %s1690_s17 = sld [smem:[#allocation10_spill]] (%p1439_p0) }
  0x43   : > { %520 = vrot.lane.b32.xlu1 %v508_v12, %s1304_s28  ;;  %v560_v36 = vsel %vm557_vm2, %v558_v34, %v559_v35  ;;  %vm584_vm3 = vcmask 1043456   ;;  %v590_v43 = vrot.slane %v1477_v8, 4  ;;  %v591_v44 = vrot.slane %v1479_v9, 4 }
  0x44   : > { %514 = vrot.lane.b32.xlu0 %v503_v15, %s1304_s28  ;;  %v563_v39 = vsel %vm557_vm2, %v561_v37, %v562_v38  ;;  %v587_v42 = vsel %vm584_vm3, %v585_v40, %v586_v41  ;;  %v593_v48 = vrot.slane %v1519_v45, 4  ;;  %v588_v49 = vrot.slane %v1521_v46, 4  ;;  %1144 = vmatprep.subr.msk.mxu0 %vm584_vm3, %v732_v60 }
  0x45   : > { %v592_v47 = vsel %vm584_vm3, %v590_v43, %v591_v44  ;;  %v614_v51 = vrot.slane %v1481_v10, 5  ;;  %v615_v52 = vrot.slane %v1486_v13, 5  ;;  %vm613_vm4 = vcmask 1042432   ;;  %1158 = vmatprep.subr.msk.mxu1 %vm584_vm3, %v732_v60  ;;  %1145 = vmatpush3.msk.msra.mxu0 %vm584_vm3, %v732_v60 }
  0x46   : > { %v594_v50 = vsel %vm584_vm3, %v591_v44, %v593_v48  ;;  %v589_v53 = vsel %vm584_vm3, %v586_v41, %v588_v49  ;;  %v619_v55 = vrot.slane %v1477_v8, 5  ;;  %v620_v56 = vrot.slane %v1479_v9, 5  ;;  %1162 = vmatpush3.msk.msra.mxu1 %vm584_vm3, %v732_v60  ;;  %1146 = vmatprep.subr.mxu0 %v731_v0 }
  0x47   : > { %516 = vrot.lane.b32.xlu1 %v507_v25, %s1304_s28  ;;  %v616_v54 = vsel %vm613_vm4, %v614_v51, %v615_v52  ;;  %v622_v58 = vrot.slane %v1519_v45, 5  ;;  %v617_v59 = vrot.slane %v1521_v46, 5  ;;  %v643_v62 = vrot.slane %v1481_v10, 6  ;;  %1159 = vmatprep.subr.mxu1 %v731_v0 }
  0x48   : > { %510 = vrot.lane.b32.xlu0 %v502_v26, %s1304_s28  ;;  %v621_v57 = vsel %vm613_vm4, %v619_v55, %v620_v56  ;;  %v644_v63 = vrot.slane %v1486_v13, 6  ;;  %vm642_vm5 = vcmask 1041408   ;;  %1147 = vmatpush3.msra.mxu0 %v731_v0  ;;  %v648_v4 = vrot.slane %v1477_v8, 6  ;;  %s947_s22 = scalar_lea.vmem (%p1439_p0), %s1690_s17, %s1118_s15 }
  0x49   : > { %v623_v61 = vsel %vm613_vm4, %v620_v56, %v622_v58  ;;  %v618_v1 = vsel %vm613_vm4, %v615_v52, %v617_v59  ;;  %v649_v5 = vrot.slane %v1479_v9, 6  ;;  %1163 = vmatpush3.msra.mxu1 %v731_v0  ;;  %1148 = vmatprep.subr.mxu0 %v730_v2  ;;  %v651_v11 = vrot.slane %v1519_v45, 6 }
  0x4a   : > { %v645_v3 = vsel %vm642_vm5, %v643_v62, %v644_v63  ;;  %1160 = vmatprep.subr.mxu1 %v730_v2  ;;  %1149 = vmatpush3.msra.mxu0 %v730_v2  ;;  %v646_v12 = vrot.slane %v1521_v46, 6  ;;  %vm671_vm6 = vcmask 31744   ;;  %vm678_vm7 = vcmask 64512  }
  0x4b   : > { %541 = vrot.lane.b32.xlu1 %v533_v27, %s1305_s11  ;;  %1164 = vmatpush3.msra.mxu1 %v730_v2  ;;  %v650_v7 = vsel %vm642_vm5, %v648_v4, %v649_v5  ;;  %v652_v14 = vsel %vm642_vm5, %v649_v5, %v651_v11  ;;  %vm685_vm8 = vcmask 97280   ;;  %vm692_vm9 = vcmask 130048  }
  0x4c   : > { %539 = vrot.lane.b32.xlu0 %v531_v30, %s1305_s11  ;;  %1150 = vmatprep.subr.mxu0 %v729_v6  ;;  %v647_v15 = vsel %vm642_vm5, %v644_v63, %v646_v12  ;;  %vm699_vm10 = vcmask 162816   ;;  %vm706_vm11 = vcmask 195584   ;;  %vm733_vm12 = vcmask 228352  }
  0x4d   : > { %1161 = vmatprep.subr.mxu1 %v729_v6  ;;  %1151 = vmatpush3.msra.mxu0 %v729_v6  ;;  %vm843_vm13 = vcmask 261120  }
  0x4e   : > { %1165 = vmatpush3.msra.mxu1 %v729_v6 }
  0x4f   : > { %547 = vrot.lane.b32.xlu1 %v538_v32, %s1305_s11 }
  0x50   : > { %545 = vrot.lane.b32.xlu0 %v536_v33, %s1305_s11 }
  0x53   : > { %549 = vrot.lane.b32.xlu1 %v537_v29, %s1305_s11 }
  0x54   : > { %543 = vrot.lane.b32.xlu0 %v532_v22, %s1305_s11 }
  0x57   : > { %566 = vrot.lane.b32.xlu1 %v560_v36, %s1306_s7 }
  0x58   : > { %564 = vrot.lane.b32.xlu0 %v558_v34, %s1306_s7 }
  0x5b   : > { %572 = vrot.lane.b32.xlu1 %v563_v39, %s1306_s7 }
  0x5c   : > { %570 = vrot.lane.b32.xlu0 %v561_v37, %s1306_s7 }
  0x5f   : > { %574 = vrot.lane.b32.xlu1 %v562_v38, %s1306_s7 }
  0x60   : > { %568 = vrot.lane.b32.xlu0 %v559_v35, %s1306_s7 }
  0x63   : > { %597 = vrot.lane.b32.xlu1 %v587_v42, %s1307_s19 }
  0x64   : > { %595 = vrot.lane.b32.xlu0 %v585_v40, %s1307_s19 }
  0x67   : > { %603 = vrot.lane.b32.xlu1 %v592_v47, %s1307_s19 }
  0x68   : > { %601 = vrot.lane.b32.xlu0 %v590_v43, %s1307_s19 }
  0x6b   : > { %605 = vrot.lane.b32.xlu1 %v594_v50, %s1307_s19 }
  0x6c   : > { %599 = vrot.lane.b32.xlu0 %v589_v53, %s1307_s19  ;;  %s462_s19 = scalar_lea.vmem [#allocation5], %s1473_s12 }
  0x6f   : > { %626 = vrot.lane.b32.xlu1 %v616_v54, %s1308_s20 }
  0x70   : > { %624 = vrot.lane.b32.xlu0 %v614_v51, %s1308_s20 }
  0x73   : > { %632 = vrot.lane.b32.xlu1 %v621_v57, %s1308_s20 }
  0x74   : > { %630 = vrot.lane.b32.xlu0 %v619_v55, %s1308_s20 }
  0x77   : > { %634 = vrot.lane.b32.xlu1 %v623_v61, %s1308_s20 }
  0x78   : > { %628 = vrot.lane.b32.xlu0 %v618_v1, %s1308_s20 }
  0x7b   : > { %655 = vrot.lane.b32.xlu1 %v645_v3, %s1309_s30 }
  0x7c   : > { %653 = vrot.lane.b32.xlu0 %v643_v62, %s1309_s30 }
  0x7f   : > { %661 = vrot.lane.b32.xlu1 %v650_v7, %s1309_s30 }
  0x80   : > { %659 = vrot.lane.b32.xlu0 %v648_v4, %s1309_s30 }
  0x83   : > { %663 = vrot.lane.b32.xlu1 %v652_v14, %s1309_s30 }
  0x84   : > { %657 = vrot.lane.b32.xlu0 %v647_v15, %s1309_s30 }
  0xb1   : > { %v519_v16 = vpop.permute.xlu1 %518 }
  0xb2   : > { %v513_v17 = vpop.permute.xlu0 %512 }
  0xb3   : > { %v673_v46 = vsel %vm671_vm6, %v1481_v10, %v513_v17  ;;  %v676_v10 = vsel %vm671_vm6, %v1477_v8, %v519_v16 }
  0xb5   : > { %v521_v19 = vpop.permute.xlu1 %520 }
  0xb6   : > { %v515_v21 = vpop.permute.xlu0 %514 }
  0xb7   : > { %v674_v4 = vsel %vm671_vm6, %v1486_v13, %v515_v21 }
  0xb9   : > { %v517_v22 = vpop.permute.xlu1 %516 }
  0xba   : > { %v511_v23 = vpop.permute.xlu0 %510  ;;  %v675_v57 = vsel %vm671_vm6, %v1492_v18, %v517_v22  ;;  %v677_v18 = vsel %vm671_vm6, %v1479_v9, %v521_v19 }
  0xbb   : > { %v672_v48 = vsel %vm671_vm6, %v1496_v20, %v511_v23 }
  0xbd   : > { %v542_v24 = vpop.permute.xlu1 %541 }
  0xbe   : > { %v540_v25 = vpop.permute.xlu0 %539  ;;  %v680_v49 = vsel %vm678_vm7, %v673_v46, %v542_v24 }
  0xbf   : > { %v679_v51 = vsel %vm678_vm7, %v672_v48, %v540_v25 }
  0xc1   : > { %v548_v26 = vpop.permute.xlu1 %547 }
  0xc2   : > { %v546_v27 = vpop.permute.xlu0 %545  ;;  %v683_v58 = vsel %vm678_vm7, %v676_v10, %v548_v26 }
  0xc3   : > { %v682_v62 = vsel %vm678_vm7, %v675_v57, %v546_v27 }
  0xc5   : > { %v550_v28 = vpop.permute.xlu1 %549 }
  0xc6   : > { %v544_v29 = vpop.permute.xlu0 %543  ;;  %v684_v11 = vsel %vm678_vm7, %v677_v18, %v550_v28 }
  0xc7   : > { %v681_v17 = vsel %vm678_vm7, %v674_v4, %v544_v29 }
  0xc9   : > { %v567_v30 = vpop.permute.xlu1 %566 }
  0xca   : > { %v565_v31 = vpop.permute.xlu0 %564  ;;  %v687_v52 = vsel %vm685_vm8, %v680_v49, %v567_v30 }
  0xcb   : > { %v686_v53 = vsel %vm685_vm8, %v679_v51, %v565_v31 }
  0xcd   : > { %v573_v32 = vpop.permute.xlu1 %572 }
  0xce   : > { %v571_v33 = vpop.permute.xlu0 %570  ;;  %v690_v63 = vsel %vm685_vm8, %v683_v58, %v573_v32 }
  0xcf   : > { %v689_v1 = vsel %vm685_vm8, %v682_v62, %v571_v33 }
  0xd1   : > { %v575_v34 = vpop.permute.xlu1 %574 }
  0xd2   : > { %v569_v35 = vpop.permute.xlu0 %568  ;;  %v691_v9 = vsel %vm685_vm8, %v684_v11, %v575_v34 }
  0xd3   : > { %v688_v21 = vsel %vm685_vm8, %v681_v17, %v569_v35 }
  0xd5   : > { %v598_v36 = vpop.permute.xlu1 %597 }
  0xd6   : > { %v596_v37 = vpop.permute.xlu0 %595  ;;  %v694_v54 = vsel %vm692_vm9, %v687_v52, %v598_v36  ;;  %v1115_v36 = vld [vmem:[%s1674_s4] ss:$0 sm:$0xff] }
  0xd7   : > { %v693_v55 = vsel %vm692_vm9, %v686_v53, %v596_v37 }
  0xd9   : > { %v604_v38 = vpop.permute.xlu1 %603 }
  0xda   : > { %v602_v39 = vpop.permute.xlu0 %601  ;;  %v697_v2 = vsel %vm692_vm9, %v690_v63, %v604_v38 }
  0xdb   : > { %v696_v5 = vsel %vm692_vm9, %v689_v1, %v602_v39 }
  0xdd   : > { %v606_v40 = vpop.permute.xlu1 %605 }
  0xde   : > { %v600_v41 = vpop.permute.xlu0 %599  ;;  %v698_v22 = vsel %vm692_vm9, %v691_v9, %v606_v40 }
  0xdf   : > { %v695_v24 = vsel %vm692_vm9, %v688_v21, %v600_v41 }
  0xe1   : > { %v627_v42 = vpop.permute.xlu1 %626 }
  0xe2   : > { %v625_v43 = vpop.permute.xlu0 %624  ;;  %v701_v20 = vsel %vm699_vm10, %v694_v54, %v627_v42 }
  0xe3   : > { %v700_v59 = vsel %vm699_vm10, %v693_v55, %v625_v43 }
  0xe5   : > { %v633_v44 = vpop.permute.xlu1 %632 }
  0xe6   : > { %v631_v45 = vpop.permute.xlu0 %630  ;;  %v704_v6 = vsel %vm699_vm10, %v697_v2, %v633_v44 }
  0xe7   : > { %v703_v12 = vsel %vm699_vm10, %v696_v5, %v631_v45 }
  0xe9   : > { %v635_v47 = vpop.permute.xlu1 %634 }
  0xea   : > { %v629_v50 = vpop.permute.xlu0 %628  ;;  %v705_v25 = vsel %vm699_vm10, %v698_v22, %v635_v47  ;;  %v1116_v22 = vld [vmem:[%s1675_s5] ss:$0 sm:$0xff] }
  0xeb   : > { %v702_v27 = vsel %vm699_vm10, %v695_v24, %v629_v50 }
  0xed   : > { %v656_v56 = vpop.permute.xlu1 %655 }
  0xee   : > { %v708_v60 = vsel %vm706_vm11, %v701_v20, %v656_v56  ;;  %v654_v61 = vpop.permute.xlu0 %653 }
  0xef   : > { %v720_v8 = vrot.slane %v708_v60, 5  ;;  %v707_v0 = vsel %vm706_vm11, %v700_v59, %v654_v61 }
  0xf0   : > { %v719_v3 = vrot.slane %v707_v0, 5 }
  0xf1   : > { %v662_v7 = vpop.permute.xlu1 %661 }
  0xf2   : > { %v711_v14 = vsel %vm706_vm11, %v704_v6, %v662_v7  ;;  %v660_v15 = vpop.permute.xlu0 %659  ;;  %v721_v16 = vsel %vm613_vm4, %v719_v3, %v720_v8  ;;  %v918_v7 = vlaneseq }
  0xf3   : > { %v725_v19 = vrot.slane %v711_v14, 5  ;;  %v710_v13 = vsel %vm706_vm11, %v703_v12, %v660_v15  ;;  %1152 = vmatprep.mubr.msk.f32.mxu0 %vm733_vm12, %v721_v16 }
  0xf4   : > { %v724_v23 = vrot.slane %v710_v13, 5  ;;  %v919_v15 = vshrl.u32 %v918_v7, 7  ;;  %v921_v13 = vstv %s1118_s15 }
  0xf5   : > { %v664_v26 = vpop.permute.xlu1 %663 }
  0xf6   : > { %v712_v28 = vsel %vm706_vm11, %v705_v25, %v664_v26  ;;  %v658_v29 = vpop.permute.xlu0 %657  ;;  %v726_v30 = vsel %vm613_vm4, %v724_v23, %v725_v19  ;;  %v1117_v26 = vld [vmem:[%s1676_s6] ss:$0 sm:$0xff] }
  0xf7   : > { %v727_v31 = vrot.slane %v712_v28, 5  ;;  %v709_v32 = vsel %vm706_vm11, %v702_v27, %v658_v29  ;;  %1155 = vmatprep.mubr.msk.f32.mxu1 %vm733_vm12, %v726_v30  ;;  %v922_v27 = vadd.s32 %v921_v13, %v919_v15 }
  0xf8   : > { %v722_v33 = vrot.slane %v709_v32, 5 }
  0xf9   : > { %v728_v34 = vsel %vm613_vm4, %v725_v19, %v727_v31  ;;  %v920_v19 = vadd.s32 8, %v919_v15  ;;  %vm924_vm15 = vcmp.lt.s32.totalorder %v922_v27, 40 }
  0xfa   : > { %v723_v35 = vsel %vm613_vm4, %v720_v8, %v722_v33  ;;  %1156 = vmatmul.mubr.msk.f32.vlgmr.msra.gmra.mxu1 %vm733_vm12, %v728_v34 }
  0xfb   : > { %1153 = vmatmul.mubr.msk.f32.vlgmr.msra.gmra.mxu0 %vm733_vm12, %v723_v35  ;;  %v923_v23 = vadd.s32 %v921_v13, %v920_v19 }
  0xfd   : > { %vm925_vm14 = vcmp.lt.s32.totalorder %v923_v23, 40 }
 0x1ba   : > { %v1157_v37 = vpop.f32.mrf.mxu1 }
 0x1bb   : > { %v1154_v38 = vpop.f32.mrf.mxu0  ;;  %v840_v46 = vadd.f32 %v1157_v37, %v1115_v36 }
 0x1bc   : > { %v838_v39 = vadd.f32 %v1154_v38, %v1115_v36  ;;  %v821_v41 = vpop.f32.mrf.mxu1 }
 0x1bd   : > { %v811_v40 = vpop.f32.mrf.mxu0  ;;  %v839_v44 = vadd.f32 %v1115_v36, %v821_v41  ;;  %v853_v48 = vsel %vm843_vm13, %v840_v46, 0.0 }
 0x1be   : > { %v837_v42 = vadd.f32 %v1115_v36, %v811_v40  ;;  %v847_v43 = vsel %vm843_vm13, %v838_v39, 0.0 }
 0x1bf   : > { %848 = vadd.xlane.f32.xlu1 %v847_v43  ;;  %v850_v47 = vsel %vm843_vm13, %v839_v44, 0.0 }
 0x1c0   : > { %v844_v45 = vsel %vm843_vm13, %v837_v42, 0.0 }
 0x1c1   : > { %845 = vadd.xlane.f32.xlu0 %v844_v45 }
 0x1c5   : > { %851 = vadd.xlane.f32.xlu0 %v850_v47 }
 0x1c9   : > { %854 = vadd.xlane.f32.xlu0 %v853_v48 }
 0x248   : > { %v849_v49 = vpop.xlane.xlu1 %848 }
 0x249   : > { %v858_v50 = vmul.f32 0.03125, %v849_v49 }
 0x24a   : > { %v846_v51 = vpop.xlane.xlu0 %845 }
 0x24b   : > { %v862_v52 = vsub.f32 %v838_v39, %v858_v50  ;;  %v857_v53 = vmul.f32 0.03125, %v846_v51 }
 0x24d   : > { %v861_v54 = vsub.f32 %v837_v42, %v857_v53  ;;  %v866_v10 = vmul.f32 %v862_v52, %v862_v52 }
 0x24e   : > { %v852_v55 = vpop.xlane.xlu0 %851 }
 0x24f   : > { %v859_v20 = vmul.f32 0.03125, %v852_v55  ;;  %v872_v56 = vsel %vm843_vm13, %v866_v10, 0.0  ;;  %v865_v57 = vmul.f32 %v861_v54, %v861_v54 }
 0x250   : > { %873 = vadd.xlane.f32.xlu0 %v872_v56 }
 0x251   : > { %v863_v58 = vsub.f32 %v839_v44, %v859_v20  ;;  %v869_v59 = vsel %vm843_vm13, %v865_v57, 0.0 }
 0x252   : > { %870 = vadd.xlane.f32.xlu1 %v869_v59  ;;  %v855_v60 = vpop.xlane.xlu0 %854 }
 0x253   : > { %v860_v61 = vmul.f32 0.03125, %v855_v60  ;;  %v867_v62 = vmul.f32 %v863_v58, %v863_v58 }
 0x255   : > { %v864_v63 = vsub.f32 %v840_v46, %v860_v61  ;;  %v875_v8 = vsel %vm843_vm13, %v867_v62, 0.0 }
 0x256   : > { %876 = vadd.xlane.f32.xlu1 %v875_v8 }
 0x257   : > { %v868_v0 = vmul.f32 %v864_v63, %v864_v63 }
 0x259   : > { %v878_v1 = vsel %vm843_vm13, %v868_v0, 0.0 }
 0x25a   : > { %879 = vadd.xlane.f32.xlu0 %v878_v1 }
 0x2d9   : > { %v874_v2 = vpop.xlane.xlu0 %873 }
 0x2da   : > { %v882_v3 = vmul.f32 0.03125, %v874_v2 }
 0x2db   : > { %v871_v18 = vpop.xlane.xlu1 %870 }
 0x2dc   : > { %v886_v4 = vadd.f32 1e-06, %v882_v3  ;;  %v881_v5 = vmul.f32 0.03125, %v871_v18 }
 0x2de   : > { %1240 = vrsqrt.f32 %v886_v4  ;;  %v885_v6 = vadd.f32 1e-06, %v881_v5 }
 0x2df   : > { %v877_v11 = vpop.xlane.xlu1 %876 }
 0x2e0   : > { %1242 = vrsqrt.f32 %v885_v6  ;;  %v883_v12 = vmul.f32 0.03125, %v877_v11 }
 0x2e2   : > { %v887_v14 = vadd.f32 1e-06, %v883_v12 }
 0x2e3   : > { %v880_v16 = vpop.xlane.xlu0 %879 }
 0x2e4   : > { %1244 = vrsqrt.f32 %v887_v14  ;;  %v884_v17 = vmul.f32 0.03125, %v880_v16 }
 0x2e6   : > { %v888_v9 = vadd.f32 1e-06, %v884_v17 }
 0x2e8   : > { %1246 = vrsqrt.f32 %v888_v9 }
 0x2eb   : > { %v1241_v21 = vpop.eup %1240 }
 0x2ec   : > { %v894_v24 = vmul.f32 %v1241_v21, %v862_v52 }
 0x2ed   : > { %v1243_v25 = vpop.eup %1242 }
 0x2ee   : > { %v904_v28 = vmul.f32 %v1116_v22, %v894_v24  ;;  %v893_v29 = vmul.f32 %v1243_v25, %v861_v54 }
 0x2f0   : > { %v914_v30 = vadd.f32 %v1117_v26, %v904_v28  ;;  %v903_v31 = vmul.f32 %v1116_v22, %v893_v29 }
 0x2f1   : > { %v1245_v32 = vpop.eup %1244 }
 0x2f2   : > { %v931_v33 = vsel %vm925_vm14, %v914_v30, 0.0  ;;  %v913_v34 = vadd.f32 %v1117_v26, %v903_v31  ;;  %v895_v35 = vmul.f32 %v1245_v32, %v863_v58 }
 0x2f3   : > { %935 = vst.msk [vmem:[%s462_s19 + $0x8] sm:$0xff] %vm843_vm13, %v931_v33 }
 0x2f4   : > { %v930_v36 = vsel %vm924_vm15, %v913_v34, 0.0  ;;  %v905_v37 = vmul.f32 %v1116_v22, %v895_v35 }
 0x2f5   : > { %v1247_v38 = vpop.eup %1246  ;;  %934 = vst.msk [vmem:[%s462_s19] sm:$0xff] %vm843_vm13, %v930_v36 }
 0x2f6   : > { %v915_v39 = vadd.f32 %v1117_v26, %v905_v37  ;;  %v896_v40 = vmul.f32 %v1247_v38, %v864_v63 }
 0x2f8   : > { %v932_v41 = vsel %vm924_vm15, %v915_v39, 0.0  ;;  %v906_v42 = vmul.f32 %v1116_v22, %v896_v40 }
 0x2f9   : > { %936 = vst.msk [vmem:[%s462_s19 + $0x10] sm:$0xff] %vm843_vm13, %v932_v41  ;;  %944 = sbr.rel (!%p1439_p0) target bundleno = 774 (0x306), region = 166 }
 0x2fa   : > { %v916_v43 = vadd.f32 %v1117_v26, %v906_v42  ;;  %v984_v46 = vld [vmem:[%s462_s19 + $0x8] sm:$0xff] (%p1439_p0) }
 0x2fb   : > { %985 = vst [vmem:[%s947_s22 + $0x8] sm:$0xff] (%p1439_p0), %v984_v46 }
 0x2fc   : > { %v933_v44 = vsel %vm925_vm14, %v916_v43, 0.0  ;;  %v982_v45 = vld [vmem:[%s462_s19] sm:$0xff] (%p1439_p0) }
 0x2fd   : > { %937 = vst.msk [vmem:[%s462_s19 + $0x18] sm:$0xff] %vm843_vm13, %v933_v44  ;;  %983 = vst [vmem:[%s947_s22] sm:$0xff] (%p1439_p0), %v982_v45 }
 0x300   : > { %v986_v47 = vld [vmem:[%s462_s19 + $0x10] sm:$0xff] }
 0x301   : > { %987 = vst [vmem:[%s947_s22 + $0x30] sm:$0xff] %v986_v47 }
 0x304   : > { %v988_v48 = vld [vmem:[%s462_s19 + $0x18] sm:$0xff] }
 0x305   : > { %989 = vst [vmem:[%s947_s22 + $0x38] sm:$0xff] %v988_v48 }
 0x306 PF: > { %s1691_s30 = sld [smem:[#allocation7_spill]]  ;;  %s1695_s24 = smov %s1282_s25 }
 0x307   : > { %s1692_s9 = sld [smem:[#allocation9_spill]]  ;;  %s1696_s25 = smov %s1446_s14 }
 0x308   : > { %s1693_s28 = sld [smem:[#allocation6_spill]]  ;;  %s1697_s26 = smov %s1290_s27 }
 0x309   : > { %s1694_s29 = sld [smem:[#allocation8_spill]] }
 0x30c   : > { %p14_p8 = scmp.ge.s32.totalorder %s1691_s30, 5  }
 0x30d   : > { %s1698_s27 = smov %s1692_s9 }
 0x30e   :  { %16 = sbr.rel (!%p14_p8) target bundleno = 6 (0x6), region = 251 }

// kernel: convnext_encoder_forward.6
= control target key start
LH: loop header
LB: loop body
LE: loop exit
PB: predicated region body
PF: predicated region fallthrough
CT: control target
= control target key end

     0   :  { %s2255_s0 = inlined_call_operand.vmem [shape: f32[2,48,32], index: 0, kind: input, shape index: {}, may-alias: {0,1,2}]   ;;  %s2256_s1 = inlined_call_operand.vmem [shape: f32[2,48,32], index: 1, kind: input, shape index: {}, may-alias: {0,1,2}]   ;;  %s2257_s2 = inlined_call_operand.vmem [shape: f32[2,48,32], index: 2, kind: input, shape index: {}, may-alias: {0,1,2}]   ;;  %s2258_s3 = inlined_call_operand.vmem [shape: f32[7,32], index: 3, kind: input, shape index: {}]   ;;  %s2259_s4 = inlined_call_operand.vmem [shape: f32[1,32], index: 4, kind: input, shape index: {}]   ;;  %s2260_s5 = inlined_call_operand.vmem [shape: f32[1,32], index: 5, kind: input, shape index: {}]   ;;  %s2261_s6 = inlined_call_operand.vmem [shape: f32[1,32], index: 6, kind: input, shape index: {}]   ;;  %s2262_s7 = inlined_call_operand.vmem [shape: f32[32,128], index: 7, kind: input, shape index: {}]   ;;  %s2263_s8 = inlined_call_operand.vmem [shape: f32[1,128], index: 8, kind: input, shape index: {}]   ;;  %s2264_s9 = inlined_call_operand.vmem [shape: f32[128,32], index: 9, kind: input, shape index: {}]   ;;  %s2265_s10 = inlined_call_operand.vmem [shape: f32[1,32], index: 10, kind: input, shape index: {}]   ;;  %s2266_s11 = inlined_call_operand.vmem [shape: f32[1,32], index: 11, kind: input, shape index: {}]   ;;  %s2267_s12 = inlined_call_operand.vmem [shape: f32[2,48,32], index: 12, kind: output, shape index: {}]  }
   0x1   :  { %2272 = sst [smem:[#allocation11_spill]] %s2261_s6 }
   0x2   :  { %2273 = sst [smem:[#allocation12_spill]] %s2263_s8 }
   0x3   :  { %2274 = sst [smem:[#allocation13_spill]] %s2265_s10 }
   0x4   :  { %2275 = sst [smem:[#allocation14_spill]] %s2266_s11 }
   0x5   :  { %2276 = sst [smem:[#allocation15_spill]] %s2267_s12 }
   0x6   :  { %s1760_s21 = smov 0   ;;  %s1762_s22 = smov 0  }
   0x7   :  { %s1764_s23 = smov 0   ;;  %s1766_s24 = smov 0  }
   0x8   :  { %s1768_s25 = smov 0   ;;  %s1770_s26 = smov 0  }
   0x9   :  { %s1772_s27 = smov 0  }
   0xa LB: > { %2277 = sst [smem:[#allocation6_spill]] %s1689_s26  ;;  %s1796_s28 = sadd.s32 1, %s1693_s27   ;;  %s1693_s27 = sphi %s1772_s27, %s2292_s27   ;;  %s1689_s26 = sphi %s1770_s26, %s2295_s26   ;;  %s1685_s25 = sphi %s1768_s25, %s2294_s25   ;;  %s1681_s24 = sphi %s1766_s24, %s2299_s24   ;;  %s1677_s23 = sphi %s1764_s23, %s2298_s23   ;;  %s1673_s22 = sphi %s1762_s22, %s2297_s22   ;;  %s1669_s21 = sphi %s1760_s21, %s2296_s21  }
   0xb   : > { %2278 = sst [smem:[#allocation7_spill]] %s1796_s28  ;;  %s1420_s29 = sshll.u32 %s1693_s27, 1 }
   0xc   : > { %s37_s30 = sadd.s32 1, %s1689_s26  ;;  %s1421_s13 = sadd.s32 4294967295, %s1420_s29 }
   0xd   : > { %s1460_s14 = sadd.s32 2, %s1420_s29  ;;  %p28_p0 = scmp.gt.s32.totalorder %s1421_s13, 0 }
   0xe   : > { %s1423_s15 = sadd.s32 4294967295, %s1460_s14  ;;  %p44_p2 = scmp.ne.s32.totalorder %s1689_s26, %s1685_s25 }
   0xf   : > { %p32_p1 = scmp.gt.s32.totalorder %s1423_s15, 0  ;;  %s2301_s13 = smov (!%p28_p0, %s1421_s13), 0 }
  0x10   : > { %p45_p3 = scmp.eq.s32.totalorder %s1693_s27, 0  ;;  %s60_s16 = ssub.s32 %s1693_s27, %s1796_s28 }
  0x11   : > { %s2303_s15 = smov (!%p32_p1, %s1423_s15), 0  ;;  %p61_p4 = scmp.eq.s32.totalorder %s60_s16, 0 }
  0x12   : > { %s34_s17 = ssub.s32 %s2301_s13, %s2303_s15  ;;  %p1810_p6 = por %p45_p3, %p44_p2 }
  0x13   : > { %p35_p5 = scmp.eq.s32.totalorder %s34_s17, 0  ;;  %s63_s19 = sadd.s32 1, %s1681_s24 }
  0x14   : > { %p70_p7 = scmp.ne.s32.totalorder %s1681_s24, %s1677_s23  ;;  %p88_p9 = scmp.lt.s32.totalorder %s1460_s14, 5 }
  0x15   : > { %s1818_s20 = scalar_select %p35_p5, %s1689_s26, %s37_s30  }
  0x16   : > { %s1821_s29 = scalar_select %p61_p4, %s1681_s24, %s63_s19  }
  0x17   : > { %2280 = sst [smem:[#allocation8_spill]] %s1818_s20  ;;  %p1828_p8 = por %p70_p7, %p45_p3 }
  0x18   : > { %2281 = sst [smem:[#allocation9_spill]] %s1821_s29  ;;  %s1833_s16 = sadd.s32 4294967295, %s1693_s27  }
  0x19   : > { %s1464_s17 = sadd.s32 2, %s1460_s14  ;;  %s2305_s14 = smov (!%p88_p9, %s1460_s14), 5 }
  0x1a   : > { %p92_p10 = scmp.lt.s32.totalorder %s1464_s17, 5  ;;  %p104_p11 = scmp.ne.s32.totalorder %s1673_s22, %s1669_s21 }
  0x1b   : > { %p323_p12 = scmp.eq.s32.totalorder %s1833_s16, 2  ;;  %s97_s29 = sadd.s32 1, %s1673_s22 }
  0x1c   : > { %s2307_s17 = smov (!%p92_p10, %s1464_s17), 5  ;;  %p1842_p13 = por %p104_p11, %p45_p3 }
  0x1d   : > { %p1849_p0 = por %p323_p12, %p70_p7  ;;  %s94_s20 = ssub.s32 %s2305_s14, %s2307_s17 }
  0x1e   : > { %p95_p1 = scmp.eq.s32.totalorder %s94_s20, 0  ;;  %p1427_p2 = scmp.ge.s32.totalorder %s1693_s27, 3 }
  0x1f   : > { %s2284_s19 = scalar_select %p1849_p0, 1, 0 }
  0x20   : > { %s1856_s28 = scalar_select %p95_p1, %s1673_s22, %s97_s29  }
  0x21   : > { %2285 = sst [smem:[#allocation10_spill]] %s2284_s19  ;;  %372 = sbr.rel (%p1427_p2) target bundleno = 54 (0x36), region = 52 }
  0x26   : > { %375 = sbr.rel (!%p1810_p6) target bundleno = 43 (0x2b), region = 56  ;;  %s377_s12 = sand.u32 (%p1810_p6), 1, %s1689_s26  }
  0x27   : > { %s1431_s11 = sshll.u32 (%p1810_p6), %s2301_s13, 3  ;;  %s1428_s10 = sshll.u32 (%p1810_p6), %s377_s12, 4 }
  0x28   : > { %s385_s19 = scalar_lea.vmem (%p1810_p6), %s2255_s0, %s1431_s11  ;;  %s379_s20 = scalar_lea.vmem (%p1810_p6), [#allocation2], %s1428_s10 }
  0x29   : > { %v416_v0 = vld [vmem:[%s385_s19] sm:$0xff] (%p1810_p6)  ;;  %v418_v1 = vld [vmem:[%s385_s19 + $0x30] sm:$0xff] (%p1810_p6) }
  0x2a   : > { %417 = vst [vmem:[%s379_s20] sm:$0xff] (%p1810_p6), %v416_v0  ;;  %419 = vst [vmem:[%s379_s20 + $0x8] sm:$0xff] (%p1810_p6), %v418_v1 }
  0x2b PF: > { %425 = sbr.rel (!%p1828_p8) target bundleno = 49 (0x31), region = 94  ;;  %s427_s18 = sand.u32 (%p1828_p8), 1, %s1681_s24  }
  0x2c   : > { %s1465_s29 = sshll.u32 (%p1828_p8), %s1693_s27, 4  ;;  %s1432_s17 = sshll.u32 (%p1828_p8), %s427_s18, 5 }
  0x2d   : > { %s432_s26 = scalar_lea.vmem (%p1828_p8), %s2256_s1, %s1465_s29  ;;  %s429_s6 = scalar_lea.vmem (%p1828_p8), [#allocation3], %s1432_s17 }
  0x2e   : > { %v467_v2 = vld [vmem:[%s432_s26] sm:$0xff] (%p1828_p8)  ;;  %v469_v3 = vld [vmem:[%s432_s26 + $0x8] sm:$0xff] (%p1828_p8)  ;;  %v471_v4 = vld [vmem:[%s432_s26 + $0x30] sm:$0xff] (%p1828_p8) }
  0x2f   : > { %468 = vst [vmem:[%s429_s6] sm:$0xff] (%p1828_p8), %v467_v2  ;;  %470 = vst [vmem:[%s429_s6 + $0x8] sm:$0xff] (%p1828_p8), %v469_v3  ;;  %v473_v5 = vld [vmem:[%s432_s26 + $0x38] sm:$0xff] (%p1828_p8) }
  0x30   : > { %472 = vst [vmem:[%s429_s6 + $0x10] sm:$0xff] %v471_v4  ;;  %474 = vst [vmem:[%s429_s6 + $0x18] sm:$0xff] %v473_v5 }
  0x31 PF: > { %480 = sbr.rel (!%p1842_p13) target bundleno = 54 (0x36), region = 132  ;;  %s482_s8 = sand.u32 (%p1842_p13), 1, %s1673_s22  }
  0x32   : > { %s1437_s10 = sshll.u32 (%p1842_p13), %s2305_s14, 3  ;;  %s1435_s11 = sshll.u32 (%p1842_p13), %s482_s8, 4 }
  0x33   : > { %s490_s20 = scalar_lea.vmem (%p1842_p13), %s2257_s2, %s1437_s10  ;;  %s484_s18 = scalar_lea.vmem (%p1842_p13), [#allocation4], %s1435_s11 }
  0x34   : > { %v521_v6 = vld [vmem:[%s490_s20] sm:$0xff] (%p1842_p13)  ;;  %v523_v7 = vld [vmem:[%s490_s20 + $0x30] sm:$0xff] (%p1842_p13) }
  0x35   : > { %522 = vst [vmem:[%s484_s18] sm:$0xff] (%p1842_p13), %v521_v6  ;;  %524 = vst [vmem:[%s484_s18 + $0x8] sm:$0xff] (%p1842_p13), %v523_v7 }
  0x36 PF: > { %p1438_p3 = scmp.ge.s32.totalorder %s1693_s27, 1  ;;  %p529_p4 = scmp.lt.s32.totalorder %s1693_s27, 4 }
  0x38   : > { %p530_p5 = pnand %p1438_p3, %p529_p4 }
  0x39   : > { %s543_s26 = sand.u32 (!%p530_p5), 1, %s1677_s23   ;;  %s550_s14 = sand.u32 (!%p530_p5), 1, %s1669_s21  }
  0x3a   : > { %533 = sbr.rel (%p530_p5) target bundleno = 855 (0x357), region = 170  ;;  %s1884_s30 = sshll.u32 (!%p530_p5), %s543_s26, 5 }
  0x3b   : > { %s1888_s29 = sshll.u32 (!%p530_p5), %s550_s14, 4  ;;  %p620_p6 = scmp.lt.s32.totalorder (!%p530_p5), %s1833_s16, 2 }
  0x3c   : > { %s536_s21 = sand.u32 (!%p530_p5), 1, %s1685_s25   ;;  %p612_p7 = scmp.gt.s32.totalorder (!%p530_p5), %s1833_s16, 0 }
  0x3d   : > { %s1901_s23 = scalar_lea.vmem (!%p530_p5), [#allocation3], %s1884_s30  ;;  %s1928_s12 = sshll.u32 (!%p530_p5), %s536_s21, 4 }
  0x3e   : > { %s552_s8 = scalar_lea.vmem (!%p530_p5), [#allocation4], %s1888_s29  ;;  %s538_s11 = scalar_lea.vmem (!%p530_p5), [#allocation2], %s1928_s12 }
  0x3f   : > { %v637_v8 = vlaneseq  ;;  %v628_v10 = vld [vmem:[%s2258_s3] sm:$0x7f]  ;;  %v1904_v15 = vld [vmem:[%s1901_s23 + $0x8] sm:$0xff]  ;;  %vm778_vm0 = vcmask 1043456   ;;  %vm817_vm1 = vcmask 1042432   ;;  %vm856_vm2 = vcmask 1041408  }
  0x40   : > { %v1920_v23 = vld [vmem:[%s2259_s4] ss:$0 sm:$0xff]  ;;  %vm669_vm3 = vcmask 1046528   ;;  %vm708_vm4 = vcmask 1045504   ;;  %s1942_s6 = scalar_select %p620_p6, 255, 0 }
  0x41   : > { %v1886_v9 = vshrl.u32 %v637_v8, 7  ;;  %v1964_v37 = vld [vmem:[%s1901_s23] sm:$0xff]  ;;  %vm743_vm5 = vcmask 1044480   ;;  %s1979_s10 = scalar_select %p612_p7, 255, 0  ;;  %vm889_vm6 = vcmask 258048  }
  0x42   : > { %v1609_v38 = vld [vmem:[%s552_s8] sm:%s1942_s6]  ;;  %vm881_vm7 = vcmask 261125   ;;  %vm885_vm8 = vcmask 261120   ;;  %s2286_s15 = sld [smem:[#allocation11_spill]]  ;;  %s1453_s13 = sshll.u32 %s1833_s16, 4 }
  0x43   : > { %v639_v11 = vsub.s32 0, %v1886_v9  ;;  %v655_v12 = vsub.s32 1, %v1886_v9  ;;  %v694_v13 = vsub.s32 2, %v1886_v9  ;;  %v733_v14 = vsub.s32 3, %v1886_v9  ;;  %v1612_v54 = vld [vmem:[%s538_s11] sm:%s1979_s10]  ;;  %s2287_s25 = sld [smem:[#allocation12_spill]] }
  0x44   : > { %v764_v16 = vsub.s32 4, %v1886_v9  ;;  %v803_v17 = vsub.s32 5, %v1886_v9  ;;  %v842_v18 = vsub.s32 6, %v1886_v9  ;;  %s597_s19 = scalar_lea.vmem [#allocation5], %s1884_s30  ;;  %s2291_s26 = sld [smem:[#allocation15_spill]] (%p1849_p0) }
  0x45   : > { %v1909_v19 = vrot.slane %v628_v10, %v639_v11  ;;  %v1911_v20 = vrot.slane %v628_v10, %v655_v12  ;;  %v1913_v21 = vrot.slane %v628_v10, %v694_v13  ;;  %v1915_v22 = vrot.slane %v628_v10, %v733_v14 }
  0x46   : > { %v1922_v24 = vrot.slane %v628_v10, %v764_v16  ;;  %v1924_v25 = vrot.slane %v628_v10, %v803_v17  ;;  %v1926_v26 = vrot.slane %v628_v10, %v842_v18  ;;  %v1615_v17 = vld [vmem:[%s538_s11 + $0x8] sm:%s1979_s10] }
  0x47   : > { %v643_v27 = vmul.f32 %v1909_v19, %v1904_v15  ;;  %v1934_v28 = vmul.f32 %v1911_v20, %v1904_v15  ;;  %v1938_v29 = vmul.f32 %v1913_v21, %v1904_v15  ;;  %v1946_v30 = vmul.f32 %v1915_v22, %v1904_v15 }
  0x48   : > { %v1950_v31 = vmul.f32 %v1922_v24, %v1904_v15  ;;  %v1954_v32 = vmul.f32 %v1924_v25, %v1904_v15  ;;  %v1958_v33 = vmul.f32 %v1926_v26, %v1904_v15  ;;  %v768_v44 = vmul.f32 %v1609_v38, %v1922_v24 }
  0x49   : > { %v649_v34 = vadd.f32 %v1920_v23, %v643_v27  ;;  %v673_v35 = vrot.slane %v1934_v28, 1  ;;  %v712_v36 = vrot.slane %v1938_v29, 2  ;;  %v745_v39 = vrot.slane %v1946_v30, 3  ;;  %v2011_v30 = vld [vmem:[%s1901_s23 + $0x10] sm:$0xff] }
  0x4a   : > { %v780_v40 = vrot.slane %v1950_v31, 4  ;;  %v819_v41 = vrot.slane %v1954_v32, 5  ;;  %v858_v42 = vrot.slane %v1958_v33, 6  ;;  %v807_v45 = vmul.f32 %v1609_v38, %v1924_v25  ;;  %s1280_s14 = scalar_lea.vmem (%p1849_p0), %s2291_s26, %s1453_s13 }
  0x4b   : > { %v688_v43 = vadd.f32 %v673_v35, %v649_v34  ;;  %v846_v46 = vmul.f32 %v1609_v38, %v1926_v26  ;;  %v658_v47 = vmul.f32 %v1911_v20, %v1964_v37  ;;  %v697_v48 = vmul.f32 %v1913_v21, %v1964_v37 }
  0x4c   : > { %v735_v49 = vmul.f32 %v1915_v22, %v1964_v37  ;;  %v782_v51 = vrot.slane %v768_v44, 4  ;;  %v821_v52 = vrot.slane %v807_v45, 5  ;;  %v641_v55 = vmul.f32 %v1612_v54, %v1909_v19 }
  0x4d   : > { %v727_v50 = vadd.f32 %v712_v36, %v688_v43  ;;  %v860_v53 = vrot.slane %v846_v46, 6  ;;  %v657_v56 = vmul.f32 %v1612_v54, %v1911_v20  ;;  %v671_v57 = vrot.slane %v658_v47, 1 }
  0x4e   : > { %v696_v58 = vmul.f32 %v1612_v54, %v1913_v21  ;;  %v783_v60 = vsel %vm778_vm0, %v780_v40, %v782_v51  ;;  %v822_v61 = vsel %vm817_vm1, %v819_v41, %v821_v52  ;;  %v647_v63 = vadd.f32 %v1920_v23, %v641_v55 }
  0x4f   : > { %v758_v59 = vadd.f32 %v745_v39, %v727_v50  ;;  %v861_v62 = vsel %vm856_vm2, %v858_v42, %v860_v53  ;;  %v670_v0 = vrot.slane %v657_v56, 1  ;;  %v710_v2 = vrot.slane %v697_v48, 2 }
  0x50   : > { %v709_v1 = vrot.slane %v696_v58, 2  ;;  %v744_v4 = vrot.slane %v735_v49, 3  ;;  %v766_v5 = vmul.f32 %v1922_v24, %v1964_v37  ;;  %v805_v6 = vmul.f32 %v1924_v25, %v1964_v37 }
  0x51   : > { %v797_v3 = vadd.f32 %v783_v60, %v758_v59  ;;  %v672_v7 = vsel %vm669_vm3, %v670_v0, %v671_v57  ;;  %v844_v10 = vmul.f32 %v1926_v26, %v1964_v37  ;;  %v642_v11 = vmul.f32 %v1909_v19, %v1964_v37  ;;  %v2037_v60 = vld [vmem:[%s1901_s23 + $0x18] sm:$0xff] }
  0x52   : > { %v711_v8 = vsel %vm708_vm4, %v709_v1, %v710_v2  ;;  %v686_v13 = vadd.f32 %v672_v7, %v647_v63  ;;  %v779_v14 = vrot.slane %v766_v5, 4  ;;  %v818_v16 = vrot.slane %v805_v6, 5 }
  0x53   : > { %v836_v12 = vadd.f32 %v822_v61, %v797_v3  ;;  %v857_v18 = vrot.slane %v844_v10, 6  ;;  %v648_v27 = vadd.f32 %v1920_v23, %v642_v11  ;;  %v674_v28 = vsel %vm669_vm3, %v671_v57, %v673_v35 }
  0x54   : > { %v713_v29 = vsel %vm708_vm4, %v710_v2, %v712_v36  ;;  %v725_v32 = vadd.f32 %v711_v8, %v686_v13  ;;  %v746_v33 = vsel %vm743_vm5, %v744_v4, %v745_v39  ;;  %v781_v34 = vsel %vm778_vm0, %v779_v14, %v780_v40 }
  0x55   : > { %v2013_v31 = vadd.f32 %v861_v62, %v836_v12  ;;  %v687_v38 = vadd.f32 %v674_v28, %v648_v27  ;;  %v820_v43 = vsel %vm817_vm1, %v818_v16, %v819_v41  ;;  %v859_v44 = vsel %vm856_vm2, %v857_v18, %v858_v42 }
  0x56   : > { %v644_v45 = vmul.f32 %v1615_v17, %v1909_v19  ;;  %v756_v36 = vadd.f32 %v744_v4, %v725_v32  ;;  %v660_v46 = vmul.f32 %v1615_v17, %v1911_v20  ;;  %v661_v47 = vmul.f32 %v1911_v20, %v2011_v30 }
  0x57   : > { %v890_v35 = vsel %vm889_vm6, %v2013_v31, 0.0  ;;  %v726_v39 = vadd.f32 %v713_v29, %v687_v38  ;;  %v699_v41 = vmul.f32 %v1615_v17, %v1913_v21  ;;  %v700_v42 = vmul.f32 %v1913_v21, %v2011_v30  ;;  %v1618_v29 = vld [vmem:[%s552_s8 + $0x8] sm:%s1942_s6]  ;;  %s2288_s8 = sld [smem:[#allocation13_spill]] }
  0x58   : > { %891 = vadd.xlane.f32.xlu1 %v890_v35  ;;  %v650_v40 = vadd.f32 %v1920_v23, %v644_v45  ;;  %v795_v48 = vadd.f32 %v779_v14, %v756_v36  ;;  %v675_v49 = vrot.slane %v660_v46, 1  ;;  %v676_v50 = vrot.slane %v661_v47, 1 }
  0x59   : > { %v737_v51 = vmul.f32 %v1915_v22, %v2011_v30  ;;  %v757_v52 = vadd.f32 %v746_v33, %v726_v39  ;;  %v714_v53 = vrot.slane %v699_v41, 2  ;;  %v715_v54 = vrot.slane %v700_v42, 2 }
  0x5a   : > { %v769_v55 = vmul.f32 %v1922_v24, %v2011_v30  ;;  %v834_v56 = vadd.f32 %v818_v16, %v795_v48  ;;  %v677_v57 = vsel %vm669_vm3, %v675_v49, %v676_v50  ;;  %v808_v59 = vmul.f32 %v1924_v25, %v2011_v30 }
  0x5b   : > { %v747_v58 = vrot.slane %v737_v51, 3  ;;  %v796_v61 = vadd.f32 %v781_v34, %v757_v52  ;;  %v689_v62 = vadd.f32 %v677_v57, %v650_v40  ;;  %v716_v63 = vsel %vm708_vm4, %v714_v53, %v715_v54 }
  0x5c   : > { %v784_v0 = vrot.slane %v769_v55, 4  ;;  %v2040_v1 = vadd.f32 %v857_v18, %v834_v56  ;;  %v823_v2 = vrot.slane %v808_v59, 5  ;;  %v847_v3 = vmul.f32 %v1926_v26, %v2011_v30 }
  0x5d   : > { %v645_v4 = vmul.f32 %v1909_v19, %v2011_v30  ;;  %v835_v5 = vadd.f32 %v820_v43, %v796_v61  ;;  %v728_v6 = vadd.f32 %v716_v63, %v689_v62  ;;  %v662_v7 = vmul.f32 %v1911_v20, %v2037_v60 }
  0x5e   : > { %v701_v8 = vmul.f32 %v1913_v21, %v2037_v60  ;;  %v882_v10 = vsel %vm881_vm7, %v2040_v1, 0.0  ;;  %v862_v11 = vrot.slane %v847_v3, 6  ;;  %v738_v13 = vmul.f32 %v1915_v22, %v2037_v60 }
  0x5f   : > { %v651_v12 = vadd.f32 %v1920_v23, %v645_v4  ;;  %883 = vadd.xlane.f32.xlu0 %v882_v10  ;;  %v2055_v14 = vadd.f32 %v859_v44, %v835_v5  ;;  %v759_v16 = vadd.f32 %v747_v58, %v728_v6  ;;  %v678_v17 = vrot.slane %v662_v7, 1 }
  0x60   : > { %v717_v18 = vrot.slane %v701_v8, 2  ;;  %v748_v27 = vrot.slane %v738_v13, 3  ;;  %v770_v20 = vmul.f32 %v1922_v24, %v2037_v60  ;;  %v809_v21 = vmul.f32 %v1924_v25, %v2037_v60 }
  0x61   : > { %v848_v28 = vmul.f32 %v1926_v26, %v2037_v60  ;;  %v886_v22 = vsel %vm885_vm8, %v2055_v14, 0.0  ;;  %v798_v32 = vadd.f32 %v784_v0, %v759_v16  ;;  %v679_v33 = vsel %vm669_vm3, %v676_v50, %v678_v17 }
  0x62   : > { %v718_v34 = vsel %vm708_vm4, %v715_v54, %v717_v18  ;;  %v690_v38 = vadd.f32 %v679_v33, %v651_v12  ;;  %v749_v43 = vsel %vm743_vm5, %v747_v58, %v748_v27  ;;  %v785_v44 = vrot.slane %v770_v20, 4 }
  0x63   : > { %887 = vadd.xlane.f32.xlu0 %v886_v22  ;;  %v837_v45 = vadd.f32 %v823_v2, %v798_v32  ;;  %v824_v35 = vrot.slane %v809_v21, 5  ;;  %v646_v36 = vmul.f32 %v1909_v19, %v2037_v60  ;;  %v771_v46 = vmul.f32 %v1618_v29, %v1922_v24 }
  0x64   : > { %v729_v47 = vadd.f32 %v718_v34, %v690_v38  ;;  %v810_v39 = vmul.f32 %v1618_v29, %v1924_v25  ;;  %v786_v41 = vsel %vm778_vm0, %v784_v0, %v785_v44  ;;  %v863_v42 = vrot.slane %v848_v28, 6 }
  0x65   : > { %v876_v40 = vadd.f32 %v862_v11, %v837_v45  ;;  %v652_v48 = vadd.f32 %v1920_v23, %v646_v36  ;;  %v787_v50 = vrot.slane %v771_v46, 4  ;;  %v849_v51 = vmul.f32 %v1618_v29, %v1926_v26  ;;  %v1006_v46 = vld [vmem:[%s2262_s7 + $0x18] sm:$0xff] }
  0x66   : > { %v760_v49 = vadd.f32 %v749_v43, %v729_v47  ;;  %v825_v53 = vsel %vm817_vm1, %v823_v2, %v824_v35  ;;  %v826_v54 = vrot.slane %v810_v39, 5  ;;  %v864_v25 = vsel %vm856_vm2, %v862_v11, %v863_v42  ;;  %v1005_v47 = vld [vmem:[%s2262_s7 + $0x10] sm:$0xff]  ;;  %1499 = vmatprep.subr.mxu0 %v1006_v46  ;;  %v1004_v39 = vld [vmem:[%s2262_s7 + $0x8] sm:$0xff] }
  0x67   : > { %v893_v52 = vsel %vm881_vm7, %v876_v40, 0.0  ;;  %v691_v19 = vadd.f32 %v678_v17, %v652_v48  ;;  %v788_v57 = vsel %vm778_vm0, %v785_v44, %v787_v50  ;;  %v865_v58 = vrot.slane %v849_v51, 6  ;;  %1500 = vmatpush3.msra.mxu0 %v1006_v46  ;;  %v1140_v48 = vld [vmem:[%s2264_s9 + $0x68] sm:$0xff] }
  0x68   : > { %894 = vadd.xlane.f32.xlu1 %v893_v52  ;;  %v799_v24 = vadd.f32 %v786_v41, %v760_v49  ;;  %v827_v61 = vsel %vm817_vm1, %v824_v35, %v826_v54  ;;  %1501 = vmatprep.subr.mxu0 %v1005_v47  ;;  %v1142_v41 = vld [vmem:[%s2264_s9 + $0x78] sm:$0xff] }
  0x69   : > { %v730_v55 = vadd.f32 %v717_v18, %v691_v19  ;;  %v866_v63 = vsel %vm856_vm2, %v863_v42, %v865_v58  ;;  %1502 = vmatpush3.msra.mxu0 %v1005_v47  ;;  %v1141_v42 = vld [vmem:[%s2264_s9 + $0x70] sm:$0xff]  ;;  %1513 = vmatprep.subr.mxu1 %v1142_v41 }
  0x6a   : > { %v838_v56 = vadd.f32 %v825_v53, %v799_v24  ;;  %1503 = vmatprep.subr.mxu0 %v1004_v39  ;;  %1514 = vmatpush3.msra.mxu1 %v1142_v41  ;;  %v1137_v41 = vld [vmem:[%s2264_s9 + $0x50] sm:$0xff] }
  0x6b   : > { %v761_v23 = vadd.f32 %v748_v27, %v730_v55  ;;  %1504 = vmatpush3.msra.mxu0 %v1004_v39  ;;  %1515 = vmatprep.subr.mxu1 %v1141_v42 }
  0x6c   : > { %v877_v59 = vadd.f32 %v864_v25, %v838_v56  ;;  %1516 = vmatpush3.msra.mxu1 %v1141_v42  ;;  %v1136_v42 = vld [vmem:[%s2264_s9 + $0x48] sm:$0xff] }
  0x6d   : > { %v800_v26 = vadd.f32 %v788_v57, %v761_v23  ;;  %1517 = vmatprep.subr.mxu1 %v1140_v48 }
  0x6e   : > { %v896_v62 = vsel %vm885_vm8, %v877_v59, 0.0  ;;  %1518 = vmatpush3.msra.mxu1 %v1140_v48  ;;  %v1135_v48 = vld [vmem:[%s2264_s9 + $0x40] sm:$0xff] }
  0x6f   : > { %897 = vadd.xlane.f32.xlu0 %v896_v62  ;;  %v839_v0 = vadd.f32 %v827_v61, %v800_v26  ;;  %v1444_v62 = vld [vmem:[%s2260_s5] ss:$0 sm:$0xff] }
  0x71   : > { %v878_v2 = vadd.f32 %v866_v63, %v839_v0 }
  0x73   : > { %v899_v3 = vsel %vm889_vm6, %v878_v2, 0.0 }
  0x74   : > { %900 = vadd.xlane.f32.xlu1 %v899_v3 }
  0xe1   : > { %v892_v4 = vpop.xlane.xlu1 %891 }
  0xe2   : > { %v905_v5 = vmul.f32 0.03125, %v892_v4 }
  0xe4   : > { %v2087_v6 = vsub.f32 %v2013_v31, %v905_v5 }
  0xe6   : > { %v917_v7 = vmul.f32 %v2087_v6, %v2087_v6 }
  0xe8   : > { %v927_v8 = vsel %vm889_vm6, %v917_v7, 0.0  ;;  %v884_v10 = vpop.xlane.xlu0 %883 }
  0xe9   : > { %928 = vadd.xlane.f32.xlu0 %v927_v8  ;;  %v903_v11 = vmul.f32 0.03125, %v884_v10  ;;  %v1445_v8 = vld [vmem:[%s2286_s15] ss:$0 sm:$0xff]  ;;  %s2289_s15 = sld [smem:[#allocation14_spill]] }
  0xeb   : > { %v2093_v12 = vsub.f32 %v2040_v1, %v903_v11 }
  0xec   : > { %v888_v13 = vpop.xlane.xlu0 %887 }
  0xed   : > { %v904_v16 = vmul.f32 0.03125, %v888_v13  ;;  %v915_v17 = vmul.f32 %v2093_v12, %v2093_v12 }
  0xef   : > { %v2098_v18 = vsub.f32 %v2055_v14, %v904_v16  ;;  %v921_v31 = vsel %vm881_vm7, %v915_v17, 0.0 }
  0xf0   : > { %922 = vadd.xlane.f32.xlu0 %v921_v31 }
  0xf1   : > { %v895_v27 = vpop.xlane.xlu1 %894  ;;  %v916_v20 = vmul.f32 %v2098_v18, %v2098_v18 }
  0xf2   : > { %v906_v21 = vmul.f32 0.03125, %v895_v27 }
  0xf3   : > { %v924_v28 = vsel %vm885_vm8, %v916_v20, 0.0 }
  0xf4   : > { %v2104_v1 = vsub.f32 %v876_v40, %v906_v21  ;;  %925 = vadd.xlane.f32.xlu1 %v924_v28  ;;  %v1003_v40 = vld [vmem:[%s2262_s7] sm:$0xff] }
  0xf5   : > { %1505 = vmatprep.subr.mxu0 %v1003_v40 }
  0xf6   : > { %v918_v29 = vmul.f32 %v2104_v1, %v2104_v1  ;;  %1506 = vmatpush3.msra.mxu0 %v1003_v40 }
  0xf8   : > { %v898_v22 = vpop.xlane.xlu0 %897  ;;  %v930_v14 = vsel %vm881_vm7, %v918_v29, 0.0 }
  0xf9   : > { %v907_v32 = vmul.f32 0.03125, %v898_v22  ;;  %931 = vadd.xlane.f32.xlu1 %v930_v14 }
  0xfb   : > { %v2109_v33 = vsub.f32 %v877_v59, %v907_v32 }
  0xfd   : > { %v901_v34 = vpop.xlane.xlu1 %900  ;;  %v919_v38 = vmul.f32 %v2109_v33, %v2109_v33 }
  0xfe   : > { %v908_v43 = vmul.f32 0.03125, %v901_v34 }
  0xff   : > { %v933_v44 = vsel %vm885_vm8, %v919_v38, 0.0 }
 0x100   : > { %v2114_v45 = vsub.f32 %v878_v2, %v908_v43  ;;  %934 = vadd.xlane.f32.xlu0 %v933_v44 }
 0x102   : > { %v920_v35 = vmul.f32 %v2114_v45, %v2114_v45 }
 0x104   : > { %v936_v36 = vsel %vm889_vm6, %v920_v35, 0.0 }
 0x105   : > { %937 = vadd.xlane.f32.xlu1 %v936_v36 }
 0x172   : > { %v929_v49 = vpop.xlane.xlu0 %928 }
 0x173   : > { %v941_v50 = vmul.f32 0.03125, %v929_v49  ;;  %v1134_v49 = vld [vmem:[%s2264_s9 + $0x38] sm:$0xff] }
 0x175   : > { %v947_v51 = vadd.f32 1e-06, %v941_v50  ;;  %v1133_v50 = vld [vmem:[%s2264_s9 + $0x30] sm:$0xff] }
 0x177   : > { %1619 = vrsqrt.f32 %v947_v51  ;;  %v1132_v51 = vld [vmem:[%s2264_s9 + $0x28] sm:$0xff] }
 0x179   : > { %v923_v52 = vpop.xlane.xlu0 %922 }
 0x17a   : > { %v939_v53 = vmul.f32 0.03125, %v923_v52  ;;  %v1131_v52 = vld [vmem:[%s2264_s9 + $0x20] sm:$0xff] }
 0x17c   : > { %v945_v19 = vadd.f32 1e-06, %v939_v53  ;;  %v1130_v53 = vld [vmem:[%s2264_s9 + $0x18] sm:$0xff] }
 0x17d   : > { %v926_v24 = vpop.xlane.xlu1 %925 }
 0x17e   : > { %1621 = vrsqrt.f32 %v945_v19  ;;  %v940_v54 = vmul.f32 0.03125, %v926_v24  ;;  %v1129_v19 = vld [vmem:[%s2264_s9 + $0x10] sm:$0xff]  ;;  %v1128_v24 = vld [vmem:[%s2264_s9 + $0x8] sm:$0xff] }
 0x180   : > { %v946_v25 = vadd.f32 1e-06, %v940_v54  ;;  %v1127_v54 = vld [vmem:[%s2264_s9] sm:$0xff] }
 0x182   : > { %1623 = vrsqrt.f32 %v946_v25  ;;  %v932_v55 = vpop.xlane.xlu1 %931  ;;  %v1446_v25 = vld [vmem:[%s2287_s25] ss:$0 sm:$0xff] }
 0x183   : > { %v942_v56 = vmul.f32 0.03125, %v932_v55 }
 0x184   : > { %v1620_v58 = vpop.eup %1619 }
 0x185   : > { %v948_v57 = vadd.f32 1e-06, %v942_v56  ;;  %v959_v61 = vmul.f32 %v1620_v58, %v2087_v6 }
 0x187   : > { %1625 = vrsqrt.f32 %v948_v57  ;;  %v971_v4 = vmul.f32 %v1444_v62, %v959_v61 }
 0x189   : > { %v935_v23 = vpop.xlane.xlu0 %934  ;;  %v983_v16 = vadd.f32 %v1445_v8, %v971_v4 }
 0x18a   : > { %v943_v59 = vmul.f32 0.03125, %v935_v23 }
 0x18b   : > { %v1622_v26 = vpop.eup %1621  ;;  %v996_v21 = vrot.slane %v983_v16, 5 }
 0x18c   : > { %v949_v63 = vadd.f32 1e-06, %v943_v59  ;;  %v957_v0 = vmul.f32 %v1622_v26, %v2093_v12 }
 0x18e   : > { %1627 = vrsqrt.f32 %v949_v63  ;;  %v938_v2 = vpop.xlane.xlu1 %937  ;;  %v969_v3 = vmul.f32 %v1444_v62, %v957_v0 }
 0x18f   : > { %v1624_v5 = vpop.eup %1623  ;;  %v944_v7 = vmul.f32 0.03125, %v938_v2 }
 0x190   : > { %v958_v6 = vmul.f32 %v1624_v5, %v2098_v18  ;;  %v981_v13 = vadd.f32 %v1445_v8, %v969_v3 }
 0x191   : > { %v950_v10 = vadd.f32 1e-06, %v944_v7 }
 0x192   : > { %v970_v11 = vmul.f32 %v1444_v62, %v958_v6  ;;  %v993_v27 = vrot.slane %v981_v13, 5 }
 0x193   : > { %1629 = vrsqrt.f32 %v950_v10 }
 0x194   : > { %v1626_v17 = vpop.eup %1625  ;;  %v982_v31 = vadd.f32 %v1445_v8, %v970_v11 }
 0x195   : > { %v960_v12 = vmul.f32 %v1626_v17, %v2104_v1 }
 0x196   : > { %v994_v20 = vrot.slane %v982_v31, 5 }
 0x197   : > { %v972_v22 = vmul.f32 %v1444_v62, %v960_v12 }
 0x198   : > { %v995_v28 = vsel %vm817_vm1, %v993_v27, %v994_v20  ;;  %v997_v29 = vsel %vm817_vm1, %v994_v20, %v996_v21 }
 0x199   : > { %1507 = vmatprep.mubr.msk.f32.mxu0 %vm885_vm8, %v995_v28  ;;  %v984_v32 = vadd.f32 %v1445_v8, %v972_v22  ;;  %v1253_v28 = vadd.s32 8, %v1886_v9  ;;  %v1451_v22 = vld [vmem:[%s2288_s8] ss:$0 sm:$0xff] }
 0x19a   : > { %1508 = vmatmul.mubr.msk.f32.vlgmr.msra.gmra.mxu0 %vm885_vm8, %v997_v29  ;;  %v1254_v29 = vstv %s1453_s13 }
 0x19b   : > { %v1628_v18 = vpop.eup %1627  ;;  %v998_v1 = vrot.slane %v984_v32, 5  ;;  %v1256_v32 = vadd.s32 %v1254_v29, %v1253_v28 }
 0x19c   : > { %v961_v14 = vmul.f32 %v1628_v18, %v2109_v33  ;;  %v1139_v33 = vld [vmem:[%s2264_s9 + $0x60] sm:$0xff] }
 0x19d   : > { %1519 = vmatprep.subr.mxu1 %v1139_v33  ;;  %vm1258_vm9 = vcmp.lt.s32.totalorder %v1256_v32, 40 }
 0x19e   : > { %v973_v34 = vmul.f32 %v1444_v62, %v961_v14  ;;  %1520 = vmatpush3.msra.mxu1 %v1139_v33  ;;  %v1452_v14 = vld [vmem:[%s2289_s15] ss:$0 sm:$0xff] }
 0x1a0   : > { %v1630_v38 = vpop.eup %1629  ;;  %v985_v43 = vadd.f32 %v1445_v8, %v973_v34 }
 0x1a1   : > { %v962_v44 = vmul.f32 %v1630_v38, %v2114_v45  ;;  %v1138_v45 = vld [vmem:[%s2264_s9 + $0x58] sm:$0xff] }
 0x1a2   : > { %v999_v35 = vrot.slane %v985_v43, 5  ;;  %1521 = vmatprep.subr.mxu1 %v1138_v45  ;;  %v1255_v43 = vadd.s32 %v1254_v29, %v1886_v9 }
 0x1a3   : > { %v974_v36 = vmul.f32 %v1444_v62, %v962_v44  ;;  %1522 = vmatpush3.msra.mxu1 %v1138_v45 }
 0x1a4   : > { %v1000_v46 = vsel %vm817_vm1, %v998_v1, %v999_v35  ;;  %1523 = vmatprep.subr.mxu1 %v1137_v41  ;;  %vm1257_vm10 = vcmp.lt.s32.totalorder %v1255_v43, 40 }
 0x1a5   : > { %1510 = vmatprep.mubr.msk.f32.mxu0 %vm885_vm8, %v1000_v46  ;;  %v986_v47 = vadd.f32 %v1445_v8, %v974_v36  ;;  %1524 = vmatpush3.msra.mxu1 %v1137_v41 }
 0x1a6   : > { %1525 = vmatprep.subr.mxu1 %v1136_v42 }
 0x1a7   : > { %v1001_v39 = vrot.slane %v986_v47, 5  ;;  %1526 = vmatpush3.msra.mxu1 %v1136_v42 }
 0x1a8   : > { %1527 = vmatprep.subr.mxu1 %v1135_v48 }
 0x1a9   : > { %v1002_v40 = vsel %vm817_vm1, %v999_v35, %v1001_v39  ;;  %1528 = vmatpush3.msra.mxu1 %v1135_v48 }
 0x1aa   : > { %1511 = vmatmul.mubr.msk.f32.gmra.mxu0 %vm885_vm8, %v1002_v40  ;;  %1529 = vmatprep.subr.mxu1 %v1134_v49 }
 0x1ab   : > { %1530 = vmatpush3.msra.mxu1 %v1134_v49 }
 0x1ac   : > { %1531 = vmatprep.subr.mxu1 %v1133_v50 }
 0x1ad   : > { %1532 = vmatpush3.msra.mxu1 %v1133_v50 }
 0x1ae   : > { %1533 = vmatprep.subr.mxu1 %v1132_v51 }
 0x1af   : > { %1534 = vmatpush3.msra.mxu1 %v1132_v51 }
 0x1b0   : > { %1535 = vmatprep.subr.mxu1 %v1131_v52 }
 0x1b1   : > { %1536 = vmatpush3.msra.mxu1 %v1131_v52 }
 0x1b2   : > { %1537 = vmatprep.subr.mxu1 %v1130_v53 }
 0x1b3   : > { %1538 = vmatpush3.msra.mxu1 %v1130_v53 }
 0x1b4   : > { %1539 = vmatprep.subr.mxu1 %v1129_v19 }
 0x1b5   : > { %1540 = vmatpush3.msra.mxu1 %v1129_v19 }
 0x1b6   : > { %1541 = vmatprep.subr.mxu1 %v1128_v24 }
 0x1b7   : > { %1542 = vmatpush3.msra.mxu1 %v1128_v24 }
 0x1b8   : > { %1543 = vmatprep.subr.mxu1 %v1127_v54 }
 0x1b9   : > { %1544 = vmatpush3.msra.mxu1 %v1127_v54 }
 0x25a   : > { %v1509_v55 = vpop.f32.mrf.mxu0 }
 0x25b   : > { %v1094_v56 = vadd.f32 %v1509_v55, %v1446_v25 }
 0x25c   : > { %v1088_v57 = vpop.f32.mrf.mxu0 }
 0x25d   : > { %v1112_v58 = vmul.f32 0.70710677, %v1094_v56  ;;  %v1089_v23 = vadd.f32 %v1446_v25, %v1088_v57  ;;  %v1108_v6 = vmul.f32 0.5, %v1094_v56 }
 0x25f   : > { %1631 = verf.f32 %v1112_v58  ;;  %v1111_v59 = vmul.f32 0.70710677, %v1089_v23  ;;  %v1107_v7 = vmul.f32 0.5, %v1089_v23 }
 0x261   : > { %1633 = verf.f32 %v1111_v59 }
 0x26a   : > { %v1512_v61 = vpop.f32.mrf.mxu0 }
 0x26b   : > { %v1104_v26 = vadd.f32 %v1512_v61, %v1446_v25 }
 0x26c   : > { %v1632_v62 = vpop.eup %1631  ;;  %v1098_v63 = vpop.f32.mrf.mxu0 }
 0x26d   : > { %v1114_v0 = vmul.f32 0.70710677, %v1104_v26  ;;  %v1099_v2 = vadd.f32 %v1446_v25, %v1098_v63  ;;  %v1120_v4 = vadd.f32 1.0, %v1632_v62  ;;  %v1110_v27 = vmul.f32 0.5, %v1104_v26 }
 0x26e   : > { %v1634_v3 = vpop.eup %1633 }
 0x26f   : > { %1635 = verf.f32 %v1114_v0  ;;  %v1113_v5 = vmul.f32 0.70710677, %v1099_v2  ;;  %v1119_v8 = vadd.f32 1.0, %v1634_v3  ;;  %v1124_v11 = vmul.f32 %v1120_v4, %v1108_v6 }
 0x270   : > { %v1109_v31 = vmul.f32 0.5, %v1099_v2 }
 0x271   : > { %1637 = verf.f32 %v1113_v5  ;;  %v1123_v10 = vmul.f32 %v1119_v8, %v1107_v7 }
 0x273   : > { %1545 = vmatprep.mubr.f32.mxu1 %v1123_v10 }
 0x274   : > { %1546 = vmatmul.mubr.f32.vlgmr.msra.gmra.mxu1 %v1124_v11 }
 0x27c   : > { %v1636_v13 = vpop.eup %1635 }
 0x27d   : > { %v1122_v17 = vadd.f32 1.0, %v1636_v13 }
 0x27e   : > { %v1638_v16 = vpop.eup %1637 }
 0x27f   : > { %v1121_v12 = vadd.f32 1.0, %v1638_v16  ;;  %v1126_v21 = vmul.f32 %v1122_v17, %v1110_v27 }
 0x281   : > { %v1125_v20 = vmul.f32 %v1121_v12, %v1109_v31 }
 0x283   : > { %1548 = vmatprep.mubr.f32.mxu1 %v1125_v20 }
 0x284   : > { %1549 = vmatmul.mubr.f32.gmra.mxu1 %v1126_v21 }
 0x334   : > { %v1547_v18 = vpop.f32.mrf.mxu1 }
 0x335   : > { %v1222_v34 = vadd.f32 %v1547_v18, %v1451_v22 }
 0x336   : > { %v1216_v38 = vpop.f32.mrf.mxu1 }
 0x337   : > { %v1243_v1 = vmul.f32 %v1452_v14, %v1222_v34  ;;  %v1217_v44 = vadd.f32 %v1451_v22, %v1216_v38 }
 0x339   : > { %v1247_v35 = vadd.f32 %v1243_v1, %v1904_v15  ;;  %v1242_v36 = vmul.f32 %v1452_v14, %v1217_v44 }
 0x33b   : > { %v1264_v46 = vsel %vm1258_vm9, %v1247_v35, 0.0  ;;  %v1246_v47 = vadd.f32 %v1242_v36, %v1964_v37 }
 0x33c   : > { %1268 = vst.msk [vmem:[%s597_s19 + $0x8] sm:$0xff] %vm885_vm8, %v1264_v46 }
 0x33d   : > { %v1263_v39 = vsel %vm1257_vm10, %v1246_v47, 0.0 }
 0x33e   : > { %1267 = vst.msk [vmem:[%s597_s19] sm:$0xff] %vm885_vm8, %v1263_v39 }
 0x343   : > { %v1317_v50 = vld [vmem:[%s597_s19 + $0x8] sm:$0xff] (%p1849_p0) }
 0x344   : > { %v1550_v40 = vpop.f32.mrf.mxu1  ;;  %1318 = vst [vmem:[%s1280_s14 + $0x8] sm:$0xff] (%p1849_p0), %v1317_v50 }
 0x345   : > { %v1232_v9 = vadd.f32 %v1550_v40, %v1451_v22 }
 0x346   : > { %v1226_v33 = vpop.f32.mrf.mxu1 }
 0x347   : > { %v1245_v45 = vmul.f32 %v1452_v14, %v1232_v9  ;;  %v1227_v41 = vadd.f32 %v1451_v22, %v1226_v33 }
 0x349   : > { %v1249_v15 = vadd.f32 %v1245_v45, %v2037_v60  ;;  %v1244_v42 = vmul.f32 %v1452_v14, %v1227_v41  ;;  %v1315_v60 = vld [vmem:[%s597_s19] sm:$0xff] (%p1849_p0) }
 0x34a   : > { %1277 = sbr.rel (!%p1849_p0) target bundleno = 855 (0x357), region = 186  ;;  %1316 = vst [vmem:[%s1280_s14] sm:$0xff] (%p1849_p0), %v1315_v60 }
 0x34b   : > { %v1266_v48 = vsel %vm1258_vm9, %v1249_v15, 0.0  ;;  %v1248_v49 = vadd.f32 %v1244_v42, %v2011_v30 }
 0x34c   : > { %1270 = vst.msk [vmem:[%s597_s19 + $0x18] sm:$0xff] %vm885_vm8, %v1266_v48 }
 0x34d   : > { %v1265_v37 = vsel %vm1257_vm10, %v1248_v49, 0.0 }
 0x34e   : > { %1269 = vst.msk [vmem:[%s597_s19 + $0x10] sm:$0xff] %vm885_vm8, %v1265_v37 }
 0x353   : > { %v1321_v30 = vld [vmem:[%s597_s19 + $0x18] sm:$0xff] }
 0x354   : > { %1322 = vst [vmem:[%s1280_s14 + $0x38] sm:$0xff] %v1321_v30 }
 0x355   : > { %v1319_v51 = vld [vmem:[%s597_s19 + $0x10] sm:$0xff] }
 0x356   : > { %1320 = vst [vmem:[%s1280_s14 + $0x30] sm:$0xff] %v1319_v51 }
 0x357 PF: > { %s2292_s27 = sld [smem:[#allocation7_spill]]  ;;  %s2296_s21 = smov %s1673_s22 }
 0x358   : > { %s2293_s29 = sld [smem:[#allocation9_spill]]  ;;  %s2297_s22 = smov %s1856_s28 }
 0x359   : > { %s2294_s25 = sld [smem:[#allocation6_spill]]  ;;  %s2298_s23 = smov %s1681_s24 }
 0x35a   : > { %s2295_s26 = sld [smem:[#allocation8_spill]] }
 0x35d   : > { %p19_p8 = scmp.ge.s32.totalorder %s2292_s27, 5  }
 0x35e   : > { %s2299_s24 = smov %s2293_s29 }
 0x35f   :  { %21 = sbr.rel (!%p19_p8) target bundleno = 10 (0xa), region = 271 }

// kernel: convnext_encoder_forward.8
= control target key start
LH: loop header
LB: loop body
LE: loop exit
PB: predicated region body
PF: predicated region fallthrough
CT: control target
= control target key end

     0   :  { %s2400_s0 = inlined_call_operand.vmem [shape: f32[2,48,64], index: 0, kind: input, shape index: {}, may-alias: {0,1,2}]   ;;  %s2401_s1 = inlined_call_operand.vmem [shape: f32[2,48,64], index: 1, kind: input, shape index: {}, may-alias: {0,1,2}]   ;;  %s2402_s2 = inlined_call_operand.vmem [shape: f32[2,48,64], index: 2, kind: input, shape index: {}, may-alias: {0,1,2}]   ;;  %s2403_s3 = inlined_call_operand.vmem [shape: f32[7,64], index: 3, kind: input, shape index: {}]   ;;  %s2404_s4 = inlined_call_operand.vmem [shape: f32[1,64], index: 4, kind: input, shape index: {}]   ;;  %s2405_s5 = inlined_call_operand.vmem [shape: f32[1,64], index: 5, kind: input, shape index: {}]   ;;  %s2406_s6 = inlined_call_operand.vmem [shape: f32[1,64], index: 6, kind: input, shape index: {}]   ;;  %s2407_s7 = inlined_call_operand.vmem [shape: f32[64,256], index: 7, kind: input, shape index: {}]   ;;  %s2408_s8 = inlined_call_operand.vmem [shape: f32[1,256], index: 8, kind: input, shape index: {}]   ;;  %s2409_s9 = inlined_call_operand.vmem [shape: f32[256,64], index: 9, kind: input, shape index: {}]   ;;  %s2410_s10 = inlined_call_operand.vmem [shape: f32[1,64], index: 10, kind: input, shape index: {}]   ;;  %s2411_s11 = inlined_call_operand.vmem [shape: f32[1,64], index: 11, kind: input, shape index: {}]   ;;  %s2412_s12 = inlined_call_operand.vmem [shape: f32[2,48,64], index: 12, kind: output, shape index: {}]  }
   0x1   :  { %2417 = sst [smem:[#allocation11_spill]] %s2406_s6 }
   0x2   :  { %2418 = sst [smem:[#allocation12_spill]] %s2408_s8 }
   0x3   :  { %2419 = sst [smem:[#allocation13_spill]] %s2410_s10 }
   0x4   :  { %2420 = sst [smem:[#allocation14_spill]] %s2411_s11 }
   0x5   :  { %2421 = sst [smem:[#allocation15_spill]] %s2412_s12 }
   0x6   :  { %s1790_s21 = smov 0   ;;  %s1792_s22 = smov 0  }
   0x7   :  { %s1794_s23 = smov 0   ;;  %s1796_s24 = smov 0  }
   0x8   :  { %s1798_s25 = smov 0   ;;  %s1800_s26 = smov 0  }
   0x9   :  { %s1802_s27 = smov 0  }
   0xa LB: > { %2422 = sst [smem:[#allocation6_spill]] %s1718_s26  ;;  %s1826_s28 = sadd.s32 1, %s1722_s27   ;;  %s1722_s27 = sphi %s1802_s27, %s2437_s27   ;;  %s1718_s26 = sphi %s1800_s26, %s2440_s26   ;;  %s1714_s25 = sphi %s1798_s25, %s2439_s25   ;;  %s1710_s24 = sphi %s1796_s24, %s2444_s24   ;;  %s1706_s23 = sphi %s1794_s23, %s2443_s23   ;;  %s1702_s22 = sphi %s1792_s22, %s2442_s22   ;;  %s1698_s21 = sphi %s1790_s21, %s2441_s21  }
   0xb   : > { %2423 = sst [smem:[#allocation7_spill]] %s1826_s28  ;;  %s1477_s29 = sshll.u32 %s1722_s27, 1 }
   0xc   : > { %s37_s30 = sadd.s32 1, %s1718_s26  ;;  %s1478_s13 = sadd.s32 4294967295, %s1477_s29 }
   0xd   : > { %s1516_s14 = sadd.s32 2, %s1477_s29  ;;  %p28_p0 = scmp.gt.s32.totalorder %s1478_s13, 0 }
   0xe   : > { %s1480_s15 = sadd.s32 4294967295, %s1516_s14  ;;  %p44_p2 = scmp.ne.s32.totalorder %s1718_s26, %s1714_s25 }
   0xf   : > { %p32_p1 = scmp.gt.s32.totalorder %s1480_s15, 0  ;;  %s2446_s13 = smov (!%p28_p0, %s1478_s13), 0 }
  0x10   : > { %p45_p3 = scmp.eq.s32.totalorder %s1722_s27, 0  ;;  %s60_s16 = ssub.s32 %s1722_s27, %s1826_s28 }
  0x11   : > { %s2448_s15 = smov (!%p32_p1, %s1480_s15), 0  ;;  %p61_p4 = scmp.eq.s32.totalorder %s60_s16, 0 }
  0x12   : > { %s34_s17 = ssub.s32 %s2446_s13, %s2448_s15  ;;  %p1840_p6 = por %p45_p3, %p44_p2 }
  0x13   : > { %p35_p5 = scmp.eq.s32.totalorder %s34_s17, 0  ;;  %s63_s19 = sadd.s32 1, %s1710_s24 }
  0x14   : > { %p70_p7 = scmp.ne.s32.totalorder %s1710_s24, %s1706_s23  ;;  %p88_p9 = scmp.lt.s32.totalorder %s1516_s14, 5 }
  0x15   : > { %s1848_s20 = scalar_select %p35_p5, %s1718_s26, %s37_s30  }
  0x16   : > { %s1851_s29 = scalar_select %p61_p4, %s1710_s24, %s63_s19  }
  0x17   : > { %2425 = sst [smem:[#allocation8_spill]] %s1848_s20  ;;  %p1858_p8 = por %p70_p7, %p45_p3 }
  0x18   : > { %2426 = sst [smem:[#allocation9_spill]] %s1851_s29  ;;  %s1863_s16 = sadd.s32 4294967295, %s1722_s27  }
  0x19   : > { %s1520_s17 = sadd.s32 2, %s1516_s14  ;;  %s2450_s14 = smov (!%p88_p9, %s1516_s14), 5 }
  0x1a   : > { %p92_p10 = scmp.lt.s32.totalorder %s1520_s17, 5  ;;  %p104_p11 = scmp.ne.s32.totalorder %s1702_s22, %s1698_s21 }
  0x1b   : > { %p323_p12 = scmp.eq.s32.totalorder %s1863_s16, 2  ;;  %s97_s29 = sadd.s32 1, %s1702_s22 }
  0x1c   : > { %s2452_s17 = smov (!%p92_p10, %s1520_s17), 5  ;;  %p1872_p13 = por %p104_p11, %p45_p3 }
  0x1d   : > { %p1879_p0 = por %p323_p12, %p70_p7  ;;  %s94_s20 = ssub.s32 %s2450_s14, %s2452_s17 }
  0x1e   : > { %p95_p1 = scmp.eq.s32.totalorder %s94_s20, 0  ;;  %p1484_p2 = scmp.ge.s32.totalorder %s1722_s27, 3 }
  0x1f   : > { %s2429_s19 = scalar_select %p1879_p0, 1, 0 }
  0x20   : > { %s1886_s28 = scalar_select %p95_p1, %s1702_s22, %s97_s29  }
  0x21   : > { %2430 = sst [smem:[#allocation10_spill]] %s2429_s19  ;;  %372 = sbr.rel (%p1484_p2) target bundleno = 54 (0x36), region = 52 }
  0x26   : > { %375 = sbr.rel (!%p1840_p6) target bundleno = 43 (0x2b), region = 56  ;;  %s377_s12 = sand.u32 (%p1840_p6), 1, %s1718_s26  }
  0x27   : > { %s1488_s11 = sshll.u32 (%p1840_p6), %s2446_s13, 3  ;;  %s1485_s10 = sshll.u32 (%p1840_p6), %s377_s12, 4 }
  0x28   : > { %s385_s19 = scalar_lea.vmem (%p1840_p6), %s2400_s0, %s1488_s11  ;;  %s379_s20 = scalar_lea.vmem (%p1840_p6), [#allocation2], %s1485_s10 }
  0x29   : > { %v416_v0 = vld [vmem:[%s385_s19] sm:$0xff] (%p1840_p6)  ;;  %v418_v1 = vld [vmem:[%s385_s19 + $0x30] sm:$0xff] (%p1840_p6) }
  0x2a   : > { %417 = vst [vmem:[%s379_s20] sm:$0xff] (%p1840_p6), %v416_v0  ;;  %419 = vst [vmem:[%s379_s20 + $0x8] sm:$0xff] (%p1840_p6), %v418_v1 }
  0x2b PF: > { %425 = sbr.rel (!%p1858_p8) target bundleno = 49 (0x31), region = 94  ;;  %s427_s18 = sand.u32 (%p1858_p8), 1, %s1710_s24  }
  0x2c   : > { %s1521_s29 = sshll.u32 (%p1858_p8), %s1722_s27, 4  ;;  %s1489_s17 = sshll.u32 (%p1858_p8), %s427_s18, 5 }
  0x2d   : > { %s432_s26 = scalar_lea.vmem (%p1858_p8), %s2401_s1, %s1521_s29  ;;  %s429_s6 = scalar_lea.vmem (%p1858_p8), [#allocation3], %s1489_s17 }
  0x2e   : > { %v467_v2 = vld [vmem:[%s432_s26] sm:$0xff] (%p1858_p8)  ;;  %v469_v3 = vld [vmem:[%s432_s26 + $0x8] sm:$0xff] (%p1858_p8)  ;;  %v471_v4 = vld [vmem:[%s432_s26 + $0x30] sm:$0xff] (%p1858_p8) }
  0x2f   : > { %468 = vst [vmem:[%s429_s6] sm:$0xff] (%p1858_p8), %v467_v2  ;;  %470 = vst [vmem:[%s429_s6 + $0x8] sm:$0xff] (%p1858_p8), %v469_v3  ;;  %v473_v5 = vld [vmem:[%s432_s26 + $0x38] sm:$0xff] (%p1858_p8) }
  0x30   : > { %472 = vst [vmem:[%s429_s6 + $0x10] sm:$0xff] %v471_v4  ;;  %474 = vst [vmem:[%s429_s6 + $0x18] sm:$0xff] %v473_v5 }
  0x31 PF: > { %480 = sbr.rel (!%p1872_p13) target bundleno = 54 (0x36), region = 132  ;;  %s482_s8 = sand.u32 (%p1872_p13), 1, %s1702_s22  }
  0x32   : > { %s1494_s10 = sshll.u32 (%p1872_p13), %s2450_s14, 3  ;;  %s1492_s11 = sshll.u32 (%p1872_p13), %s482_s8, 4 }
  0x33   : > { %s490_s20 = scalar_lea.vmem (%p1872_p13), %s2402_s2, %s1494_s10  ;;  %s484_s18 = scalar_lea.vmem (%p1872_p13), [#allocation4], %s1492_s11 }
  0x34   : > { %v521_v6 = vld [vmem:[%s490_s20] sm:$0xff] (%p1872_p13)  ;;  %v523_v7 = vld [vmem:[%s490_s20 + $0x30] sm:$0xff] (%p1872_p13) }
  0x35   : > { %522 = vst [vmem:[%s484_s18] sm:$0xff] (%p1872_p13), %v521_v6  ;;  %524 = vst [vmem:[%s484_s18 + $0x8] sm:$0xff] (%p1872_p13), %v523_v7 }
  0x36 PF: > { %p1495_p3 = scmp.ge.s32.totalorder %s1722_s27, 1  ;;  %p529_p4 = scmp.lt.s32.totalorder %s1722_s27, 4 }
  0x38   : > { %p530_p5 = pnand %p1495_p3, %p529_p4 }
  0x39   : > { %s536_s26 = sand.u32 (!%p530_p5), 1, %s1714_s25   ;;  %s543_s14 = sand.u32 (!%p530_p5), 1, %s1706_s23  }
  0x3a   : > { %533 = sbr.rel (%p530_p5) target bundleno = 857 (0x359), region = 170  ;;  %s1914_s30 = sshll.u32 (!%p530_p5), %s543_s14, 5 }
  0x3b   : > { %s1918_s29 = sshll.u32 (!%p530_p5), %s536_s26, 4  ;;  %p612_p6 = scmp.gt.s32.totalorder (!%p530_p5), %s1863_s16, 0 }
  0x3c   : > { %s550_s23 = sand.u32 (!%p530_p5), 1, %s1698_s21   ;;  %p620_p7 = scmp.lt.s32.totalorder (!%p530_p5), %s1863_s16, 2 }
  0x3d   : > { %s1931_s25 = scalar_lea.vmem (!%p530_p5), [#allocation3], %s1914_s30  ;;  %s1960_s21 = sshll.u32 (!%p530_p5), %s550_s23, 4 }
  0x3e   : > { %s538_s8 = scalar_lea.vmem (!%p530_p5), [#allocation2], %s1918_s29  ;;  %s552_s11 = scalar_lea.vmem (!%p530_p5), [#allocation4], %s1960_s21 }
  0x3f   : > { %v637_v8 = vlaneseq  ;;  %v628_v10 = vld [vmem:[%s2403_s3] sm:$0x7f]  ;;  %vm669_vm0 = vcmask 1046528   ;;  %vm708_vm1 = vcmask 1045504   ;;  %v1952_v23 = vld [vmem:[%s1931_s25 + $0x8] sm:$0xff]  ;;  %vm778_vm2 = vcmask 1043456  }
  0x40   : > { %v1934_v15 = vld [vmem:[%s1931_s25] sm:$0xff]  ;;  %s1974_s13 = scalar_select %p612_p6, 255, 0  ;;  %vm817_vm3 = vcmask 1042432   ;;  %vm743_vm4 = vcmask 1044480   ;;  %vm856_vm5 = vcmask 1041408  }
  0x41   : > { %v1916_v9 = vshrl.u32 %v637_v8, 7  ;;  %v1979_v30 = vld [vmem:[%s2404_s4] ss:$0 sm:$0xff]  ;;  %s2009_s10 = scalar_select %p620_p7, 255, 0  ;;  %vm881_vm6 = vcmask 523269  }
  0x42   : > { %v1630_v38 = vld [vmem:[%s538_s8] sm:%s1974_s13]  ;;  %vm889_vm7 = vcmask 520192   ;;  %vm885_vm8 = vcmask 523264   ;;  %s2432_s12 = sld [smem:[#allocation12_spill]]  ;;  %s1509_s6 = sshll.u32 %s1863_s16, 4 }
  0x43   : > { %v639_v11 = vsub.s32 0, %v1916_v9  ;;  %v655_v12 = vsub.s32 1, %v1916_v9  ;;  %v694_v13 = vsub.s32 2, %v1916_v9  ;;  %v733_v14 = vsub.s32 3, %v1916_v9  ;;  %v1633_v53 = vld [vmem:[%s552_s11] sm:%s2009_s10]  ;;  %s2434_s20 = sld [smem:[#allocation14_spill]] }
  0x44   : > { %v764_v16 = vsub.s32 4, %v1916_v9  ;;  %v803_v17 = vsub.s32 5, %v1916_v9  ;;  %v842_v18 = vsub.s32 6, %v1916_v9  ;;  %s2351_s18 = scalar_lea.vmem [#allocation5], %s1914_s30  ;;  %s2436_s29 = sld [smem:[#allocation15_spill]] (%p1879_p0) }
  0x45   : > { %v1941_v19 = vrot.slane %v628_v10, %v639_v11  ;;  %v1945_v20 = vrot.slane %v628_v10, %v655_v12  ;;  %v1947_v21 = vrot.slane %v628_v10, %v694_v13  ;;  %v1949_v22 = vrot.slane %v628_v10, %v733_v14 }
  0x46   : > { %v1954_v24 = vrot.slane %v628_v10, %v764_v16  ;;  %v1956_v25 = vrot.slane %v628_v10, %v803_v17  ;;  %v1958_v26 = vrot.slane %v628_v10, %v842_v18 }
  0x47   : > { %v658_v27 = vmul.f32 %v1945_v20, %v1934_v15  ;;  %v1966_v28 = vmul.f32 %v1947_v21, %v1934_v15  ;;  %v1970_v29 = vmul.f32 %v1949_v22, %v1934_v15  ;;  %v643_v34 = vmul.f32 %v1941_v19, %v1952_v23 }
  0x48   : > { %v1983_v31 = vmul.f32 %v1954_v24, %v1934_v15  ;;  %v1987_v32 = vmul.f32 %v1956_v25, %v1934_v15  ;;  %v1991_v33 = vmul.f32 %v1958_v26, %v1934_v15  ;;  %v641_v42 = vmul.f32 %v1630_v38, %v1941_v19 }
  0x49   : > { %v671_v35 = vrot.slane %v658_v27, 1  ;;  %v710_v36 = vrot.slane %v1966_v28, 2  ;;  %v744_v37 = vrot.slane %v1970_v29, 3  ;;  %v657_v43 = vmul.f32 %v1630_v38, %v1945_v20  ;;  %v1636_v27 = vld [vmem:[%s538_s8 + $0x8] sm:%s1974_s13]  ;;  %s2431_s13 = sld [smem:[#allocation11_spill]] }
  0x4a   : > { %v779_v39 = vrot.slane %v1983_v31, 4  ;;  %v818_v40 = vrot.slane %v1987_v32, 5  ;;  %v857_v41 = vrot.slane %v1991_v33, 6  ;;  %v696_v44 = vmul.f32 %v1630_v38, %v1947_v21  ;;  %v2046_v38 = vld [vmem:[%s1931_s25 + $0x10] sm:$0xff]  ;;  %s1337_s17 = scalar_lea.vmem (%p1879_p0), %s2436_s29, %s1509_s6 }
  0x4b   : > { %v649_v45 = vadd.f32 %v1979_v30, %v643_v34  ;;  %v659_v46 = vmul.f32 %v1945_v20, %v1952_v23  ;;  %v698_v47 = vmul.f32 %v1947_v21, %v1952_v23  ;;  %v736_v48 = vmul.f32 %v1949_v22, %v1952_v23 }
  0x4c   : > { %v767_v49 = vmul.f32 %v1954_v24, %v1952_v23  ;;  %v647_v50 = vadd.f32 %v1979_v30, %v641_v42  ;;  %v670_v51 = vrot.slane %v657_v43, 1  ;;  %v709_v52 = vrot.slane %v696_v44, 2 }
  0x4d   : > { %v806_v54 = vmul.f32 %v1956_v25, %v1952_v23  ;;  %v673_v55 = vrot.slane %v659_v46, 1  ;;  %v712_v56 = vrot.slane %v698_v47, 2  ;;  %v745_v57 = vrot.slane %v736_v48, 3 }
  0x4e   : > { %v768_v58 = vmul.f32 %v1633_v53, %v1954_v24  ;;  %v672_v59 = vsel %vm669_vm0, %v670_v51, %v671_v35  ;;  %v711_v60 = vsel %vm708_vm1, %v709_v52, %v710_v36  ;;  %v780_v61 = vrot.slane %v767_v49, 4 }
  0x4f   : > { %v807_v62 = vmul.f32 %v1633_v53, %v1956_v25  ;;  %v686_v63 = vadd.f32 %v672_v59, %v647_v50  ;;  %v688_v0 = vadd.f32 %v673_v55, %v649_v45  ;;  %v819_v2 = vrot.slane %v806_v54, 5 }
  0x50   : > { %v782_v1 = vrot.slane %v768_v58, 4  ;;  %v845_v4 = vmul.f32 %v1958_v26, %v1952_v23  ;;  %v846_v5 = vmul.f32 %v1633_v53, %v1958_v26  ;;  %v642_v6 = vmul.f32 %v1941_v19, %v1934_v15 }
  0x51   : > { %v821_v3 = vrot.slane %v807_v62, 5  ;;  %v725_v7 = vadd.f32 %v711_v60, %v686_v63  ;;  %v727_v8 = vadd.f32 %v712_v56, %v688_v0  ;;  %v674_v13 = vsel %vm669_vm0, %v671_v35, %v673_v55  ;;  %v2080_v0 = vld [vmem:[%s1931_s25 + $0x18] sm:$0xff] }
  0x52   : > { %v783_v10 = vsel %vm778_vm2, %v780_v61, %v782_v1  ;;  %v858_v16 = vrot.slane %v845_v4, 6  ;;  %v860_v17 = vrot.slane %v846_v5, 6  ;;  %v648_v18 = vadd.f32 %v1979_v30, %v642_v6 }
  0x53   : > { %v822_v14 = vsel %vm817_vm3, %v819_v2, %v821_v3  ;;  %v756_v28 = vadd.f32 %v744_v37, %v725_v7  ;;  %v758_v29 = vadd.f32 %v745_v57, %v727_v8  ;;  %v713_v31 = vsel %vm708_vm1, %v710_v36, %v712_v56 }
  0x54   : > { %v746_v34 = vsel %vm743_vm4, %v744_v37, %v745_v57  ;;  %v861_v42 = vsel %vm856_vm5, %v858_v16, %v860_v17  ;;  %v687_v43 = vadd.f32 %v674_v13, %v648_v18  ;;  %v781_v35 = vsel %vm778_vm2, %v779_v39, %v780_v61 }
  0x55   : > { %v820_v44 = vsel %vm817_vm3, %v818_v40, %v819_v2  ;;  %v795_v45 = vadd.f32 %v779_v39, %v756_v28  ;;  %v797_v46 = vadd.f32 %v783_v10, %v758_v29  ;;  %v859_v47 = vsel %vm856_vm5, %v857_v41, %v858_v16 }
  0x56   : > { %v644_v36 = vmul.f32 %v1636_v27, %v1941_v19  ;;  %v726_v37 = vadd.f32 %v713_v31, %v687_v43  ;;  %v660_v48 = vmul.f32 %v1636_v27, %v1945_v20  ;;  %v661_v49 = vmul.f32 %v1945_v20, %v2046_v38 }
  0x57   : > { %v699_v50 = vmul.f32 %v1636_v27, %v1947_v21  ;;  %v834_v51 = vadd.f32 %v818_v40, %v795_v45  ;;  %v836_v39 = vadd.f32 %v822_v14, %v797_v46  ;;  %v700_v53 = vmul.f32 %v1947_v21, %v2046_v38  ;;  %v1639_v45 = vld [vmem:[%s552_s11 + $0x8] sm:%s2009_s10]  ;;  %s2433_s11 = sld [smem:[#allocation13_spill]] }
  0x58   : > { %v650_v52 = vadd.f32 %v1979_v30, %v644_v36  ;;  %v757_v54 = vadd.f32 %v746_v34, %v726_v37  ;;  %v675_v55 = vrot.slane %v660_v48, 1  ;;  %v676_v56 = vrot.slane %v661_v49, 1 }
  0x59   : > { %v714_v57 = vrot.slane %v699_v50, 2  ;;  %v2068_v58 = vadd.f32 %v857_v41, %v834_v51  ;;  %v2070_v59 = vadd.f32 %v861_v42, %v836_v39  ;;  %v715_v60 = vrot.slane %v700_v53, 2 }
  0x5a   : > { %v737_v32 = vmul.f32 %v1949_v22, %v2046_v38  ;;  %v796_v40 = vadd.f32 %v781_v35, %v757_v54  ;;  %v677_v61 = vsel %vm669_vm0, %v675_v55, %v676_v56  ;;  %v769_v62 = vmul.f32 %v1954_v24, %v2046_v38 }
  0x5b   : > { %v808_v63 = vmul.f32 %v1956_v25, %v2046_v38  ;;  %v882_v33 = vsel %vm881_vm6, %v2068_v58, 0.0  ;;  %v890_v41 = vsel %vm889_vm7, %v2070_v59, 0.0  ;;  %v689_v1 = vadd.f32 %v677_v61, %v650_v52 }
  0x5c   : > { %v716_v2 = vsel %vm708_vm1, %v714_v57, %v715_v60  ;;  %883 = vadd.xlane.f32.xlu0 %v882_v33  ;;  %891 = vadd.xlane.f32.xlu1 %v890_v41  ;;  %v835_v3 = vadd.f32 %v820_v44, %v796_v40  ;;  %v747_v4 = vrot.slane %v737_v32, 3  ;;  %v784_v5 = vrot.slane %v769_v62, 4 }
  0x5d   : > { %v823_v6 = vrot.slane %v808_v63, 5  ;;  %v728_v7 = vadd.f32 %v716_v2, %v689_v1  ;;  %v847_v8 = vmul.f32 %v1958_v26, %v2046_v38  ;;  %v645_v10 = vmul.f32 %v1941_v19, %v2046_v38 }
  0x5e   : > { %v662_v13 = vmul.f32 %v1945_v20, %v2080_v0  ;;  %v2093_v14 = vadd.f32 %v859_v47, %v835_v3  ;;  %v701_v16 = vmul.f32 %v1947_v21, %v2080_v0  ;;  %v738_v17 = vmul.f32 %v1949_v22, %v2080_v0 }
  0x5f   : > { %v770_v18 = vmul.f32 %v1954_v24, %v2080_v0  ;;  %v759_v27 = vadd.f32 %v747_v4, %v728_v7  ;;  %v862_v28 = vrot.slane %v847_v8, 6  ;;  %v651_v29 = vadd.f32 %v1979_v30, %v645_v10 }
  0x60   : > { %v678_v31 = vrot.slane %v662_v13, 1  ;;  %v886_v20 = vsel %vm885_vm8, %v2093_v14, 0.0  ;;  %v717_v34 = vrot.slane %v701_v16, 2  ;;  %v748_v42 = vrot.slane %v738_v17, 3 }
  0x61   : > { %v785_v43 = vrot.slane %v770_v18, 4  ;;  %887 = vadd.xlane.f32.xlu0 %v886_v20  ;;  %v798_v21 = vadd.f32 %v784_v5, %v759_v27  ;;  %v809_v22 = vmul.f32 %v1956_v25, %v2080_v0  ;;  %v848_v44 = vmul.f32 %v1958_v26, %v2080_v0 }
  0x62   : > { %v679_v35 = vsel %vm669_vm0, %v676_v56, %v678_v31  ;;  %v718_v47 = vsel %vm708_vm1, %v715_v60, %v717_v34  ;;  %v749_v37 = vsel %vm743_vm4, %v747_v4, %v748_v42  ;;  %v646_v49 = vmul.f32 %v1941_v19, %v2080_v0 }
  0x63   : > { %v690_v46 = vadd.f32 %v679_v35, %v651_v29  ;;  %v837_v36 = vadd.f32 %v823_v6, %v798_v21  ;;  %v824_v48 = vrot.slane %v809_v22, 5  ;;  %v771_v51 = vmul.f32 %v1639_v45, %v1954_v24 }
  0x64   : > { %v810_v39 = vmul.f32 %v1639_v45, %v1956_v25  ;;  %v786_v53 = vsel %vm778_vm2, %v784_v5, %v785_v43  ;;  %v863_v54 = vrot.slane %v848_v44, 6  ;;  %v652_v55 = vadd.f32 %v1979_v30, %v646_v49 }
  0x65   : > { %v729_v50 = vadd.f32 %v718_v47, %v690_v46  ;;  %v876_v52 = vadd.f32 %v862_v28, %v837_v36  ;;  %v787_v57 = vrot.slane %v771_v51, 4  ;;  %v849_v60 = vmul.f32 %v1639_v45, %v1958_v26 }
  0x66   : > { %v825_v40 = vsel %vm817_vm3, %v823_v6, %v824_v48  ;;  %v691_v19 = vadd.f32 %v678_v31, %v652_v55  ;;  %v826_v24 = vrot.slane %v810_v39, 5  ;;  %v864_v25 = vsel %vm856_vm5, %v862_v28, %v863_v54  ;;  %v1018_v39 = vld [vmem:[%s2407_s7 + $0x78] sm:$0xff] }
  0x67   : > { %v760_v56 = vadd.f32 %v749_v37, %v729_v50  ;;  %v893_v32 = vsel %vm881_vm6, %v876_v52, 0.0  ;;  %v788_v33 = vsel %vm778_vm2, %v785_v43, %v787_v57  ;;  %v865_v41 = vrot.slane %v849_v60, 6  ;;  %1055 = vmatprep.subr.mxu0 %v1018_v39  ;;  %v1014_v55 = vld [vmem:[%s2407_s7 + $0x58] sm:$0xff]  ;;  %v1012_v60 = vld [vmem:[%s2407_s7 + $0x48] sm:$0xff] }
  0x68   : > { %894 = vadd.xlane.f32.xlu1 %v893_v32  ;;  %v730_v62 = vadd.f32 %v717_v34, %v691_v19  ;;  %v827_v2 = vsel %vm817_vm3, %v824_v48, %v826_v24  ;;  %v1724_v57 = vmov 0.0   ;;  %v1011_v32 = vld [vmem:[%s2407_s7 + $0x40] sm:$0xff]  ;;  %v1009_v19 = vld [vmem:[%s2407_s7 + $0x30] sm:$0xff] }
  0x69   : > { %v799_v61 = vadd.f32 %v786_v53, %v760_v56  ;;  %v866_v4 = vsel %vm856_vm5, %v863_v54, %v865_v41  ;;  %v1016_v53 = vld [vmem:[%s2407_s7 + $0x68] sm:$0xff]  ;;  %v1015_v54 = vld [vmem:[%s2407_s7 + $0x60] sm:$0xff]  ;;  %v1013_v56 = vld [vmem:[%s2407_s7 + $0x50] sm:$0xff]  ;;  %1103 = vmatprep.mubr.f32.mxu0 %v1724_v57 }
  0x6a   : > { %v761_v30 = vadd.f32 %v748_v42, %v730_v62  ;;  %v1007_v24 = vld [vmem:[%s2407_s7 + $0x20] sm:$0xff]  ;;  %v1005_v62 = vld [vmem:[%s2407_s7 + $0x10] sm:$0xff]  ;;  %v1199_v41 = vld [vmem:[%s2409_s9 + $0xf8] sm:$0xff] }
  0x6b   : > { %v838_v63 = vadd.f32 %v825_v40, %v799_v61  ;;  %v1010_v40 = vld [vmem:[%s2407_s7 + $0x38] sm:$0xff]  ;;  %v1008_v61 = vld [vmem:[%s2407_s7 + $0x28] sm:$0xff]  ;;  %1527 = vmatprep.subr.mxu1 %v1199_v41 }
  0x6c   : > { %v800_v26 = vadd.f32 %v788_v33, %v761_v30  ;;  %v1003_v33 = vld [vmem:[%s2407_s7] sm:$0xff]  ;;  %v1183_v30 = vld [vmem:[%s2409_s9 + $0x78] sm:$0xff] }
  0x6d   : > { %v877_v1 = vadd.f32 %v864_v25, %v838_v63  ;;  %v1006_v25 = vld [vmem:[%s2407_s7 + $0x18] sm:$0xff]  ;;  %v1004_v63 = vld [vmem:[%s2407_s7 + $0x8] sm:$0xff]  ;;  %1528 = vmatpush3.msra.mxu1 %v1183_v30 }
  0x6e   : > { %v839_v5 = vadd.f32 %v827_v2, %v800_v26  ;;  %v1182_v2 = vld [vmem:[%s2409_s9 + $0x70] sm:$0xff]  ;;  %v1197_v26 = vld [vmem:[%s2409_s9 + $0xe8] sm:$0xff] }
  0x6f   : > { %v896_v3 = vsel %vm885_vm8, %v877_v1, 0.0 }
  0x70   : > { %897 = vadd.xlane.f32.xlu0 %v896_v3  ;;  %v878_v6 = vadd.f32 %v866_v4, %v839_v5  ;;  %v1181_v3 = vld [vmem:[%s2409_s9 + $0x68] sm:$0xff] }
  0x72   : > { %v899_v7 = vsel %vm889_vm7, %v878_v6, 0.0 }
  0x73   : > { %900 = vadd.xlane.f32.xlu1 %v899_v7 }
  0xe5   : > { %v884_v8 = vpop.xlane.xlu0 %883  ;;  %v892_v10 = vpop.xlane.xlu1 %891 }
  0xe6   : > { %v903_v13 = vmul.f32 0.015625, %v884_v8  ;;  %v905_v16 = vmul.f32 0.015625, %v892_v10 }
  0xe8   : > { %v2130_v17 = vsub.f32 %v2068_v58, %v903_v13  ;;  %v2133_v18 = vsub.f32 %v2070_v59, %v905_v16 }
  0xea   : > { %v888_v27 = vpop.xlane.xlu0 %887  ;;  %v915_v28 = vmul.f32 %v2130_v17, %v2130_v17  ;;  %v917_v29 = vmul.f32 %v2133_v18, %v2133_v18 }
  0xeb   : > { %v904_v31 = vmul.f32 0.015625, %v888_v27 }
  0xec   : > { %v921_v20 = vsel %vm881_vm6, %v915_v28, 0.0  ;;  %v927_v58 = vsel %vm889_vm7, %v917_v29, 0.0 }
  0xed   : > { %v2141_v34 = vsub.f32 %v2093_v14, %v904_v31  ;;  %922 = vadd.xlane.f32.xlu0 %v921_v20 }
  0xef   : > { %v916_v59 = vmul.f32 %v2141_v34, %v2141_v34 }
  0xf1   : > { %v895_v42 = vpop.xlane.xlu1 %894  ;;  %928 = vadd.xlane.f32.xlu0 %v927_v58  ;;  %v924_v43 = vsel %vm885_vm8, %v916_v59, 0.0  ;;  %v1501_v59 = vld [vmem:[%s2405_s5] ss:$0 sm:$0xff] }
  0xf2   : > { %v906_v21 = vmul.f32 0.015625, %v895_v42  ;;  %925 = vadd.xlane.f32.xlu1 %v924_v43 }
  0xf4   : > { %v2147_v35 = vsub.f32 %v876_v52, %v906_v21  ;;  %v1017_v52 = vld [vmem:[%s2407_s7 + $0x70] sm:$0xff] }
  0xf5   : > { %1056 = vmatpush1.msra.mxu0 %v1017_v52 }
  0xf6   : > { %v918_v22 = vmul.f32 %v2147_v35, %v2147_v35  ;;  %1057 = vmatprep.subr.mxu0 %v1016_v53 }
  0xf7   : > { %1058 = vmatpush1.msra.mxu0 %v1015_v54 }
  0xf8   : > { %v930_v14 = vsel %vm881_vm6, %v918_v22, 0.0  ;;  %1059 = vmatprep.subr.mxu0 %v1014_v55 }
  0xf9   : > { %v898_v44 = vpop.xlane.xlu0 %897  ;;  %931 = vadd.xlane.f32.xlu1 %v930_v14  ;;  %1060 = vmatpush1.msra.mxu0 %v1013_v56 }
  0xfa   : > { %v907_v45 = vmul.f32 0.015625, %v898_v44  ;;  %1061 = vmatprep.subr.mxu0 %v1012_v60 }
  0xfb   : > { %1062 = vmatpush1.msra.mxu0 %v1011_v32 }
  0xfc   : > { %v2152_v46 = vsub.f32 %v877_v1, %v907_v45  ;;  %v901_v47 = vpop.xlane.xlu1 %900  ;;  %1063 = vmatprep.subr.mxu0 %v1010_v40  ;;  %v1198_v1 = vld [vmem:[%s2409_s9 + $0xf0] sm:$0xff]  ;;  %v1502_v45 = vld [vmem:[%s2431_s13] ss:$0 sm:$0xff] }
  0xfd   : > { %v908_v37 = vmul.f32 0.015625, %v901_v47  ;;  %1064 = vmatpush1.msra.mxu0 %v1009_v19  ;;  %1529 = vmatprep.subr.mxu1 %v1198_v1 }
  0xfe   : > { %v919_v36 = vmul.f32 %v2152_v46, %v2152_v46  ;;  %1065 = vmatprep.subr.mxu0 %v1008_v61  ;;  %1530 = vmatpush3.msra.mxu1 %v1182_v2 }
  0xff   : > { %v2157_v49 = vsub.f32 %v878_v6, %v908_v37  ;;  %1066 = vmatpush1.msra.mxu0 %v1007_v24  ;;  %1531 = vmatprep.subr.mxu1 %v1197_v26 }
 0x100   : > { %v933_v48 = vsel %vm885_vm8, %v919_v36, 0.0  ;;  %1067 = vmatprep.subr.mxu0 %v1006_v25  ;;  %1532 = vmatpush3.msra.mxu1 %v1181_v3 }
 0x101   : > { %934 = vadd.xlane.f32.xlu0 %v933_v48  ;;  %v920_v50 = vmul.f32 %v2157_v49, %v2157_v49  ;;  %1068 = vmatpush1.msra.mxu0 %v1005_v62 }
 0x102   : > { %1069 = vmatprep.subr.mxu0 %v1004_v63 }
 0x103   : > { %v936_v51 = vsel %vm889_vm7, %v920_v50, 0.0  ;;  %1070 = vmatpush1.msra.mxu0 %v1003_v33 }
 0x104   : > { %937 = vadd.xlane.f32.xlu1 %v936_v51 }
 0x176   : > { %v923_v4 = vpop.xlane.xlu0 %922 }
 0x177   : > { %v939_v5 = vmul.f32 0.015625, %v923_v4  ;;  %v1195_v4 = vld [vmem:[%s2409_s9 + $0xd8] sm:$0xff] }
 0x179   : > { %v945_v6 = vadd.f32 1e-06, %v939_v5  ;;  %v1194_v5 = vld [vmem:[%s2409_s9 + $0xd0] sm:$0xff] }
 0x17a   : > { %v929_v7 = vpop.xlane.xlu0 %928 }
 0x17b   : > { %1640 = vrsqrt.f32 %v945_v6  ;;  %v926_v8 = vpop.xlane.xlu1 %925  ;;  %v941_v10 = vmul.f32 0.015625, %v929_v7  ;;  %v1178_v6 = vld [vmem:[%s2409_s9 + $0x50] sm:$0xff]  ;;  %v1193_v7 = vld [vmem:[%s2409_s9 + $0xc8] sm:$0xff] }
 0x17c   : > { %v940_v13 = vmul.f32 0.015625, %v926_v8  ;;  %v1177_v8 = vld [vmem:[%s2409_s9 + $0x48] sm:$0xff] }
 0x17d   : > { %v947_v16 = vadd.f32 1e-06, %v941_v10  ;;  %v1192_v10 = vld [vmem:[%s2409_s9 + $0xc0] sm:$0xff] }
 0x17e   : > { %v946_v27 = vadd.f32 1e-06, %v940_v13  ;;  %v1176_v13 = vld [vmem:[%s2409_s9 + $0x40] sm:$0xff] }
 0x17f   : > { %1642 = vrsqrt.f32 %v947_v16  ;;  %v1191_v16 = vld [vmem:[%s2409_s9 + $0xb8] sm:$0xff] }
 0x180   : > { %1644 = vrsqrt.f32 %v946_v27  ;;  %v1175_v27 = vld [vmem:[%s2409_s9 + $0x38] sm:$0xff] }
 0x182   : > { %v932_v28 = vpop.xlane.xlu1 %931 }
 0x183   : > { %v942_v29 = vmul.f32 0.015625, %v932_v28  ;;  %v1190_v28 = vld [vmem:[%s2409_s9 + $0xb0] sm:$0xff] }
 0x185   : > { %v948_v31 = vadd.f32 1e-06, %v942_v29  ;;  %v1174_v29 = vld [vmem:[%s2409_s9 + $0x30] sm:$0xff] }
 0x187   : > { %1646 = vrsqrt.f32 %v948_v31  ;;  %v1189_v31 = vld [vmem:[%s2409_s9 + $0xa8] sm:$0xff] }
 0x188   : > { %v1641_v20 = vpop.eup %1640 }
 0x189   : > { %v957_v42 = vmul.f32 %v1641_v20, %v2130_v17  ;;  %v1173_v20 = vld [vmem:[%s2409_s9 + $0x28] sm:$0xff] }
 0x18a   : > { %v935_v58 = vpop.xlane.xlu0 %934 }
 0x18b   : > { %v943_v43 = vmul.f32 0.015625, %v935_v58  ;;  %v969_v44 = vmul.f32 %v1501_v59, %v957_v42  ;;  %v1188_v58 = vld [vmem:[%s2409_s9 + $0xa0] sm:$0xff]  ;;  %v1187_v42 = vld [vmem:[%s2409_s9 + $0x98] sm:$0xff] }
 0x18c   : > { %v1643_v21 = vpop.eup %1642 }
 0x18d   : > { %v949_v22 = vadd.f32 1e-06, %v943_v43  ;;  %v1645_v14 = vpop.eup %1644  ;;  %v959_v47 = vmul.f32 %v1643_v21, %v2133_v18  ;;  %v938_v36 = vpop.xlane.xlu1 %937  ;;  %v981_v39 = vadd.f32 %v1502_v45, %v969_v44  ;;  %v1171_v43 = vld [vmem:[%s2409_s9 + $0x18] sm:$0xff]  ;;  %v1186_v21 = vld [vmem:[%s2409_s9 + $0x90] sm:$0xff]  ;;  %v1185_v44 = vld [vmem:[%s2409_s9 + $0x88] sm:$0xff] }
 0x18e   : > { %v958_v37 = vmul.f32 %v1645_v14, %v2141_v34  ;;  %v944_v48 = vmul.f32 0.015625, %v938_v36  ;;  %v1169_v14 = vld [vmem:[%s2409_s9 + $0x8] sm:$0xff]  ;;  %v1019_v36 = vld [vmem:[%s2432_s12] sm:$0x3] }
 0x18f   : > { %1648 = vrsqrt.f32 %v949_v22  ;;  %v971_v50 = vmul.f32 %v1501_v59, %v959_v47  ;;  %v993_v55 = vrot.slane %v981_v39, 5  ;;  %v1170_v22 = vld [vmem:[%s2409_s9 + $0x10] sm:$0xff]  ;;  %v1168_v47 = vld [vmem:[%s2409_s9] sm:$0xff] }
 0x190   : > { %v970_v51 = vmul.f32 %v1501_v59, %v958_v37  ;;  %v950_v17 = vadd.f32 1e-06, %v944_v48  ;;  %v1024_v37 = vrot.slane %v1019_v36, %v639_v11  ;;  %v1028_v48 = vrot.slane %v1019_v36, %v655_v12 }
 0x191   : > { %v983_v53 = vadd.f32 %v1502_v45, %v971_v50 }
 0x192   : > { %v982_v52 = vadd.f32 %v1502_v45, %v970_v51  ;;  %1650 = vrsqrt.f32 %v950_v17 }
 0x193   : > { %v996_v18 = vrot.slane %v983_v53, 5 }
 0x194   : > { %v1647_v54 = vpop.eup %1646  ;;  %v994_v56 = vrot.slane %v982_v52, 5 }
 0x195   : > { %v960_v60 = vmul.f32 %v1647_v54, %v2147_v35 }
 0x196   : > { %v995_v32 = vsel %vm817_vm3, %v993_v55, %v994_v56  ;;  %v997_v40 = vsel %vm817_vm3, %v994_v56, %v996_v18 }
 0x197   : > { %1503 = vmatmul.mubr.msk.f32.vlgmr.msra.gmra.mxu0 %vm885_vm8, %v995_v32  ;;  %v972_v34 = vmul.f32 %v1501_v59, %v960_v60 }
 0x198   : > { %1109 = vmatprep.mubr.f32.mxu0 %v1724_v57 }
 0x199   : > { %v984_v24 = vadd.f32 %v1502_v45, %v972_v34 }
 0x19b   : > { %1504 = vmatmul.mubr.msk.f32.gmra.mxu0 %vm885_vm8, %v997_v40  ;;  %v998_v63 = vrot.slane %v984_v24, 5 }
 0x19c   : > { %v1649_v19 = vpop.eup %1648  ;;  %1115 = vmatprep.mubr.f32.mxu0 %v1724_v57 }
 0x19d   : > { %v961_v61 = vmul.f32 %v1649_v19, %v2152_v46  ;;  %v1196_v46 = vld [vmem:[%s2409_s9 + $0xe0] sm:$0xff] }
 0x19e   : > { %1533 = vmatprep.subr.mxu1 %v1196_v46 }
 0x19f   : > { %v973_v25 = vmul.f32 %v1501_v59, %v961_v61  ;;  %v1651_v35 = vpop.eup %1650 }
 0x1a0   : > { %v962_v33 = vmul.f32 %v1651_v35, %v2157_v49  ;;  %v1180_v49 = vld [vmem:[%s2409_s9 + $0x60] sm:$0xff] }
 0x1a1   : > { %v985_v62 = vadd.f32 %v1502_v45, %v973_v25  ;;  %1534 = vmatpush3.msra.mxu1 %v1180_v49 }
 0x1a2   : > { %v974_v30 = vmul.f32 %v1501_v59, %v962_v33  ;;  %1535 = vmatprep.subr.mxu1 %v1195_v4  ;;  %v1172_v59 = vld [vmem:[%s2409_s9 + $0x20] sm:$0xff] }
 0x1a3   : > { %v999_v41 = vrot.slane %v985_v62, 5 }
 0x1a4   : > { %v986_v2 = vadd.f32 %v1502_v45, %v974_v30  ;;  %v1184_v45 = vld [vmem:[%s2409_s9 + $0x80] sm:$0xff] }
 0x1a5   : > { %v1000_v1 = vsel %vm817_vm3, %v998_v63, %v999_v41 }
 0x1a6   : > { %1505 = vmatmul.mubr.msk.f32.gmra.mxu0 %vm885_vm8, %v1000_v1  ;;  %v1001_v26 = vrot.slane %v986_v2, 5 }
 0x1a7   : > { %1121 = vmatprep.mubr.f32.mxu0 %v1724_v57  ;;  %v1179_v57 = vld [vmem:[%s2409_s9 + $0x58] sm:$0xff] }
 0x1a8   : > { %v1002_v3 = vsel %vm817_vm3, %v999_v41, %v1001_v26  ;;  %1536 = vmatpush3.msra.mxu1 %v1179_v57 }
 0x1a9   : > { %1537 = vmatprep.subr.mxu1 %v1194_v5 }
 0x1aa   : > { %1506 = vmatmul.mubr.msk.f32.gmra.mxu0 %vm885_vm8, %v1002_v3  ;;  %1538 = vmatpush3.msra.mxu1 %v1178_v6 }
 0x1ab   : > { %1539 = vmatprep.subr.mxu1 %v1193_v7 }
 0x1ac   : > { %1540 = vmatpush3.msra.mxu1 %v1177_v8 }
 0x1ad   : > { %1541 = vmatprep.subr.mxu1 %v1192_v10 }
 0x1ae   : > { %1542 = vmatpush3.msra.mxu1 %v1176_v13 }
 0x1af   : > { %1543 = vmatprep.subr.mxu1 %v1191_v16 }
 0x1b0   : > { %1544 = vmatpush3.msra.mxu1 %v1175_v27 }
 0x1b1   : > { %1545 = vmatprep.subr.mxu1 %v1190_v28 }
 0x1b2   : > { %1546 = vmatpush3.msra.mxu1 %v1174_v29 }
 0x1b3   : > { %1547 = vmatprep.subr.mxu1 %v1189_v31 }
 0x1b4   : > { %1548 = vmatpush3.msra.mxu1 %v1173_v20 }
 0x1b5   : > { %1549 = vmatprep.subr.mxu1 %v1188_v58 }
 0x1b6   : > { %1550 = vmatpush3.msra.mxu1 %v1172_v59 }
 0x1b7   : > { %1551 = vmatprep.subr.mxu1 %v1187_v42 }
 0x1b8   : > { %1552 = vmatpush3.msra.mxu1 %v1171_v43 }
 0x1b9   : > { %1553 = vmatprep.subr.mxu1 %v1186_v21 }
 0x1ba   : > { %1554 = vmatpush3.msra.mxu1 %v1170_v22 }
 0x1bb   : > { %1555 = vmatprep.subr.mxu1 %v1185_v44 }
 0x1bc   : > { %1556 = vmatpush3.msra.mxu1 %v1169_v14 }
 0x1bd   : > { %1557 = vmatprep.subr.mxu1 %v1184_v45 }
 0x1be   : > { %1558 = vmatpush3.msra.mxu1 %v1168_v47 }
 0x257   : > { %v1105_v50 = vpop.f32.mrf.mxu0 }
 0x258   : > { %v1106_v51 = vadd.f32 %v1105_v50, %v1024_v37 }
 0x259   : > { %v1107_v39 = vpop.f32.mrf.mxu0 }
 0x25a   : > { %v1136_v17 = vmul.f32 0.70710677, %v1106_v51  ;;  %v1108_v52 = vadd.f32 %v1107_v39, %v1028_v48  ;;  %v1128_v2 = vmul.f32 0.5, %v1106_v51  ;;  %v1508_v39 = vld [vmem:[%s2434_s20] ss:$0 sm:$0xff] }
 0x25b   : > { %v1111_v53 = vpop.f32.mrf.mxu0 }
 0x25c   : > { %1652 = verf.f32 %v1136_v17  ;;  %v1137_v54 = vmul.f32 0.70710677, %v1108_v52  ;;  %v1112_v55 = vadd.f32 %v1111_v53, %v1024_v37  ;;  %v1129_v41 = vmul.f32 0.5, %v1108_v52 }
 0x25d   : > { %v1113_v56 = vpop.f32.mrf.mxu0  ;;  %v1310_v53 = vadd.s32 8, %v1916_v9 }
 0x25e   : > { %1654 = verf.f32 %v1137_v54  ;;  %v1138_v60 = vmul.f32 0.70710677, %v1112_v55  ;;  %v1114_v32 = vadd.f32 %v1113_v56, %v1028_v48  ;;  %v1130_v8 = vmul.f32 0.5, %v1112_v55 }
 0x260   : > { %1656 = verf.f32 %v1138_v60  ;;  %v1139_v18 = vmul.f32 0.70710677, %v1114_v32  ;;  %v1131_v6 = vmul.f32 0.5, %v1114_v32 }
 0x262   : > { %1658 = verf.f32 %v1139_v18 }
 0x266   : > { %v1117_v11 = vpop.f32.mrf.mxu0 }
 0x267   : > { %v1118_v34 = vadd.f32 %v1117_v11, %v1024_v37 }
 0x268   : > { %v1119_v40 = vpop.f32.mrf.mxu0 }
 0x269   : > { %v1140_v12 = vmul.f32 0.70710677, %v1118_v34  ;;  %v1120_v19 = vadd.f32 %v1119_v40, %v1028_v48  ;;  %v1653_v61 = vpop.eup %1652  ;;  %v1132_v20 = vmul.f32 0.5, %v1118_v34 }
 0x26a   : > { %v1123_v25 = vpop.f32.mrf.mxu0  ;;  %v1152_v63 = vadd.f32 1.0, %v1653_v61 }
 0x26b   : > { %1660 = verf.f32 %v1140_v12  ;;  %v1141_v24 = vmul.f32 0.70710677, %v1120_v19  ;;  %v1655_v35 = vpop.eup %1654  ;;  %v1124_v62 = vadd.f32 %v1123_v25, %v1024_v37  ;;  %v1133_v29 = vmul.f32 0.5, %v1120_v19 }
 0x26c   : > { %v1125_v33 = vpop.f32.mrf.mxu0  ;;  %v1153_v30 = vadd.f32 1.0, %v1655_v35  ;;  %v1160_v57 = vmul.f32 %v1152_v63, %v1128_v2  ;;  %v1311_v37 = vstv %s1509_s6 }
 0x26d   : > { %1662 = verf.f32 %v1141_v24  ;;  %v1657_v1 = vpop.eup %1656  ;;  %v1142_v26 = vmul.f32 0.70710677, %v1124_v62  ;;  %v1126_v3 = vadd.f32 %v1125_v33, %v1028_v48  ;;  %v1134_v14 = vmul.f32 0.5, %v1124_v62  ;;  %v1507_v48 = vld [vmem:[%s2433_s11] ss:$0 sm:$0xff] }
 0x26e   : > { %v1161_v46 = vmul.f32 %v1153_v30, %v1129_v41  ;;  %v1154_v5 = vadd.f32 1.0, %v1657_v1  ;;  %v1312_v17 = vadd.s32 %v1311_v37, %v1916_v9  ;;  %v1313_v32 = vadd.s32 %v1311_v37, %v1310_v53 }
 0x26f   : > { %v1659_v49 = vpop.eup %1658  ;;  %1664 = verf.f32 %v1142_v26  ;;  %v1143_v4 = vmul.f32 0.70710677, %v1126_v3  ;;  %v1135_v22 = vmul.f32 0.5, %v1126_v3 }
 0x270   : > { %1271 = vmatprep.mubr.f32.mxu1 %v1161_v46  ;;  %v1155_v7 = vadd.f32 1.0, %v1659_v49  ;;  %v1162_v13 = vmul.f32 %v1154_v5, %v1130_v8  ;;  %vm1314_vm9 = vcmp.lt.s32.totalorder %v1312_v17, 40  ;;  %vm1315_vm10 = vcmp.lt.s32.totalorder %v1313_v32, 40 }
 0x271   : > { %1666 = verf.f32 %v1143_v4  ;;  %1272 = vmatmul.mubr.f32.vlgmr.msra.gmra.mxu1 %v1160_v57 }
 0x272   : > { %v1163_v10 = vmul.f32 %v1155_v7, %v1131_v6 }
 0x274   : > { %1276 = vmatprep.mubr.f32.mxu1 %v1163_v10 }
 0x275   : > { %1277 = vmatmul.mubr.f32.gmra.mxu1 %v1162_v13 }
 0x278   : > { %v1661_v16 = vpop.eup %1660 }
 0x279   : > { %v1156_v28 = vadd.f32 1.0, %v1661_v16 }
 0x27a   : > { %v1663_v27 = vpop.eup %1662 }
 0x27b   : > { %v1157_v31 = vadd.f32 1.0, %v1663_v27  ;;  %v1164_v42 = vmul.f32 %v1156_v28, %v1132_v20 }
 0x27c   : > { %v1665_v58 = vpop.eup %1664 }
 0x27d   : > { %v1165_v59 = vmul.f32 %v1157_v31, %v1133_v29  ;;  %v1158_v21 = vadd.f32 1.0, %v1665_v58 }
 0x27e   : > { %v1667_v43 = vpop.eup %1666 }
 0x27f   : > { %1281 = vmatprep.mubr.f32.mxu1 %v1165_v59  ;;  %v1159_v44 = vadd.f32 1.0, %v1667_v43  ;;  %v1166_v47 = vmul.f32 %v1158_v21, %v1134_v14 }
 0x280   : > { %1282 = vmatmul.mubr.f32.gmra.mxu1 %v1164_v42 }
 0x281   : > { %v1167_v45 = vmul.f32 %v1159_v44, %v1135_v22 }
 0x283   : > { %1286 = vmatprep.mubr.f32.mxu1 %v1167_v45 }
 0x284   : > { %1287 = vmatmul.mubr.f32.gmra.mxu1 %v1166_v47 }
 0x331   : > { %v1559_v36 = vpop.f32.mrf.mxu1 }
 0x333   : > { %v1560_v50 = vpop.f32.mrf.mxu1 }
 0x334   : > { %v1561_v51 = vadd.f32 %v1560_v50, %v1559_v36 }
 0x335   : > { %v1562_v52 = vpop.f32.mrf.mxu1 }
 0x336   : > { %v1274_v54 = vadd.f32 %v1561_v51, %v1507_v48 }
 0x337   : > { %v1563_v55 = vpop.f32.mrf.mxu1 }
 0x338   : > { %v1299_v56 = vmul.f32 %v1508_v39, %v1274_v54  ;;  %v1564_v60 = vadd.f32 %v1563_v55, %v1562_v52 }
 0x33a   : > { %v1303_v18 = vadd.f32 %v1299_v56, %v1934_v15  ;;  %v1279_v11 = vadd.f32 %v1564_v60, %v1507_v48 }
 0x33c   : > { %v1320_v34 = vsel %vm1314_vm9, %v1303_v18, 0.0  ;;  %v1300_v40 = vmul.f32 %v1508_v39, %v1279_v11 }
 0x33d   : > { %1324 = vst.msk [vmem:[%s2351_s18] sm:$0xff] %vm885_vm8, %v1320_v34 }
 0x33e   : > { %v1304_v9 = vadd.f32 %v1300_v40, %v1952_v23 }
 0x340   : > { %v1565_v12 = vpop.f32.mrf.mxu1  ;;  %v1321_v19 = vsel %vm1315_vm10, %v1304_v9, 0.0 }
 0x341   : > { %1325 = vst.msk [vmem:[%s2351_s18 + $0x8] sm:$0xff] %vm885_vm8, %v1321_v19 }
 0x342   : > { %v1566_v15 = vpop.f32.mrf.mxu1 }
 0x343   : > { %v1567_v61 = vadd.f32 %v1566_v15, %v1565_v12 }
 0x344   : > { %v1568_v25 = vpop.f32.mrf.mxu1 }
 0x345   : > { %v1284_v24 = vadd.f32 %v1567_v61, %v1507_v48 }
 0x346   : > { %v1569_v62 = vpop.f32.mrf.mxu1 }
 0x347   : > { %v1301_v35 = vmul.f32 %v1508_v39, %v1284_v24  ;;  %v1570_v63 = vadd.f32 %v1569_v62, %v1568_v25 }
 0x348   : > { %v1374_v26 = vld [vmem:[%s2351_s18 + $0x8] sm:$0xff] (%p1879_p0) }
 0x349   : > { %v1305_v33 = vadd.f32 %v1301_v35, %v2046_v38  ;;  %v1289_v41 = vadd.f32 %v1570_v63, %v1507_v48  ;;  %v1372_v38 = vld [vmem:[%s2351_s18] sm:$0xff] (%p1879_p0)  ;;  %1375 = vst [vmem:[%s1337_s17 + $0x8] sm:$0xff] (%p1879_p0), %v1374_v26 }
 0x34a   : > { %1373 = vst [vmem:[%s1337_s17] sm:$0xff] (%p1879_p0), %v1372_v38 }
 0x34b   : > { %v1322_v30 = vsel %vm1314_vm9, %v1305_v33, 0.0  ;;  %v1302_v23 = vmul.f32 %v1508_v39, %v1289_v41 }
 0x34c   : > { %1326 = vst.msk [vmem:[%s2351_s18 + $0x10] sm:$0xff] %vm885_vm8, %v1322_v30  ;;  %1334 = sbr.rel (!%p1879_p0) target bundleno = 857 (0x359), region = 186 }
 0x34d   : > { %v1306_v1 = vadd.f32 %v1302_v23, %v2080_v0 }
 0x34f   : > { %v1323_v2 = vsel %vm1315_vm10, %v1306_v1, 0.0 }
 0x350   : > { %1327 = vst.msk [vmem:[%s2351_s18 + $0x18] sm:$0xff] %vm885_vm8, %v1323_v2 }
 0x353   : > { %v1376_v0 = vld [vmem:[%s2351_s18 + $0x10] sm:$0xff] }
 0x354   : > { %1377 = vst [vmem:[%s1337_s17 + $0x30] sm:$0xff] %v1376_v0 }
 0x357   : > { %v1378_v3 = vld [vmem:[%s2351_s18 + $0x18] sm:$0xff] }
 0x358   : > { %1379 = vst [vmem:[%s1337_s17 + $0x38] sm:$0xff] %v1378_v3 }
 0x359 PF: > { %s2437_s27 = sld [smem:[#allocation7_spill]]  ;;  %s2441_s21 = smov %s1702_s22 }
 0x35a   : > { %s2438_s16 = sld [smem:[#allocation9_spill]]  ;;  %s2442_s22 = smov %s1886_s28 }
 0x35b   : > { %s2439_s25 = sld [smem:[#allocation6_spill]]  ;;  %s2443_s23 = smov %s1710_s24 }
 0x35c   : > { %s2440_s26 = sld [smem:[#allocation8_spill]] }
 0x35f   : > { %p19_p8 = scmp.ge.s32.totalorder %s2437_s27, 5  }
 0x360   : > { %s2444_s24 = smov %s2438_s16 }
 0x361   :  { %21 = sbr.rel (!%p19_p8) target bundleno = 10 (0xa), region = 271 }

// kernel: convnext_encoder_forward.9
= control target key start
LH: loop header
LB: loop body
LE: loop exit
PB: predicated region body
PF: predicated region fallthrough
CT: control target
= control target key end

     0   :  { %s505_s12 = smov 0   ;;  %s507_s13 = smov 0   ;;  %s587_s0 = inlined_call_operand.vmem [shape: f32[2,48,64], index: 0, kind: input, shape index: {}]   ;;  %s588_s1 = inlined_call_operand.vmem [shape: f32[1,64], index: 1, kind: input, shape index: {}]   ;;  %s589_s2 = inlined_call_operand.vmem [shape: f32[1,64], index: 2, kind: input, shape index: {}]   ;;  %s590_s3 = inlined_call_operand.vmem [shape: f32[2,48,64], index: 3, kind: output, shape index: {}]  }
   0x1   :  { %s509_s14 = smov 0  }
   0x2 LB: > { %s410_s15 = sadd.s32 4294967295, %s483_s14   ;;  %s522_s16 = sadd.s32 1, %s483_s14   ;;  %s483_s14 = sphi %s509_s14, %s594_s14   ;;  %s479_s13 = sphi %s507_s13, %s593_s13   ;;  %s475_s12 = sphi %s505_s12, %s592_s12  }
   0x3   : > { %s17_s17 = ssub.s32 %s483_s14, %s522_s16  ;;  %s20_s18 = sadd.s32 1, %s479_s13 }
   0x4   : > { %p18_p0 = scmp.eq.s32.totalorder %s17_s17, 0  ;;  %p27_p1 = scmp.ne.s32.totalorder %s479_s13, %s475_s12 }
   0x5   : > { %p28_p2 = scmp.eq.s32.totalorder %s483_s14, 0  ;;  %p99_p3 = scmp.eq.s32.totalorder %s410_s15, 2 }
   0x6   : > { %s533_s19 = scalar_select %p18_p0, %s479_s13, %s20_s18  }
   0x7   : > { %p29_p4 = por %p28_p2, %p27_p1  ;;  %p535_p5 = por %p99_p3, %p27_p1 }
   0x8   : > { %p413_p6 = scmp.ge.s32.totalorder %s483_s14, 3 }
   0xa   : > { %127 = sbr.rel (%p413_p6) target bundleno = 21 (0x15), region = 24 }
   0xf   : > { %130 = sbr.rel (!%p29_p4) target bundleno = 21 (0x15), region = 28  ;;  %s132_s21 = sand.u32 (%p29_p4), 1, %s479_s13  }
  0x10   : > { %s427_s22 = sshll.u32 (%p29_p4), %s483_s14, 4  ;;  %s414_s23 = sshll.u32 (%p29_p4), %s132_s21, 5 }
  0x11   : > { %s137_s26 = scalar_lea.vmem (%p29_p4), %s587_s0, %s427_s22  ;;  %s134_s27 = scalar_lea.vmem (%p29_p4), [#allocation2], %s414_s23 }
  0x12   : > { %v172_v0 = vld [vmem:[%s137_s26] sm:$0xff] (%p29_p4)  ;;  %v174_v1 = vld [vmem:[%s137_s26 + $0x8] sm:$0xff] (%p29_p4)  ;;  %v176_v2 = vld [vmem:[%s137_s26 + $0x30] sm:$0xff] (%p29_p4) }
  0x13   : > { %173 = vst [vmem:[%s134_s27] sm:$0xff] (%p29_p4), %v172_v0  ;;  %175 = vst [vmem:[%s134_s27 + $0x8] sm:$0xff] (%p29_p4), %v174_v1  ;;  %v178_v3 = vld [vmem:[%s137_s26 + $0x38] sm:$0xff] (%p29_p4) }
  0x14   : > { %177 = vst [vmem:[%s134_s27 + $0x10] sm:$0xff] %v176_v2  ;;  %179 = vst [vmem:[%s134_s27 + $0x18] sm:$0xff] %v178_v3 }
  0x15 PF: > { %p417_p7 = scmp.ge.s32.totalorder %s483_s14, 1  ;;  %p184_p8 = scmp.lt.s32.totalorder %s483_s14, 4 }
  0x17   : > { %p185_p9 = pnand %p417_p7, %p184_p8 }
  0x18   : > { %s191_s28 = sand.u32 (!%p185_p9), 1, %s475_s12  }
  0x19   : > { %188 = sbr.rel (%p185_p9) target bundleno = 356 (0x164), region = 66  ;;  %s548_s29 = sshll.u32 (!%p185_p9), %s191_s28, 5 }
  0x1a   : > { %s193_s30 = scalar_lea.vmem (!%p185_p9), [#allocation2], %s548_s29  ;;  %s212_s8 = scalar_lea.vmem (!%p185_p9), [#allocation3], %s548_s29 }
  0x1e   : > { %vm221_vm0 = vcmask 523264   ;;  %v215_v4 = vld [vmem:[%s193_s30] sm:$0xff]  ;;  %v217_v5 = vld [vmem:[%s193_s30 + $0x10] sm:$0xff]  ;;  %v216_v6 = vld [vmem:[%s193_s30 + $0x8] sm:$0xff]  ;;  %s428_s9 = sshll.u32 (%p535_p5), %s410_s15, 4 }
  0x1f   : > { %v222_v7 = vsel %vm221_vm0, %v215_v4, 0.0  ;;  %v228_v8 = vsel %vm221_vm0, %v217_v5, 0.0  ;;  %v218_v9 = vld [vmem:[%s193_s30 + $0x18] sm:$0xff]  ;;  %v225_v10 = vsel %vm221_vm0, %v216_v6, 0.0  ;;  %v420_v45 = vld [vmem:[%s588_s1] ss:$0 sm:$0xff]  ;;  %s308_s12 = scalar_lea.vmem (%p535_p5), %s590_s3, %s428_s9 }
  0x20   : > { %223 = vadd.xlane.f32.xlu0 %v222_v7  ;;  %229 = vadd.xlane.f32.xlu1 %v228_v8  ;;  %v231_v11 = vsel %vm221_vm0, %v218_v9, 0.0  ;;  %v421_v47 = vld [vmem:[%s589_s2] ss:$0 sm:$0xff] }
  0x24   : > { %226 = vadd.xlane.f32.xlu0 %v225_v10  ;;  %232 = vadd.xlane.f32.xlu1 %v231_v11 }
  0xa9   : > { %v224_v12 = vpop.xlane.xlu0 %223  ;;  %v230_v13 = vpop.xlane.xlu1 %229 }
  0xaa   : > { %v235_v14 = vmul.f32 0.015625, %v224_v12  ;;  %v237_v15 = vmul.f32 0.015625, %v230_v13 }
  0xac   : > { %v239_v16 = vsub.f32 %v215_v4, %v235_v14  ;;  %v241_v17 = vsub.f32 %v217_v5, %v237_v15 }
  0xad   : > { %v227_v18 = vpop.xlane.xlu0 %226  ;;  %v233_v19 = vpop.xlane.xlu1 %232 }
  0xae   : > { %v236_v20 = vmul.f32 0.015625, %v227_v18  ;;  %v238_v21 = vmul.f32 0.015625, %v233_v19  ;;  %v243_v22 = vmul.f32 %v239_v16, %v239_v16  ;;  %v245_v23 = vmul.f32 %v241_v17, %v241_v17 }
  0xb0   : > { %v240_v24 = vsub.f32 %v216_v6, %v236_v20  ;;  %v242_v25 = vsub.f32 %v218_v9, %v238_v21  ;;  %v247_v26 = vsel %vm221_vm0, %v243_v22, 0.0  ;;  %v253_v27 = vsel %vm221_vm0, %v245_v23, 0.0 }
  0xb1   : > { %248 = vadd.xlane.f32.xlu0 %v247_v26 }
  0xb2   : > { %v244_v28 = vmul.f32 %v240_v24, %v240_v24  ;;  %v246_v29 = vmul.f32 %v242_v25, %v242_v25 }
  0xb4   : > { %v250_v30 = vsel %vm221_vm0, %v244_v28, 0.0  ;;  %v256_v31 = vsel %vm221_vm0, %v246_v29, 0.0 }
  0xb5   : > { %254 = vadd.xlane.f32.xlu0 %v253_v27  ;;  %251 = vadd.xlane.f32.xlu1 %v250_v30 }
  0xb9   : > { %257 = vadd.xlane.f32.xlu1 %v256_v31 }
 0x13a   : > { %v249_v32 = vpop.xlane.xlu0 %248 }
 0x13b   : > { %v259_v33 = vmul.f32 0.015625, %v249_v32 }
 0x13d   : > { %v263_v34 = vadd.f32 1e-06, %v259_v33 }
 0x13e   : > { %v252_v35 = vpop.xlane.xlu1 %251  ;;  %v255_v36 = vpop.xlane.xlu0 %254 }
 0x13f   : > { %453 = vrsqrt.f32 %v263_v34  ;;  %v260_v37 = vmul.f32 0.015625, %v252_v35  ;;  %v261_v38 = vmul.f32 0.015625, %v255_v36 }
 0x141   : > { %v264_v39 = vadd.f32 1e-06, %v260_v37  ;;  %v265_v40 = vadd.f32 1e-06, %v261_v38 }
 0x142   : > { %v258_v41 = vpop.xlane.xlu1 %257 }
 0x143   : > { %455 = vrsqrt.f32 %v264_v39  ;;  %v262_v42 = vmul.f32 0.015625, %v258_v41 }
 0x144   : > { %457 = vrsqrt.f32 %v265_v40 }
 0x145   : > { %v266_v43 = vadd.f32 1e-06, %v262_v42 }
 0x147   : > { %459 = vrsqrt.f32 %v266_v43 }
 0x14c   : > { %v454_v44 = vpop.eup %453 }
 0x14d   : > { %v271_v46 = vmul.f32 %v454_v44, %v239_v16 }
 0x14f   : > { %v281_v48 = vmul.f32 %v420_v45, %v271_v46 }
 0x150   : > { %v456_v49 = vpop.eup %455 }
 0x151   : > { %v458_v50 = vpop.eup %457  ;;  %v291_v51 = vadd.f32 %v421_v47, %v281_v48  ;;  %v272_v52 = vmul.f32 %v456_v49, %v240_v24 }
 0x152   : > { %v273_v53 = vmul.f32 %v458_v50, %v241_v17 }
 0x153   : > { %295 = vst.msk [vmem:[%s212_s8] sm:$0xff] %vm221_vm0, %v291_v51  ;;  %v282_v54 = vmul.f32 %v420_v45, %v272_v52 }
 0x154   : > { %v460_v55 = vpop.eup %459  ;;  %v283_v56 = vmul.f32 %v420_v45, %v273_v53 }
 0x155   : > { %v292_v57 = vadd.f32 %v421_v47, %v282_v54  ;;  %v274_v58 = vmul.f32 %v460_v55, %v242_v25 }
 0x156   : > { %v293_v59 = vadd.f32 %v421_v47, %v283_v56 }
 0x157   : > { %296 = vst.msk [vmem:[%s212_s8 + $0x8] sm:$0xff] %vm221_vm0, %v292_v57  ;;  %v284_v60 = vmul.f32 %v420_v45, %v274_v58  ;;  %305 = sbr.rel (!%p535_p5) target bundleno = 356 (0x164), region = 74 }
 0x158   : > { %297 = vst.msk [vmem:[%s212_s8 + $0x10] sm:$0xff] %vm221_vm0, %v293_v59 }
 0x159   : > { %v294_v61 = vadd.f32 %v421_v47, %v284_v60 }
 0x15a   : > { %v343_v62 = vld [vmem:[%s212_s8] sm:$0xff] (%p535_p5) }
 0x15b   : > { %298 = vst.msk [vmem:[%s212_s8 + $0x18] sm:$0xff] %vm221_vm0, %v294_v61  ;;  %344 = vst [vmem:[%s308_s12] sm:$0xff] (%p535_p5), %v343_v62 }
 0x15e   : > { %v345_v63 = vld [vmem:[%s212_s8 + $0x8] sm:$0xff] }
 0x15f   : > { %v347_v0 = vld [vmem:[%s212_s8 + $0x10] sm:$0xff]  ;;  %346 = vst [vmem:[%s308_s12 + $0x8] sm:$0xff] %v345_v63 }
 0x160   : > { %348 = vst [vmem:[%s308_s12 + $0x30] sm:$0xff] %v347_v0 }
 0x162   : > { %v349_v1 = vld [vmem:[%s212_s8 + $0x18] sm:$0xff] }
 0x163   : > { %350 = vst [vmem:[%s308_s12 + $0x38] sm:$0xff] %v349_v1 }
 0x164 PF: > { %p10_p10 = scmp.ge.s32.totalorder %s522_s16, 5   ;;  %s592_s12 = smov %s479_s13 }
 0x165   : > { %s593_s13 = smov %s533_s19  ;;  %s594_s14 = smov %s522_s16 }
 0x166   :  { %12 = sbr.rel (!%p10_p10) target bundleno = 2 (0x2), region = 143 }

</bundles_post_ra>
